<compile_context>
chip_gen: v7x
topology: tpu7x:2x2x1
jax: 0.10.0
libtpu: 0.0.40
codegen_flags: <defaults>
</compile_context>

<pallas_src>
import functools

import jax
import jax.numpy as jnp
import numpy as np
from jax.experimental import pallas as pl
from jax.experimental.pallas import tpu as pltpu


def _round_up(a, m):
  return (a + m - 1) // m * m


# ----------------------------------------------------------------------------
# Fused forward kernel for one batch block.
# Activations are time-major flat: row r = t*B + b, with B a multiple of 8 so
# every static row offset (k*B, t*B, pad*B) is sublane-aligned.
# ----------------------------------------------------------------------------
def _fused_kernel(
    x_ref,
    ec1_w_ref, ec1_b_ref, ec2_w_ref, ec2_b_ref,
    e_wih0_ref, e_b0_ref, e_rec_ref, e_whh1_ref, e_b1_ref,
    d_wih0_ref, d_b0_ref, d_rec_ref, d_whh1_ref, d_b1_ref,
    dc1_w_ref, dc1_b_ref, dc2_w_ref, dc2_b_ref,
    y_ref,
    pad_in_s, pad_f_s, pad_h_s,
    *, B, T, K, H):
  f32 = jnp.float32
  N = B * T
  pad = K // 2
  P = pad * B                     # zero rows at each end of a padded buffer

  def sigmoid(z):
    # exact identity, numerically stable, single EUP tanh (no divide)
    return 0.5 * (jnp.tanh(0.5 * z) + 1.0)

  def lstm_gates(g, c_prev):
    # PyTorch gate order (i, f, g, o); c_prev=None means zero initial state.
    i = sigmoid(g[:, 0:H])
    f = sigmoid(g[:, H:2 * H])
    gg = jnp.tanh(g[:, 2 * H:3 * H])
    o = sigmoid(g[:, 3 * H:4 * H])
    c = i * gg if c_prev is None else f * c_prev + i * gg
    h = o * jnp.tanh(c)
    return h, c

  def conv_from_pad(pad_ref, w_ref, b_ref, relu):
    # 'same' Conv1d over time as K shifted matmuls on the whole [B*T, Cin]
    # block; time shift == row shift (offsets k*B are sublane-aligned).
    acc = jnp.dot(pad_ref[0:N, :], w_ref[0], preferred_element_type=f32)
    for k in range(1, K):         # K is a small static constant (3)
      acc = acc + jnp.dot(pad_ref[k * B:k * B + N, :], w_ref[k],
                          preferred_element_type=f32)
    acc = acc + b_ref[...]
    if relu:
      acc = jnp.maximum(acc, 0.0)
    return acc

  # Zero only the pad rows; data rows are always fully overwritten before use.
  for pad_ref in (pad_in_s, pad_f_s, pad_h_s):
    cols = pad_ref.shape[1]
    pad_ref[0:P, :] = jnp.zeros((P, cols), f32)
    pad_ref[P + N:P + N + P, :] = jnp.zeros((P, cols), f32)

  # ---- CNN encoder: Conv(Din->F)+ReLU, Conv(F->F)+ReLU ----
  pad_in_s[P:P + N, :] = x_ref[...].reshape(N, -1).astype(f32)
  h = conv_from_pad(pad_in_s, ec1_w_ref, ec1_b_ref, True)      # [N, F]
  pad_f_s[P:P + N, :] = h
  h = conv_from_pad(pad_f_s, ec2_w_ref, ec2_b_ref, True)       # [N, F]

  # ---- LSTM encoder (2 layers, zero init state). Layer-0 input projection is
  # hoisted out of the recurrence as one [N,F]x[F,4H] matmul and kept as a
  # value. Per step, the two matmuls that share h0 as LHS (Whh0 recurrence for
  # the *next* step and Wih1 for layer 1 now) are fused into one [H,8H] dot,
  # split at the lane-128 boundary. t=0 is peeled (zero state). ----
  gx = (jnp.dot(h, e_wih0_ref[...], preferred_element_type=f32)
        + e_b0_ref[...])                                       # [N, 4H]
  rec0 = None   # h0_{t-1} @ Whh0
  rec1 = None   # h1_{t-1} @ Whh1
  c0 = None
  c1 = None
  h1 = None
  for t in range(T):              # T is small & static -> full unroll
    g0 = gx[t * B:(t + 1) * B, :]
    if rec0 is not None:
      g0 = g0 + rec0
    h0, c0 = lstm_gates(g0, c0)
    if t < T - 1:
      fused = jnp.dot(h0, e_rec_ref[...], preferred_element_type=f32)  # [B,8H]
      rec0 = fused[:, 0:4 * H]
      in1 = fused[:, 4 * H:8 * H]
    else:
      in1 = jnp.dot(h0, e_rec_ref[:, 4 * H:8 * H], preferred_element_type=f32)
    g1 = in1 + e_b1_ref[...]
    if rec1 is not None:
      g1 = g1 + rec1
    h1, c1 = lstm_gates(g1, c1)
    if t < T - 1:
      rec1 = jnp.dot(h1, e_whh1_ref[...], preferred_element_type=f32)
  hn = h1                                                      # [B, H]

  # ---- LSTM decoder: input is hn repeated over T, so its layer-0 input
  # projection is one [B,H]x[H,4H] matmul reused every step. Same fused-h0 /
  # peeled-t0 structure; hidden states are written straight into the padded
  # buffer of the decoder conv (aligned row offsets). ----
  gx_dec = (jnp.dot(hn, d_wih0_ref[...], preferred_element_type=f32)
            + d_b0_ref[...])                                   # [B, 4H]
  rec0 = None
  rec1 = None
  c0 = None
  c1 = None
  for t in range(T):
    g0 = gx_dec if rec0 is None else gx_dec + rec0
    h0, c0 = lstm_gates(g0, c0)
    if t < T - 1:
      fused = jnp.dot(h0, d_rec_ref[...], preferred_element_type=f32)
      rec0 = fused[:, 0:4 * H]
      in1 = fused[:, 4 * H:8 * H]
    else:
      in1 = jnp.dot(h0, d_rec_ref[:, 4 * H:8 * H], preferred_element_type=f32)
    g1 = in1 + d_b1_ref[...]
    if rec1 is not None:
      g1 = g1 + rec1
    h1, c1 = lstm_gates(g1, c1)
    if t < T - 1:
      rec1 = jnp.dot(h1, d_whh1_ref[...], preferred_element_type=f32)
    pad_h_s[P + t * B:P + (t + 1) * B, :] = h1                 # time-major write

  # ---- CNN decoder: Conv(H->F)+ReLU, Conv(F->Din) ----
  o = conv_from_pad(pad_h_s, dc1_w_ref, dc1_b_ref, True)       # [N, F]
  pad_f_s[P:P + N, :] = o
  o = conv_from_pad(pad_f_s, dc2_w_ref, dc2_b_ref, False)      # [N, Din]
  y_ref[...] = o.reshape(T, B, -1).astype(y_ref.dtype)


# ----------------------------------------------------------------------------
# Wrapper: batch is padded to a multiple of the block size (itself a multiple
# of 8) and processed on a "parallel" grid axis over batch blocks. Weights use
# constant index_maps so they are DMA'd once and stay VMEM-resident.
# ----------------------------------------------------------------------------
def cnn_lstm_autoencoder_forward(x, params):
  B, T, Din = x.shape
  K = params["enc_c1_w"].shape[0]
  F = params["enc_c1_w"].shape[2]
  H = params["lstm_enc"]["whh0"].shape[0]
  pad = K // 2

  # Batch block size: multiple of 8 (sublane alignment), capped for VMEM.
  B_BLK = min(256, _round_up(max(B, 1), 8))
  B_pad = _round_up(B, B_BLK)
  if B_pad != B:
    x = jnp.concatenate(
        [x, jnp.zeros((B_pad - B, T, Din), x.dtype)], axis=0)

  # time-major layout [T, B_pad, Din]; batch (middle) axis is blocked.
  x_tm = jnp.transpose(x, (1, 0, 2))

  pe, pd = params["lstm_enc"], params["lstm_dec"]
  # Host-side fusion of the two matmuls that share h0 as LHS: [Whh0 | Wih1].
  e_rec = jnp.concatenate([pe["whh0"], pe["wih1"]], axis=1)    # [H, 8H]
  d_rec = jnp.concatenate([pd["whh0"], pd["wih1"]], axis=1)    # [H, 8H]

  weights = [
      params["enc_c1_w"], params["enc_c1_b"],
      params["enc_c2_w"], params["enc_c2_b"],
      pe["wih0"], pe["b0"], e_rec, pe["whh1"], pe["b1"],
      pd["wih0"], pd["b0"], d_rec, pd["whh1"], pd["b1"],
      params["dec_c1_w"], params["dec_c1_b"],
      params["dec_c2_w"], params["dec_c2_b"],
  ]

  def const_spec(a):
    # full-shape block, same block every grid step -> fetched once, kept in VMEM
    nd = a.ndim
    return pl.BlockSpec(a.shape, lambda b, _nd=nd: (0,) * _nd)

  kern = functools.partial(_fused_kernel, B=B_BLK, T=T, K=K, H=H)
  grid = (B_pad // B_BLK,)

  y_tm = pl.pallas_call(
      kern,
      out_shape=jax.ShapeDtypeStruct((T, B_pad, Din), x.dtype),
      grid_spec=pltpu.PrefetchScalarGridSpec(
          num_scalar_prefetch=0,
          grid=grid,
          in_specs=[pl.BlockSpec((T, B_BLK, Din), lambda b: (0, b, 0))]
                   + [const_spec(w) for w in weights],
          out_specs=pl.BlockSpec((T, B_BLK, Din), lambda b: (0, b, 0)),
          scratch_shapes=[
              pltpu.VMEM(((T + 2 * pad) * B_BLK, Din), jnp.float32),  # enc conv1 in
              pltpu.VMEM(((T + 2 * pad) * B_BLK, F), jnp.float32),    # F-wide conv in
              pltpu.VMEM(((T + 2 * pad) * B_BLK, H), jnp.float32),    # dec conv1 in
          ]),
      compiler_params=pltpu.CompilerParams(
          dimension_semantics=("parallel",),
          vmem_limit_bytes=32 * 1024 * 1024),
  )(x_tm, *weights)

  y = jnp.transpose(y_tm, (1, 0, 2))
  return y[:B] if B_pad != B else y


# ----------------------------------------------------------------------------
# Deterministic parameter init (PyTorch-style U(-1/sqrt(fan), 1/sqrt(fan))).
# Conv weights stored as [K, Cin, Cout]; LSTM gate order (i, f, g, o);
# b = b_ih + b_hh folded.
# ----------------------------------------------------------------------------
def init_params(key, input_dim, hidden_dim, cnn_filters, kernel_size):
  keys = iter(jax.random.split(key, 64))

  def uni(shape, fan):
    s = 1.0 / np.sqrt(fan)
    return jax.random.uniform(next(keys), shape, jnp.float32, -s, s)

  K = kernel_size
  H = hidden_dim
  F = cnn_filters

  def lstm_layer_params(in_size):
    return dict(
        wih=uni((in_size, 4 * H), H),
        whh=uni((H, 4 * H), H),
        b=uni((1, 4 * H), H) + uni((1, 4 * H), H),
    )

  def lstm_params(in_size):
    l0 = lstm_layer_params(in_size)
    l1 = lstm_layer_params(H)
    return dict(wih0=l0["wih"], whh0=l0["whh"], b0=l0["b"],
                wih1=l1["wih"], whh1=l1["whh"], b1=l1["b"])

  return dict(
      enc_c1_w=uni((K, input_dim, F), input_dim * K),
      enc_c1_b=uni((1, F), input_dim * K),
      enc_c2_w=uni((K, F, F), F * K),
      enc_c2_b=uni((1, F), F * K),
      lstm_enc=lstm_params(F),
      lstm_dec=lstm_params(H),
      dec_c1_w=uni((K, H, F), H * K),
      dec_c1_b=uni((1, F), H * K),
      dec_c2_w=uni((K, F, input_dim), F * K),
      dec_c2_b=uni((1, input_dim), F * K),
  )


# ----------------------------------------------------------------------------
# Pure-JAX reference (same math, natural [B,T,C] layout, full-f32 matmuls).
# ----------------------------------------------------------------------------
_HP = jax.lax.Precision.HIGHEST


def _conv_ref(x, w, b, relu):
  K = w.shape[0]
  pad = K // 2
  T = x.shape[1]
  xp = jnp.pad(x, ((0, 0), (pad, pad), (0, 0)))
  out = sum(jnp.einsum("btc,cd->btd", xp[:, k:k + T, :], w[k], precision=_HP)
            for k in range(K))
  out = out + b[0]
  return jnp.maximum(out, 0.0) if relu else out


def _lstm2_ref(x, p):
  B, T, _ = x.shape
  H = p["whh0"].shape[0]
  h0 = jnp.zeros((B, H)); c0 = jnp.zeros((B, H))
  h1 = jnp.zeros((B, H)); c1 = jnp.zeros((B, H))

  def cell(xt, h, c, wih, whh, b):
    g = (jnp.dot(xt, wih, precision=_HP) + jnp.dot(h, whh, precision=_HP) + b[0])
    i = jax.nn.sigmoid(g[:, :H]); f = jax.nn.sigmoid(g[:, H:2 * H])
    gg = jnp.tanh(g[:, 2 * H:3 * H]); o = jax.nn.sigmoid(g[:, 3 * H:])
    c = f * c + i * gg
    h = o * jnp.tanh(c)
    return h, c

  seq = []
  for t in range(T):
    h0, c0 = cell(x[:, t], h0, c0, p["wih0"], p["whh0"], p["b0"])
    h1, c1 = cell(h0, h1, c1, p["wih1"], p["whh1"], p["b1"])
    seq.append(h1)
  return jnp.stack(seq, axis=1), h1


def _forward_ref(x, params):
  B, T, _ = x.shape
  h = _conv_ref(x, params["enc_c1_w"], params["enc_c1_b"], True)
  h = _conv_ref(h, params["enc_c2_w"], params["enc_c2_b"], True)
  _, hn = _lstm2_ref(h, params["lstm_enc"])
  dec_in = jnp.broadcast_to(hn[:, None, :], (B, T, hn.shape[-1]))
  dec_seq, _ = _lstm2_ref(dec_in, params["lstm_dec"])
  o = _conv_ref(dec_seq, params["dec_c1_w"], params["dec_c1_b"], True)
  o = _conv_ref(o, params["dec_c2_w"], params["dec_c2_b"], False)
  return o


if __name__ == "__main__":
  # small shapes consistent with the module's forward: x is [batch, seq, input_dim]
  B, T = 2, 8
  INPUT_DIM, HIDDEN_DIM, LAYER_DIM, CNN_FILTERS, KSIZE = 4, 32, 2, 32, 3

  key = jax.random.PRNGKey(0)
  kx, kp = jax.random.split(key)
  x = jax.random.normal(kx, (B, T, INPUT_DIM), jnp.float32)
  params = init_params(kp, INPUT_DIM, HIDDEN_DIM, CNN_FILTERS, KSIZE)

  y = jax.jit(cnn_lstm_autoencoder_forward)(x, params)
  y = jax.block_until_ready(y)

  assert y.shape == x.shape and y.dtype == x.dtype

  y_ref = jax.block_until_ready(_forward_ref(x, params))
  np.testing.assert_allclose(np.asarray(y), np.asarray(y_ref),
                             rtol=1e-4, atol=1e-4)

  print("KERNEL_OK")
</pallas_src>

<mosaic_0001>
module attributes {stable_mosaic.version = 11 : i64} {
  func.func @_fused_kernel(%arg0: i32, %arg1: memref<8x8x4xf32, #tpu.memory_space<vmem>>, %arg2: memref<3x4x32xf32, #tpu.memory_space<vmem>>, %arg3: memref<1x32xf32, #tpu.memory_space<vmem>>, %arg4: memref<3x32x32xf32, #tpu.memory_space<vmem>>, %arg5: memref<1x32xf32, #tpu.memory_space<vmem>>, %arg6: memref<32x128xf32, #tpu.memory_space<vmem>>, %arg7: memref<1x128xf32, #tpu.memory_space<vmem>>, %arg8: memref<32x256xf32, #tpu.memory_space<vmem>>, %arg9: memref<32x128xf32, #tpu.memory_space<vmem>>, %arg10: memref<1x128xf32, #tpu.memory_space<vmem>>, %arg11: memref<32x128xf32, #tpu.memory_space<vmem>>, %arg12: memref<1x128xf32, #tpu.memory_space<vmem>>, %arg13: memref<32x256xf32, #tpu.memory_space<vmem>>, %arg14: memref<32x128xf32, #tpu.memory_space<vmem>>, %arg15: memref<1x128xf32, #tpu.memory_space<vmem>>, %arg16: memref<3x32x32xf32, #tpu.memory_space<vmem>>, %arg17: memref<1x32xf32, #tpu.memory_space<vmem>>, %arg18: memref<3x32x4xf32, #tpu.memory_space<vmem>>, %arg19: memref<1x4xf32, #tpu.memory_space<vmem>>, %arg20: memref<8x8x4xf32, #tpu.memory_space<vmem>>, %arg21: memref<80x4xf32, #tpu.memory_space<vmem>>, %arg22: memref<80x32xf32, #tpu.memory_space<vmem>>, %arg23: memref<80x32xf32, #tpu.memory_space<vmem>>) attributes {dimension_semantics = [#tpu.dimension_semantics<parallel>], iteration_bounds = array<i64: 1>, scalar_prefetch = 0 : i64, scratch_operands = 3 : i64, tpu.core_type = #tpu.core_type<tc>, window_params = [{transform_indices = @transform_0, window_bounds = array<i64: 8, 8, 4>}, {pipeline_mode = #tpu.pipeline_mode<synchronous>, transform_indices = @transform_1, window_bounds = array<i64: 3, 4, 32>}, {pipeline_mode = #tpu.pipeline_mode<synchronous>, transform_indices = @transform_2, window_bounds = array<i64: 1, 32>}, {pipeline_mode = #tpu.pipeline_mode<synchronous>, transform_indices = @transform_3, window_bounds = array<i64: 3, 32, 32>}, {pipeline_mode = #tpu.pipeline_mode<synchronous>, transform_indices = @transform_4, window_bounds = array<i64: 1, 32>}, {pipeline_mode = #tpu.pipeline_mode<synchronous>, transform_indices = @transform_5, window_bounds = array<i64: 32, 128>}, {pipeline_mode = #tpu.pipeline_mode<synchronous>, transform_indices = @transform_6, window_bounds = array<i64: 1, 128>}, {pipeline_mode = #tpu.pipeline_mode<synchronous>, transform_indices = @transform_7, window_bounds = array<i64: 32, 256>}, {pipeline_mode = #tpu.pipeline_mode<synchronous>, transform_indices = @transform_8, window_bounds = array<i64: 32, 128>}, {pipeline_mode = #tpu.pipeline_mode<synchronous>, transform_indices = @transform_9, window_bounds = array<i64: 1, 128>}, {pipeline_mode = #tpu.pipeline_mode<synchronous>, transform_indices = @transform_10, window_bounds = array<i64: 32, 128>}, {pipeline_mode = #tpu.pipeline_mode<synchronous>, transform_indices = @transform_11, window_bounds = array<i64: 1, 128>}, {pipeline_mode = #tpu.pipeline_mode<synchronous>, transform_indices = @transform_12, window_bounds = array<i64: 32, 256>}, {pipeline_mode = #tpu.pipeline_mode<synchronous>, transform_indices = @transform_13, window_bounds = array<i64: 32, 128>}, {pipeline_mode = #tpu.pipeline_mode<synchronous>, transform_indices = @transform_14, window_bounds = array<i64: 1, 128>}, {pipeline_mode = #tpu.pipeline_mode<synchronous>, transform_indices = @transform_15, window_bounds = array<i64: 3, 32, 32>}, {pipeline_mode = #tpu.pipeline_mode<synchronous>, transform_indices = @transform_16, window_bounds = array<i64: 1, 32>}, {pipeline_mode = #tpu.pipeline_mode<synchronous>, transform_indices = @transform_17, window_bounds = array<i64: 3, 32, 4>}, {pipeline_mode = #tpu.pipeline_mode<synchronous>, transform_indices = @transform_18, window_bounds = array<i64: 1, 4>}, {transform_indices = @transform_19, window_bounds = array<i64: 8, 8, 4>}]} {
    %cst = arith.constant 0.000000e+00 : f32
    %0 = vector.broadcast %cst : f32 to vector<8x4xf32>
    %c0 = arith.constant 0 : index
    %c0_0 = arith.constant 0 : index
    %1 = vector.load %arg21[%c0, %c0_0] : memref<80x4xf32, #tpu.memory_space<vmem>>, vector<8x4xf32>
    tpu.vector_store %arg21[%c0, %c0_0], %0 {strides = array<i32>} : memref<80x4xf32, #tpu.memory_space<vmem>>, vector<8x4xf32>,
    %cst_1 = arith.constant 0.000000e+00 : f32
    %2 = vector.broadcast %cst_1 : f32 to vector<8x4xf32>
    %c72 = arith.constant 72 : index
    %c0_2 = arith.constant 0 : index
    %3 = vector.load %arg21[%c72, %c0_2] : memref<80x4xf32, #tpu.memory_space<vmem>>, vector<8x4xf32>
    tpu.vector_store %arg21[%c72, %c0_2], %2 {strides = array<i32>} : memref<80x4xf32, #tpu.memory_space<vmem>>, vector<8x4xf32>,
    %cst_3 = arith.constant 0.000000e+00 : f32
    %4 = vector.broadcast %cst_3 : f32 to vector<8x32xf32>
    %c0_4 = arith.constant 0 : index
    %c0_5 = arith.constant 0 : index
    %5 = vector.load %arg22[%c0_4, %c0_5] : memref<80x32xf32, #tpu.memory_space<vmem>>, vector<8x32xf32>
    tpu.vector_store %arg22[%c0_4, %c0_5], %4 {strides = array<i32>} : memref<80x32xf32, #tpu.memory_space<vmem>>, vector<8x32xf32>,
    %cst_6 = arith.constant 0.000000e+00 : f32
    %6 = vector.broadcast %cst_6 : f32 to vector<8x32xf32>
    %c72_7 = arith.constant 72 : index
    %c0_8 = arith.constant 0 : index
    %7 = vector.load %arg22[%c72_7, %c0_8] : memref<80x32xf32, #tpu.memory_space<vmem>>, vector<8x32xf32>
    tpu.vector_store %arg22[%c72_7, %c0_8], %6 {strides = array<i32>} : memref<80x32xf32, #tpu.memory_space<vmem>>, vector<8x32xf32>,
    %cst_9 = arith.constant 0.000000e+00 : f32
    %8 = vector.broadcast %cst_9 : f32 to vector<8x32xf32>
    %c0_10 = arith.constant 0 : index
    %c0_11 = arith.constant 0 : index
    %9 = vector.load %arg23[%c0_10, %c0_11] : memref<80x32xf32, #tpu.memory_space<vmem>>, vector<8x32xf32>
    tpu.vector_store %arg23[%c0_10, %c0_11], %8 {strides = array<i32>} : memref<80x32xf32, #tpu.memory_space<vmem>>, vector<8x32xf32>,
    %cst_12 = arith.constant 0.000000e+00 : f32
    %10 = vector.broadcast %cst_12 : f32 to vector<8x32xf32>
    %c72_13 = arith.constant 72 : index
    %c0_14 = arith.constant 0 : index
    %11 = vector.load %arg23[%c72_13, %c0_14] : memref<80x32xf32, #tpu.memory_space<vmem>>, vector<8x32xf32>
    tpu.vector_store %arg23[%c72_13, %c0_14], %10 {strides = array<i32>} : memref<80x32xf32, #tpu.memory_space<vmem>>, vector<8x32xf32>,
    %c0_15 = arith.constant 0 : index
    %c0_16 = arith.constant 0 : index
    %c0_17 = arith.constant 0 : index
    %12 = vector.load %arg1[%c0_15, %c0_16, %c0_17] : memref<8x8x4xf32, #tpu.memory_space<vmem>>, vector<8x8x4xf32>
    %13 = vector.shape_cast %12 : vector<8x8x4xf32> to vector<64x4xf32>
    %c8 = arith.constant 8 : index
    %c0_18 = arith.constant 0 : index
    %14 = vector.load %arg21[%c8, %c0_18] : memref<80x4xf32, #tpu.memory_space<vmem>>, vector<64x4xf32>
    tpu.vector_store %arg21[%c8, %c0_18], %13 {strides = array<i32>} : memref<80x4xf32, #tpu.memory_space<vmem>>, vector<64x4xf32>,
    %c0_19 = arith.constant 0 : index
    %c0_20 = arith.constant 0 : index
    %15 = vector.load %arg21[%c0_19, %c0_20] : memref<80x4xf32, #tpu.memory_space<vmem>>, vector<64x4xf32>
    %c0_21 = arith.constant 0 : index
    %c0_22 = arith.constant 0 : index
    %c0_23 = arith.constant 0 : index
    %16 = vector.load %arg2[%c0_21, %c0_22, %c0_23] : memref<3x4x32xf32, #tpu.memory_space<vmem>>, vector<1x4x32xf32>
    %17 = vector.shape_cast %16 : vector<1x4x32xf32> to vector<4x32xf32>
    %cst_24 = arith.constant dense<0.000000e+00> : vector<64x32xf32>
    %18 = tpu.matmul %15, %17, %cst_24 {dimension_numbers = #tpu.dot_dimension_numbers<[1], [0], [0], [1], [0, 0, 1, 1], [], []>} : vector<64x4xf32>, vector<4x32xf32>, vector<64x32xf32> -> vector<64x32xf32>
    %c8_25 = arith.constant 8 : index
    %c0_26 = arith.constant 0 : index
    %19 = vector.load %arg21[%c8_25, %c0_26] : memref<80x4xf32, #tpu.memory_space<vmem>>, vector<64x4xf32>
    %c1 = arith.constant 1 : index
    %c0_27 = arith.constant 0 : index
    %c0_28 = arith.constant 0 : index
    %20 = vector.load %arg2[%c1, %c0_27, %c0_28] : memref<3x4x32xf32, #tpu.memory_space<vmem>>, vector<1x4x32xf32>
    %21 = vector.shape_cast %20 : vector<1x4x32xf32> to vector<4x32xf32>
    %cst_29 = arith.constant dense<0.000000e+00> : vector<64x32xf32>
    %22 = tpu.matmul %19, %21, %cst_29 {dimension_numbers = #tpu.dot_dimension_numbers<[1], [0], [0], [1], [0, 0, 1, 1], [], []>} : vector<64x4xf32>, vector<4x32xf32>, vector<64x32xf32> -> vector<64x32xf32>
    %23 = arith.addf %18, %22 : vector<64x32xf32>
    %c16 = arith.constant 16 : index
    %c0_30 = arith.constant 0 : index
    %24 = vector.load %arg21[%c16, %c0_30] : memref<80x4xf32, #tpu.memory_space<vmem>>, vector<64x4xf32>
    %c2 = arith.constant 2 : index
    %c0_31 = arith.constant 0 : index
    %c0_32 = arith.constant 0 : index
    %25 = vector.load %arg2[%c2, %c0_31, %c0_32] : memref<3x4x32xf32, #tpu.memory_space<vmem>>, vector<1x4x32xf32>
    %26 = vector.shape_cast %25 : vector<1x4x32xf32> to vector<4x32xf32>
    %cst_33 = arith.constant dense<0.000000e+00> : vector<64x32xf32>
    %27 = tpu.matmul %24, %26, %cst_33 {dimension_numbers = #tpu.dot_dimension_numbers<[1], [0], [0], [1], [0, 0, 1, 1], [], []>} : vector<64x4xf32>, vector<4x32xf32>, vector<64x32xf32> -> vector<64x32xf32>
    %28 = arith.addf %23, %27 : vector<64x32xf32>
    %c0_34 = arith.constant 0 : index
    %c0_35 = arith.constant 0 : index
    %29 = vector.load %arg3[%c0_34, %c0_35] : memref<1x32xf32, #tpu.memory_space<vmem>>, vector<1x32xf32>
    %30 = vector.broadcast %29 : vector<1x32xf32> to vector<64x32xf32>
    %31 = arith.addf %28, %30 : vector<64x32xf32>
    %cst_36 = arith.constant 0.000000e+00 : f32
    %32 = vector.broadcast %cst_36 : f32 to vector<64x32xf32>
    %33 = arith.maximumf %31, %32 : vector<64x32xf32>
    %c8_37 = arith.constant 8 : index
    %c0_38 = arith.constant 0 : index
    %34 = vector.load %arg22[%c8_37, %c0_38] : memref<80x32xf32, #tpu.memory_space<vmem>>, vector<64x32xf32>
    tpu.vector_store %arg22[%c8_37, %c0_38], %33 {strides = array<i32>} : memref<80x32xf32, #tpu.memory_space<vmem>>, vector<64x32xf32>,
    %c0_39 = arith.constant 0 : index
    %c0_40 = arith.constant 0 : index
    %35 = vector.load %arg22[%c0_39, %c0_40] : memref<80x32xf32, #tpu.memory_space<vmem>>, vector<64x32xf32>
    %c0_41 = arith.constant 0 : index
    %c0_42 = arith.constant 0 : index
    %c0_43 = arith.constant 0 : index
    %36 = vector.load %arg4[%c0_41, %c0_42, %c0_43] : memref<3x32x32xf32, #tpu.memory_space<vmem>>, vector<1x32x32xf32>
    %37 = vector.shape_cast %36 : vector<1x32x32xf32> to vector<32x32xf32>
    %cst_44 = arith.constant dense<0.000000e+00> : vector<64x32xf32>
    %38 = tpu.matmul %35, %37, %cst_44 {dimension_numbers = #tpu.dot_dimension_numbers<[1], [0], [0], [1], [0, 0, 1, 1], [], []>} : vector<64x32xf32>, vector<32x32xf32>, vector<64x32xf32> -> vector<64x32xf32>
    %c8_45 = arith.constant 8 : index
    %c0_46 = arith.constant 0 : index
    %39 = vector.load %arg22[%c8_45, %c0_46] : memref<80x32xf32, #tpu.memory_space<vmem>>, vector<64x32xf32>
    %c1_47 = arith.constant 1 : index
    %c0_48 = arith.constant 0 : index
    %c0_49 = arith.constant 0 : index
    %40 = vector.load %arg4[%c1_47, %c0_48, %c0_49] : memref<3x32x32xf32, #tpu.memory_space<vmem>>, vector<1x32x32xf32>
    %41 = vector.shape_cast %40 : vector<1x32x32xf32> to vector<32x32xf32>
    %cst_50 = arith.constant dense<0.000000e+00> : vector<64x32xf32>
    %42 = tpu.matmul %39, %41, %cst_50 {dimension_numbers = #tpu.dot_dimension_numbers<[1], [0], [0], [1], [0, 0, 1, 1], [], []>} : vector<64x32xf32>, vector<32x32xf32>, vector<64x32xf32> -> vector<64x32xf32>
    %43 = arith.addf %38, %42 : vector<64x32xf32>
    %c16_51 = arith.constant 16 : index
    %c0_52 = arith.constant 0 : index
    %44 = vector.load %arg22[%c16_51, %c0_52] : memref<80x32xf32, #tpu.memory_space<vmem>>, vector<64x32xf32>
    %c2_53 = arith.constant 2 : index
    %c0_54 = arith.constant 0 : index
    %c0_55 = arith.constant 0 : index
    %45 = vector.load %arg4[%c2_53, %c0_54, %c0_55] : memref<3x32x32xf32, #tpu.memory_space<vmem>>, vector<1x32x32xf32>
    %46 = vector.shape_cast %45 : vector<1x32x32xf32> to vector<32x32xf32>
    %cst_56 = arith.constant dense<0.000000e+00> : vector<64x32xf32>
    %47 = tpu.matmul %44, %46, %cst_56 {dimension_numbers = #tpu.dot_dimension_numbers<[1], [0], [0], [1], [0, 0, 1, 1], [], []>} : vector<64x32xf32>, vector<32x32xf32>, vector<64x32xf32> -> vector<64x32xf32>
    %48 = arith.addf %43, %47 : vector<64x32xf32>
    %c0_57 = arith.constant 0 : index
    %c0_58 = arith.constant 0 : index
    %49 = vector.load %arg5[%c0_57, %c0_58] : memref<1x32xf32, #tpu.memory_space<vmem>>, vector<1x32xf32>
    %50 = vector.broadcast %49 : vector<1x32xf32> to vector<64x32xf32>
    %51 = arith.addf %48, %50 : vector<64x32xf32>
    %cst_59 = arith.constant 0.000000e+00 : f32
    %52 = vector.broadcast %cst_59 : f32 to vector<64x32xf32>
    %53 = arith.maximumf %51, %52 : vector<64x32xf32>
    %c0_60 = arith.constant 0 : index
    %c0_61 = arith.constant 0 : index
    %54 = vector.load %arg6[%c0_60, %c0_61] : memref<32x128xf32, #tpu.memory_space<vmem>>, vector<32x128xf32>
    %cst_62 = arith.constant dense<0.000000e+00> : vector<64x128xf32>
    %55 = tpu.matmul %53, %54, %cst_62 {dimension_numbers = #tpu.dot_dimension_numbers<[1], [0], [0], [1], [0, 0, 1, 1], [], []>} : vector<64x32xf32>, vector<32x128xf32>, vector<64x128xf32> -> vector<64x128xf32>
    %c0_63 = arith.constant 0 : index
    %c0_64 = arith.constant 0 : index
    %56 = vector.load %arg7[%c0_63, %c0_64] : memref<1x128xf32, #tpu.memory_space<vmem>>, vector<1x128xf32>
    %57 = vector.broadcast %56 : vector<1x128xf32> to vector<64x128xf32>
    %58 = arith.addf %55, %57 : vector<64x128xf32>
    %59 = vector.extract_strided_slice %58 {offsets = [0, 0], sizes = [8, 128], strides = [1, 1]} : vector<64x128xf32> to vector<8x128xf32>
    %60 = vector.extract_strided_slice %59 {offsets = [0, 0], sizes = [8, 32], strides = [1, 1]} : vector<8x128xf32> to vector<8x32xf32>
    %cst_65 = arith.constant 5.000000e-01 : f32
    %61 = vector.broadcast %cst_65 : f32 to vector<8x32xf32>
    %62 = arith.mulf %61, %60 : vector<8x32xf32>
    %63 = math.tanh %62 : vector<8x32xf32>
    %cst_66 = arith.constant 1.000000e+00 : f32
    %64 = vector.broadcast %cst_66 : f32 to vector<8x32xf32>
    %65 = arith.addf %63, %64 : vector<8x32xf32>
    %cst_67 = arith.constant 5.000000e-01 : f32
    %66 = vector.broadcast %cst_67 : f32 to vector<8x32xf32>
    %67 = arith.mulf %66, %65 : vector<8x32xf32>
    %68 = vector.extract_strided_slice %59 {offsets = [0, 64], sizes = [8, 32], strides = [1, 1]} : vector<8x128xf32> to vector<8x32xf32>
    %69 = math.tanh %68 : vector<8x32xf32>
    %70 = vector.extract_strided_slice %59 {offsets = [0, 96], sizes = [8, 32], strides = [1, 1]} : vector<8x128xf32> to vector<8x32xf32>
    %cst_68 = arith.constant 5.000000e-01 : f32
    %71 = vector.broadcast %cst_68 : f32 to vector<8x32xf32>
    %72 = arith.mulf %71, %70 : vector<8x32xf32>
    %73 = math.tanh %72 : vector<8x32xf32>
    %cst_69 = arith.constant 1.000000e+00 : f32
    %74 = vector.broadcast %cst_69 : f32 to vector<8x32xf32>
    %75 = arith.addf %73, %74 : vector<8x32xf32>
    %cst_70 = arith.constant 5.000000e-01 : f32
    %76 = vector.broadcast %cst_70 : f32 to vector<8x32xf32>
    %77 = arith.mulf %76, %75 : vector<8x32xf32>
    %78 = arith.mulf %67, %69 : vector<8x32xf32>
    %79 = math.tanh %78 : vector<8x32xf32>
    %80 = arith.mulf %77, %79 : vector<8x32xf32>
    %c0_71 = arith.constant 0 : index
    %c0_72 = arith.constant 0 : index
    %81 = vector.load %arg8[%c0_71, %c0_72] : memref<32x256xf32, #tpu.memory_space<vmem>>, vector<32x256xf32>
    %cst_73 = arith.constant dense<0.000000e+00> : vector<8x256xf32>
    %82 = tpu.matmul %80, %81, %cst_73 {dimension_numbers = #tpu.dot_dimension_numbers<[1], [0], [0], [1], [0, 0, 1, 1], [], []>} : vector<8x32xf32>, vector<32x256xf32>, vector<8x256xf32> -> vector<8x256xf32>
    %83 = vector.extract_strided_slice %82 {offsets = [0, 0], sizes = [8, 128], strides = [1, 1]} : vector<8x256xf32> to vector<8x128xf32>
    %84 = vector.extract_strided_slice %82 {offsets = [0, 128], sizes = [8, 128], strides = [1, 1]} : vector<8x256xf32> to vector<8x128xf32>
    %c0_74 = arith.constant 0 : index
    %c0_75 = arith.constant 0 : index
    %85 = vector.load %arg10[%c0_74, %c0_75] : memref<1x128xf32, #tpu.memory_space<vmem>>, vector<1x128xf32>
    %86 = vector.broadcast %85 : vector<1x128xf32> to vector<8x128xf32>
    %87 = arith.addf %84, %86 : vector<8x128xf32>
    %88 = vector.extract_strided_slice %87 {offsets = [0, 0], sizes = [8, 32], strides = [1, 1]} : vector<8x128xf32> to vector<8x32xf32>
    %cst_76 = arith.constant 5.000000e-01 : f32
    %89 = vector.broadcast %cst_76 : f32 to vector<8x32xf32>
    %90 = arith.mulf %89, %88 : vector<8x32xf32>
    %91 = math.tanh %90 : vector<8x32xf32>
    %cst_77 = arith.constant 1.000000e+00 : f32
    %92 = vector.broadcast %cst_77 : f32 to vector<8x32xf32>
    %93 = arith.addf %91, %92 : vector<8x32xf32>
    %cst_78 = arith.constant 5.000000e-01 : f32
    %94 = vector.broadcast %cst_78 : f32 to vector<8x32xf32>
    %95 = arith.mulf %94, %93 : vector<8x32xf32>
    %96 = vector.extract_strided_slice %87 {offsets = [0, 64], sizes = [8, 32], strides = [1, 1]} : vector<8x128xf32> to vector<8x32xf32>
    %97 = math.tanh %96 : vector<8x32xf32>
    %98 = vector.extract_strided_slice %87 {offsets = [0, 96], sizes = [8, 32], strides = [1, 1]} : vector<8x128xf32> to vector<8x32xf32>
    %cst_79 = arith.constant 5.000000e-01 : f32
    %99 = vector.broadcast %cst_79 : f32 to vector<8x32xf32>
    %100 = arith.mulf %99, %98 : vector<8x32xf32>
    %101 = math.tanh %100 : vector<8x32xf32>
    %cst_80 = arith.constant 1.000000e+00 : f32
    %102 = vector.broadcast %cst_80 : f32 to vector<8x32xf32>
    %103 = arith.addf %101, %102 : vector<8x32xf32>
    %cst_81 = arith.constant 5.000000e-01 : f32
    %104 = vector.broadcast %cst_81 : f32 to vector<8x32xf32>
    %105 = arith.mulf %104, %103 : vector<8x32xf32>
    %106 = arith.mulf %95, %97 : vector<8x32xf32>
    %107 = math.tanh %106 : vector<8x32xf32>
    %108 = arith.mulf %105, %107 : vector<8x32xf32>
    %c0_82 = arith.constant 0 : index
    %c0_83 = arith.constant 0 : index
    %109 = vector.load %arg9[%c0_82, %c0_83] : memref<32x128xf32, #tpu.memory_space<vmem>>, vector<32x128xf32>
    %cst_84 = arith.constant dense<0.000000e+00> : vector<8x128xf32>
    %110 = tpu.matmul %108, %109, %cst_84 {dimension_numbers = #tpu.dot_dimension_numbers<[1], [0], [0], [1], [0, 0, 1, 1], [], []>} : vector<8x32xf32>, vector<32x128xf32>, vector<8x128xf32> -> vector<8x128xf32>
    %111 = vector.extract_strided_slice %58 {offsets = [8, 0], sizes = [8, 128], strides = [1, 1]} : vector<64x128xf32> to vector<8x128xf32>
    %112 = arith.addf %111, %83 : vector<8x128xf32>
    %113 = vector.extract_strided_slice %112 {offsets = [0, 0], sizes = [8, 32], strides = [1, 1]} : vector<8x128xf32> to vector<8x32xf32>
    %cst_85 = arith.constant 5.000000e-01 : f32
    %114 = vector.broadcast %cst_85 : f32 to vector<8x32xf32>
    %115 = arith.mulf %114, %113 : vector<8x32xf32>
    %116 = math.tanh %115 : vector<8x32xf32>
    %cst_86 = arith.constant 1.000000e+00 : f32
    %117 = vector.broadcast %cst_86 : f32 to vector<8x32xf32>
    %118 = arith.addf %116, %117 : vector<8x32xf32>
    %cst_87 = arith.constant 5.000000e-01 : f32
    %119 = vector.broadcast %cst_87 : f32 to vector<8x32xf32>
    %120 = arith.mulf %119, %118 : vector<8x32xf32>
    %121 = vector.extract_strided_slice %112 {offsets = [0, 32], sizes = [8, 32], strides = [1, 1]} : vector<8x128xf32> to vector<8x32xf32>
    %cst_88 = arith.constant 5.000000e-01 : f32
    %122 = vector.broadcast %cst_88 : f32 to vector<8x32xf32>
    %123 = arith.mulf %122, %121 : vector<8x32xf32>
    %124 = math.tanh %123 : vector<8x32xf32>
    %cst_89 = arith.constant 1.000000e+00 : f32
    %125 = vector.broadcast %cst_89 : f32 to vector<8x32xf32>
    %126 = arith.addf %124, %125 : vector<8x32xf32>
    %cst_90 = arith.constant 5.000000e-01 : f32
    %127 = vector.broadcast %cst_90 : f32 to vector<8x32xf32>
    %128 = arith.mulf %127, %126 : vector<8x32xf32>
    %129 = vector.extract_strided_slice %112 {offsets = [0, 64], sizes = [8, 32], strides = [1, 1]} : vector<8x128xf32> to vector<8x32xf32>
    %130 = math.tanh %129 : vector<8x32xf32>
    %131 = vector.extract_strided_slice %112 {offsets = [0, 96], sizes = [8, 32], strides = [1, 1]} : vector<8x128xf32> to vector<8x32xf32>
    %cst_91 = arith.constant 5.000000e-01 : f32
    %132 = vector.broadcast %cst_91 : f32 to vector<8x32xf32>
    %133 = arith.mulf %132, %131 : vector<8x32xf32>
    %134 = math.tanh %133 : vector<8x32xf32>
    %cst_92 = arith.constant 1.000000e+00 : f32
    %135 = vector.broadcast %cst_92 : f32 to vector<8x32xf32>
    %136 = arith.addf %134, %135 : vector<8x32xf32>
    %cst_93 = arith.constant 5.000000e-01 : f32
    %137 = vector.broadcast %cst_93 : f32 to vector<8x32xf32>
    %138 = arith.mulf %137, %136 : vector<8x32xf32>
    %139 = arith.mulf %128, %78 : vector<8x32xf32>
    %140 = arith.mulf %120, %130 : vector<8x32xf32>
    %141 = arith.addf %139, %140 : vector<8x32xf32>
    %142 = math.tanh %141 : vector<8x32xf32>
    %143 = arith.mulf %138, %142 : vector<8x32xf32>
    %c0_94 = arith.constant 0 : index
    %c0_95 = arith.constant 0 : index
    %144 = vector.load %arg8[%c0_94, %c0_95] : memref<32x256xf32, #tpu.memory_space<vmem>>, vector<32x256xf32>
    %cst_96 = arith.constant dense<0.000000e+00> : vector<8x256xf32>
    %145 = tpu.matmul %143, %144, %cst_96 {dimension_numbers = #tpu.dot_dimension_numbers<[1], [0], [0], [1], [0, 0, 1, 1], [], []>} : vector<8x32xf32>, vector<32x256xf32>, vector<8x256xf32> -> vector<8x256xf32>
    %146 = vector.extract_strided_slice %145 {offsets = [0, 0], sizes = [8, 128], strides = [1, 1]} : vector<8x256xf32> to vector<8x128xf32>
    %147 = vector.extract_strided_slice %145 {offsets = [0, 128], sizes = [8, 128], strides = [1, 1]} : vector<8x256xf32> to vector<8x128xf32>
    %c0_97 = arith.constant 0 : index
    %c0_98 = arith.constant 0 : index
    %148 = vector.load %arg10[%c0_97, %c0_98] : memref<1x128xf32, #tpu.memory_space<vmem>>, vector<1x128xf32>
    %149 = vector.broadcast %148 : vector<1x128xf32> to vector<8x128xf32>
    %150 = arith.addf %147, %149 : vector<8x128xf32>
    %151 = arith.addf %150, %110 : vector<8x128xf32>
    %152 = vector.extract_strided_slice %151 {offsets = [0, 0], sizes = [8, 32], strides = [1, 1]} : vector<8x128xf32> to vector<8x32xf32>
    %cst_99 = arith.constant 5.000000e-01 : f32
    %153 = vector.broadcast %cst_99 : f32 to vector<8x32xf32>
    %154 = arith.mulf %153, %152 : vector<8x32xf32>
    %155 = math.tanh %154 : vector<8x32xf32>
    %cst_100 = arith.constant 1.000000e+00 : f32
    %156 = vector.broadcast %cst_100 : f32 to vector<8x32xf32>
    %157 = arith.addf %155, %156 : vector<8x32xf32>
    %cst_101 = arith.constant 5.000000e-01 : f32
    %158 = vector.broadcast %cst_101 : f32 to vector<8x32xf32>
    %159 = arith.mulf %158, %157 : vector<8x32xf32>
    %160 = vector.extract_strided_slice %151 {offsets = [0, 32], sizes = [8, 32], strides = [1, 1]} : vector<8x128xf32> to vector<8x32xf32>
    %cst_102 = arith.constant 5.000000e-01 : f32
    %161 = vector.broadcast %cst_102 : f32 to vector<8x32xf32>
    %162 = arith.mulf %161, %160 : vector<8x32xf32>
    %163 = math.tanh %162 : vector<8x32xf32>
    %cst_103 = arith.constant 1.000000e+00 : f32
    %164 = vector.broadcast %cst_103 : f32 to vector<8x32xf32>
    %165 = arith.addf %163, %164 : vector<8x32xf32>
    %cst_104 = arith.constant 5.000000e-01 : f32
    %166 = vector.broadcast %cst_104 : f32 to vector<8x32xf32>
    %167 = arith.mulf %166, %165 : vector<8x32xf32>
    %168 = vector.extract_strided_slice %151 {offsets = [0, 64], sizes = [8, 32], strides = [1, 1]} : vector<8x128xf32> to vector<8x32xf32>
    %169 = math.tanh %168 : vector<8x32xf32>
    %170 = vector.extract_strided_slice %151 {offsets = [0, 96], sizes = [8, 32], strides = [1, 1]} : vector<8x128xf32> to vector<8x32xf32>
    %cst_105 = arith.constant 5.000000e-01 : f32
    %171 = vector.broadcast %cst_105 : f32 to vector<8x32xf32>
    %172 = arith.mulf %171, %170 : vector<8x32xf32>
    %173 = math.tanh %172 : vector<8x32xf32>
    %cst_106 = arith.constant 1.000000e+00 : f32
    %174 = vector.broadcast %cst_106 : f32 to vector<8x32xf32>
    %175 = arith.addf %173, %174 : vector<8x32xf32>
    %cst_107 = arith.constant 5.000000e-01 : f32
    %176 = vector.broadcast %cst_107 : f32 to vector<8x32xf32>
    %177 = arith.mulf %176, %175 : vector<8x32xf32>
    %178 = arith.mulf %167, %106 : vector<8x32xf32>
    %179 = arith.mulf %159, %169 : vector<8x32xf32>
    %180 = arith.addf %178, %179 : vector<8x32xf32>
    %181 = math.tanh %180 : vector<8x32xf32>
    %182 = arith.mulf %177, %181 : vector<8x32xf32>
    %c0_108 = arith.constant 0 : index
    %c0_109 = arith.constant 0 : index
    %183 = vector.load %arg9[%c0_108, %c0_109] : memref<32x128xf32, #tpu.memory_space<vmem>>, vector<32x128xf32>
    %cst_110 = arith.constant dense<0.000000e+00> : vector<8x128xf32>
    %184 = tpu.matmul %182, %183, %cst_110 {dimension_numbers = #tpu.dot_dimension_numbers<[1], [0], [0], [1], [0, 0, 1, 1], [], []>} : vector<8x32xf32>, vector<32x128xf32>, vector<8x128xf32> -> vector<8x128xf32>
    %185 = vector.extract_strided_slice %58 {offsets = [16, 0], sizes = [8, 128], strides = [1, 1]} : vector<64x128xf32> to vector<8x128xf32>
    %186 = arith.addf %185, %146 : vector<8x128xf32>
    %187 = vector.extract_strided_slice %186 {offsets = [0, 0], sizes = [8, 32], strides = [1, 1]} : vector<8x128xf32> to vector<8x32xf32>
    %cst_111 = arith.constant 5.000000e-01 : f32
    %188 = vector.broadcast %cst_111 : f32 to vector<8x32xf32>
    %189 = arith.mulf %188, %187 : vector<8x32xf32>
    %190 = math.tanh %189 : vector<8x32xf32>
    %cst_112 = arith.constant 1.000000e+00 : f32
    %191 = vector.broadcast %cst_112 : f32 to vector<8x32xf32>
    %192 = arith.addf %190, %191 : vector<8x32xf32>
    %cst_113 = arith.constant 5.000000e-01 : f32
    %193 = vector.broadcast %cst_113 : f32 to vector<8x32xf32>
    %194 = arith.mulf %193, %192 : vector<8x32xf32>
    %195 = vector.extract_strided_slice %186 {offsets = [0, 32], sizes = [8, 32], strides = [1, 1]} : vector<8x128xf32> to vector<8x32xf32>
    %cst_114 = arith.constant 5.000000e-01 : f32
    %196 = vector.broadcast %cst_114 : f32 to vector<8x32xf32>
    %197 = arith.mulf %196, %195 : vector<8x32xf32>
    %198 = math.tanh %197 : vector<8x32xf32>
    %cst_115 = arith.constant 1.000000e+00 : f32
    %199 = vector.broadcast %cst_115 : f32 to vector<8x32xf32>
    %200 = arith.addf %198, %199 : vector<8x32xf32>
    %cst_116 = arith.constant 5.000000e-01 : f32
    %201 = vector.broadcast %cst_116 : f32 to vector<8x32xf32>
    %202 = arith.mulf %201, %200 : vector<8x32xf32>
    %203 = vector.extract_strided_slice %186 {offsets = [0, 64], sizes = [8, 32], strides = [1, 1]} : vector<8x128xf32> to vector<8x32xf32>
    %204 = math.tanh %203 : vector<8x32xf32>
    %205 = vector.extract_strided_slice %186 {offsets = [0, 96], sizes = [8, 32], strides = [1, 1]} : vector<8x128xf32> to vector<8x32xf32>
    %cst_117 = arith.constant 5.000000e-01 : f32
    %206 = vector.broadcast %cst_117 : f32 to vector<8x32xf32>
    %207 = arith.mulf %206, %205 : vector<8x32xf32>
    %208 = math.tanh %207 : vector<8x32xf32>
    %cst_118 = arith.constant 1.000000e+00 : f32
    %209 = vector.broadcast %cst_118 : f32 to vector<8x32xf32>
    %210 = arith.addf %208, %209 : vector<8x32xf32>
    %cst_119 = arith.constant 5.000000e-01 : f32
    %211 = vector.broadcast %cst_119 : f32 to vector<8x32xf32>
    %212 = arith.mulf %211, %210 : vector<8x32xf32>
    %213 = arith.mulf %202, %141 : vector<8x32xf32>
    %214 = arith.mulf %194, %204 : vector<8x32xf32>
    %215 = arith.addf %213, %214 : vector<8x32xf32>
    %216 = math.tanh %215 : vector<8x32xf32>
    %217 = arith.mulf %212, %216 : vector<8x32xf32>
    %c0_120 = arith.constant 0 : index
    %c0_121 = arith.constant 0 : index
    %218 = vector.load %arg8[%c0_120, %c0_121] : memref<32x256xf32, #tpu.memory_space<vmem>>, vector<32x256xf32>
    %cst_122 = arith.constant dense<0.000000e+00> : vector<8x256xf32>
    %219 = tpu.matmul %217, %218, %cst_122 {dimension_numbers = #tpu.dot_dimension_numbers<[1], [0], [0], [1], [0, 0, 1, 1], [], []>} : vector<8x32xf32>, vector<32x256xf32>, vector<8x256xf32> -> vector<8x256xf32>
    %220 = vector.extract_strided_slice %219 {offsets = [0, 0], sizes = [8, 128], strides = [1, 1]} : vector<8x256xf32> to vector<8x128xf32>
    %221 = vector.extract_strided_slice %219 {offsets = [0, 128], sizes = [8, 128], strides = [1, 1]} : vector<8x256xf32> to vector<8x128xf32>
    %c0_123 = arith.constant 0 : index
    %c0_124 = arith.constant 0 : index
    %222 = vector.load %arg10[%c0_123, %c0_124] : memref<1x128xf32, #tpu.memory_space<vmem>>, vector<1x128xf32>
    %223 = vector.broadcast %222 : vector<1x128xf32> to vector<8x128xf32>
    %224 = arith.addf %221, %223 : vector<8x128xf32>
    %225 = arith.addf %224, %184 : vector<8x128xf32>
    %226 = vector.extract_strided_slice %225 {offsets = [0, 0], sizes = [8, 32], strides = [1, 1]} : vector<8x128xf32> to vector<8x32xf32>
    %cst_125 = arith.constant 5.000000e-01 : f32
    %227 = vector.broadcast %cst_125 : f32 to vector<8x32xf32>
    %228 = arith.mulf %227, %226 : vector<8x32xf32>
    %229 = math.tanh %228 : vector<8x32xf32>
    %cst_126 = arith.constant 1.000000e+00 : f32
    %230 = vector.broadcast %cst_126 : f32 to vector<8x32xf32>
    %231 = arith.addf %229, %230 : vector<8x32xf32>
    %cst_127 = arith.constant 5.000000e-01 : f32
    %232 = vector.broadcast %cst_127 : f32 to vector<8x32xf32>
    %233 = arith.mulf %232, %231 : vector<8x32xf32>
    %234 = vector.extract_strided_slice %225 {offsets = [0, 32], sizes = [8, 32], strides = [1, 1]} : vector<8x128xf32> to vector<8x32xf32>
    %cst_128 = arith.constant 5.000000e-01 : f32
    %235 = vector.broadcast %cst_128 : f32 to vector<8x32xf32>
    %236 = arith.mulf %235, %234 : vector<8x32xf32>
    %237 = math.tanh %236 : vector<8x32xf32>
    %cst_129 = arith.constant 1.000000e+00 : f32
    %238 = vector.broadcast %cst_129 : f32 to vector<8x32xf32>
    %239 = arith.addf %237, %238 : vector<8x32xf32>
    %cst_130 = arith.constant 5.000000e-01 : f32
    %240 = vector.broadcast %cst_130 : f32 to vector<8x32xf32>
    %241 = arith.mulf %240, %239 : vector<8x32xf32>
    %242 = vector.extract_strided_slice %225 {offsets = [0, 64], sizes = [8, 32], strides = [1, 1]} : vector<8x128xf32> to vector<8x32xf32>
    %243 = math.tanh %242 : vector<8x32xf32>
    %244 = vector.extract_strided_slice %225 {offsets = [0, 96], sizes = [8, 32], strides = [1, 1]} : vector<8x128xf32> to vector<8x32xf32>
    %cst_131 = arith.constant 5.000000e-01 : f32
    %245 = vector.broadcast %cst_131 : f32 to vector<8x32xf32>
    %246 = arith.mulf %245, %244 : vector<8x32xf32>
    %247 = math.tanh %246 : vector<8x32xf32>
    %cst_132 = arith.constant 1.000000e+00 : f32
    %248 = vector.broadcast %cst_132 : f32 to vector<8x32xf32>
    %249 = arith.addf %247, %248 : vector<8x32xf32>
    %cst_133 = arith.constant 5.000000e-01 : f32
    %250 = vector.broadcast %cst_133 : f32 to vector<8x32xf32>
    %251 = arith.mulf %250, %249 : vector<8x32xf32>
    %252 = arith.mulf %241, %180 : vector<8x32xf32>
    %253 = arith.mulf %233, %243 : vector<8x32xf32>
    %254 = arith.addf %252, %253 : vector<8x32xf32>
    %255 = math.tanh %254 : vector<8x32xf32>
    %256 = arith.mulf %251, %255 : vector<8x32xf32>
    %c0_134 = arith.constant 0 : index
    %c0_135 = arith.constant 0 : index
    %257 = vector.load %arg9[%c0_134, %c0_135] : memref<32x128xf32, #tpu.memory_space<vmem>>, vector<32x128xf32>
    %cst_136 = arith.constant dense<0.000000e+00> : vector<8x128xf32>
    %258 = tpu.matmul %256, %257, %cst_136 {dimension_numbers = #tpu.dot_dimension_numbers<[1], [0], [0], [1], [0, 0, 1, 1], [], []>} : vector<8x32xf32>, vector<32x128xf32>, vector<8x128xf32> -> vector<8x128xf32>
    %259 = vector.extract_strided_slice %58 {offsets = [24, 0], sizes = [8, 128], strides = [1, 1]} : vector<64x128xf32> to vector<8x128xf32>
    %260 = arith.addf %259, %220 : vector<8x128xf32>
    %261 = vector.extract_strided_slice %260 {offsets = [0, 0], sizes = [8, 32], strides = [1, 1]} : vector<8x128xf32> to vector<8x32xf32>
    %cst_137 = arith.constant 5.000000e-01 : f32
    %262 = vector.broadcast %cst_137 : f32 to vector<8x32xf32>
    %263 = arith.mulf %262, %261 : vector<8x32xf32>
    %264 = math.tanh %263 : vector<8x32xf32>
    %cst_138 = arith.constant 1.000000e+00 : f32
    %265 = vector.broadcast %cst_138 : f32 to vector<8x32xf32>
    %266 = arith.addf %264, %265 : vector<8x32xf32>
    %cst_139 = arith.constant 5.000000e-01 : f32
    %267 = vector.broadcast %cst_139 : f32 to vector<8x32xf32>
    %268 = arith.mulf %267, %266 : vector<8x32xf32>
    %269 = vector.extract_strided_slice %260 {offsets = [0, 32], sizes = [8, 32], strides = [1, 1]} : vector<8x128xf32> to vector<8x32xf32>
    %cst_140 = arith.constant 5.000000e-01 : f32
    %270 = vector.broadcast %cst_140 : f32 to vector<8x32xf32>
    %271 = arith.mulf %270, %269 : vector<8x32xf32>
    %272 = math.tanh %271 : vector<8x32xf32>
    %cst_141 = arith.constant 1.000000e+00 : f32
    %273 = vector.broadcast %cst_141 : f32 to vector<8x32xf32>
    %274 = arith.addf %272, %273 : vector<8x32xf32>
    %cst_142 = arith.constant 5.000000e-01 : f32
    %275 = vector.broadcast %cst_142 : f32 to vector<8x32xf32>
    %276 = arith.mulf %275, %274 : vector<8x32xf32>
    %277 = vector.extract_strided_slice %260 {offsets = [0, 64], sizes = [8, 32], strides = [1, 1]} : vector<8x128xf32> to vector<8x32xf32>
    %278 = math.tanh %277 : vector<8x32xf32>
    %279 = vector.extract_strided_slice %260 {offsets = [0, 96], sizes = [8, 32], strides = [1, 1]} : vector<8x128xf32> to vector<8x32xf32>
    %cst_143 = arith.constant 5.000000e-01 : f32
    %280 = vector.broadcast %cst_143 : f32 to vector<8x32xf32>
    %281 = arith.mulf %280, %279 : vector<8x32xf32>
    %282 = math.tanh %281 : vector<8x32xf32>
    %cst_144 = arith.constant 1.000000e+00 : f32
    %283 = vector.broadcast %cst_144 : f32 to vector<8x32xf32>
    %284 = arith.addf %282, %283 : vector<8x32xf32>
    %cst_145 = arith.constant 5.000000e-01 : f32
    %285 = vector.broadcast %cst_145 : f32 to vector<8x32xf32>
    %286 = arith.mulf %285, %284 : vector<8x32xf32>
    %287 = arith.mulf %276, %215 : vector<8x32xf32>
    %288 = arith.mulf %268, %278 : vector<8x32xf32>
    %289 = arith.addf %287, %288 : vector<8x32xf32>
    %290 = math.tanh %289 : vector<8x32xf32>
    %291 = arith.mulf %286, %290 : vector<8x32xf32>
    %c0_146 = arith.constant 0 : index
    %c0_147 = arith.constant 0 : index
    %292 = vector.load %arg8[%c0_146, %c0_147] : memref<32x256xf32, #tpu.memory_space<vmem>>, vector<32x256xf32>
    %cst_148 = arith.constant dense<0.000000e+00> : vector<8x256xf32>
    %293 = tpu.matmul %291, %292, %cst_148 {dimension_numbers = #tpu.dot_dimension_numbers<[1], [0], [0], [1], [0, 0, 1, 1], [], []>} : vector<8x32xf32>, vector<32x256xf32>, vector<8x256xf32> -> vector<8x256xf32>
    %294 = vector.extract_strided_slice %293 {offsets = [0, 0], sizes = [8, 128], strides = [1, 1]} : vector<8x256xf32> to vector<8x128xf32>
    %295 = vector.extract_strided_slice %293 {offsets = [0, 128], sizes = [8, 128], strides = [1, 1]} : vector<8x256xf32> to vector<8x128xf32>
    %c0_149 = arith.constant 0 : index
    %c0_150 = arith.constant 0 : index
    %296 = vector.load %arg10[%c0_149, %c0_150] : memref<1x128xf32, #tpu.memory_space<vmem>>, vector<1x128xf32>
    %297 = vector.broadcast %296 : vector<1x128xf32> to vector<8x128xf32>
    %298 = arith.addf %295, %297 : vector<8x128xf32>
    %299 = arith.addf %298, %258 : vector<8x128xf32>
    %300 = vector.extract_strided_slice %299 {offsets = [0, 0], sizes = [8, 32], strides = [1, 1]} : vector<8x128xf32> to vector<8x32xf32>
    %cst_151 = arith.constant 5.000000e-01 : f32
    %301 = vector.broadcast %cst_151 : f32 to vector<8x32xf32>
    %302 = arith.mulf %301, %300 : vector<8x32xf32>
    %303 = math.tanh %302 : vector<8x32xf32>
    %cst_152 = arith.constant 1.000000e+00 : f32
    %304 = vector.broadcast %cst_152 : f32 to vector<8x32xf32>
    %305 = arith.addf %303, %304 : vector<8x32xf32>
    %cst_153 = arith.constant 5.000000e-01 : f32
    %306 = vector.broadcast %cst_153 : f32 to vector<8x32xf32>
    %307 = arith.mulf %306, %305 : vector<8x32xf32>
    %308 = vector.extract_strided_slice %299 {offsets = [0, 32], sizes = [8, 32], strides = [1, 1]} : vector<8x128xf32> to vector<8x32xf32>
    %cst_154 = arith.constant 5.000000e-01 : f32
    %309 = vector.broadcast %cst_154 : f32 to vector<8x32xf32>
    %310 = arith.mulf %309, %308 : vector<8x32xf32>
    %311 = math.tanh %310 : vector<8x32xf32>
    %cst_155 = arith.constant 1.000000e+00 : f32
    %312 = vector.broadcast %cst_155 : f32 to vector<8x32xf32>
    %313 = arith.addf %311, %312 : vector<8x32xf32>
    %cst_156 = arith.constant 5.000000e-01 : f32
    %314 = vector.broadcast %cst_156 : f32 to vector<8x32xf32>
    %315 = arith.mulf %314, %313 : vector<8x32xf32>
    %316 = vector.extract_strided_slice %299 {offsets = [0, 64], sizes = [8, 32], strides = [1, 1]} : vector<8x128xf32> to vector<8x32xf32>
    %317 = math.tanh %316 : vector<8x32xf32>
    %318 = vector.extract_strided_slice %299 {offsets = [0, 96], sizes = [8, 32], strides = [1, 1]} : vector<8x128xf32> to vector<8x32xf32>
    %cst_157 = arith.constant 5.000000e-01 : f32
    %319 = vector.broadcast %cst_157 : f32 to vector<8x32xf32>
    %320 = arith.mulf %319, %318 : vector<8x32xf32>
    %321 = math.tanh %320 : vector<8x32xf32>
    %cst_158 = arith.constant 1.000000e+00 : f32
    %322 = vector.broadcast %cst_158 : f32 to vector<8x32xf32>
    %323 = arith.addf %321, %322 : vector<8x32xf32>
    %cst_159 = arith.constant 5.000000e-01 : f32
    %324 = vector.broadcast %cst_159 : f32 to vector<8x32xf32>
    %325 = arith.mulf %324, %323 : vector<8x32xf32>
    %326 = arith.mulf %315, %254 : vector<8x32xf32>
    %327 = arith.mulf %307, %317 : vector<8x32xf32>
    %328 = arith.addf %326, %327 : vector<8x32xf32>
    %329 = math.tanh %328 : vector<8x32xf32>
    %330 = arith.mulf %325, %329 : vector<8x32xf32>
    %c0_160 = arith.constant 0 : index
    %c0_161 = arith.constant 0 : index
    %331 = vector.load %arg9[%c0_160, %c0_161] : memref<32x128xf32, #tpu.memory_space<vmem>>, vector<32x128xf32>
    %cst_162 = arith.constant dense<0.000000e+00> : vector<8x128xf32>
    %332 = tpu.matmul %330, %331, %cst_162 {dimension_numbers = #tpu.dot_dimension_numbers<[1], [0], [0], [1], [0, 0, 1, 1], [], []>} : vector<8x32xf32>, vector<32x128xf32>, vector<8x128xf32> -> vector<8x128xf32>
    %333 = vector.extract_strided_slice %58 {offsets = [32, 0], sizes = [8, 128], strides = [1, 1]} : vector<64x128xf32> to vector<8x128xf32>
    %334 = arith.addf %333, %294 : vector<8x128xf32>
    %335 = vector.extract_strided_slice %334 {offsets = [0, 0], sizes = [8, 32], strides = [1, 1]} : vector<8x128xf32> to vector<8x32xf32>
    %cst_163 = arith.constant 5.000000e-01 : f32
    %336 = vector.broadcast %cst_163 : f32 to vector<8x32xf32>
    %337 = arith.mulf %336, %335 : vector<8x32xf32>
    %338 = math.tanh %337 : vector<8x32xf32>
    %cst_164 = arith.constant 1.000000e+00 : f32
    %339 = vector.broadcast %cst_164 : f32 to vector<8x32xf32>
    %340 = arith.addf %338, %339 : vector<8x32xf32>
    %cst_165 = arith.constant 5.000000e-01 : f32
    %341 = vector.broadcast %cst_165 : f32 to vector<8x32xf32>
    %342 = arith.mulf %341, %340 : vector<8x32xf32>
    %343 = vector.extract_strided_slice %334 {offsets = [0, 32], sizes = [8, 32], strides = [1, 1]} : vector<8x128xf32> to vector<8x32xf32>
    %cst_166 = arith.constant 5.000000e-01 : f32
    %344 = vector.broadcast %cst_166 : f32 to vector<8x32xf32>
    %345 = arith.mulf %344, %343 : vector<8x32xf32>
    %346 = math.tanh %345 : vector<8x32xf32>
    %cst_167 = arith.constant 1.000000e+00 : f32
    %347 = vector.broadcast %cst_167 : f32 to vector<8x32xf32>
    %348 = arith.addf %346, %347 : vector<8x32xf32>
    %cst_168 = arith.constant 5.000000e-01 : f32
    %349 = vector.broadcast %cst_168 : f32 to vector<8x32xf32>
    %350 = arith.mulf %349, %348 : vector<8x32xf32>
    %351 = vector.extract_strided_slice %334 {offsets = [0, 64], sizes = [8, 32], strides = [1, 1]} : vector<8x128xf32> to vector<8x32xf32>
    %352 = math.tanh %351 : vector<8x32xf32>
    %353 = vector.extract_strided_slice %334 {offsets = [0, 96], sizes = [8, 32], strides = [1, 1]} : vector<8x128xf32> to vector<8x32xf32>
    %cst_169 = arith.constant 5.000000e-01 : f32
    %354 = vector.broadcast %cst_169 : f32 to vector<8x32xf32>
    %355 = arith.mulf %354, %353 : vector<8x32xf32>
    %356 = math.tanh %355 : vector<8x32xf32>
    %cst_170 = arith.constant 1.000000e+00 : f32
    %357 = vector.broadcast %cst_170 : f32 to vector<8x32xf32>
    %358 = arith.addf %356, %357 : vector<8x32xf32>
    %cst_171 = arith.constant 5.000000e-01 : f32
    %359 = vector.broadcast %cst_171 : f32 to vector<8x32xf32>
    %360 = arith.mulf %359, %358 : vector<8x32xf32>
    %361 = arith.mulf %350, %289 : vector<8x32xf32>
    %362 = arith.mulf %342, %352 : vector<8x32xf32>
    %363 = arith.addf %361, %362 : vector<8x32xf32>
    %364 = math.tanh %363 : vector<8x32xf32>
    %365 = arith.mulf %360, %364 : vector<8x32xf32>
    %c0_172 = arith.constant 0 : index
    %c0_173 = arith.constant 0 : index
    %366 = vector.load %arg8[%c0_172, %c0_173] : memref<32x256xf32, #tpu.memory_space<vmem>>, vector<32x256xf32>
    %cst_174 = arith.constant dense<0.000000e+00> : vector<8x256xf32>
    %367 = tpu.matmul %365, %366, %cst_174 {dimension_numbers = #tpu.dot_dimension_numbers<[1], [0], [0], [1], [0, 0, 1, 1], [], []>} : vector<8x32xf32>, vector<32x256xf32>, vector<8x256xf32> -> vector<8x256xf32>
    %368 = vector.extract_strided_slice %367 {offsets = [0, 0], sizes = [8, 128], strides = [1, 1]} : vector<8x256xf32> to vector<8x128xf32>
    %369 = vector.extract_strided_slice %367 {offsets = [0, 128], sizes = [8, 128], strides = [1, 1]} : vector<8x256xf32> to vector<8x128xf32>
    %c0_175 = arith.constant 0 : index
    %c0_176 = arith.constant 0 : index
    %370 = vector.load %arg10[%c0_175, %c0_176] : memref<1x128xf32, #tpu.memory_space<vmem>>, vector<1x128xf32>
    %371 = vector.broadcast %370 : vector<1x128xf32> to vector<8x128xf32>
    %372 = arith.addf %369, %371 : vector<8x128xf32>
    %373 = arith.addf %372, %332 : vector<8x128xf32>
    %374 = vector.extract_strided_slice %373 {offsets = [0, 0], sizes = [8, 32], strides = [1, 1]} : vector<8x128xf32> to vector<8x32xf32>
    %cst_177 = arith.constant 5.000000e-01 : f32
    %375 = vector.broadcast %cst_177 : f32 to vector<8x32xf32>
    %376 = arith.mulf %375, %374 : vector<8x32xf32>
    %377 = math.tanh %376 : vector<8x32xf32>
    %cst_178 = arith.constant 1.000000e+00 : f32
    %378 = vector.broadcast %cst_178 : f32 to vector<8x32xf32>
    %379 = arith.addf %377, %378 : vector<8x32xf32>
    %cst_179 = arith.constant 5.000000e-01 : f32
    %380 = vector.broadcast %cst_179 : f32 to vector<8x32xf32>
    %381 = arith.mulf %380, %379 : vector<8x32xf32>
    %382 = vector.extract_strided_slice %373 {offsets = [0, 32], sizes = [8, 32], strides = [1, 1]} : vector<8x128xf32> to vector<8x32xf32>
    %cst_180 = arith.constant 5.000000e-01 : f32
    %383 = vector.broadcast %cst_180 : f32 to vector<8x32xf32>
    %384 = arith.mulf %383, %382 : vector<8x32xf32>
    %385 = math.tanh %384 : vector<8x32xf32>
    %cst_181 = arith.constant 1.000000e+00 : f32
    %386 = vector.broadcast %cst_181 : f32 to vector<8x32xf32>
    %387 = arith.addf %385, %386 : vector<8x32xf32>
    %cst_182 = arith.constant 5.000000e-01 : f32
    %388 = vector.broadcast %cst_182 : f32 to vector<8x32xf32>
    %389 = arith.mulf %388, %387 : vector<8x32xf32>
    %390 = vector.extract_strided_slice %373 {offsets = [0, 64], sizes = [8, 32], strides = [1, 1]} : vector<8x128xf32> to vector<8x32xf32>
    %391 = math.tanh %390 : vector<8x32xf32>
    %392 = vector.extract_strided_slice %373 {offsets = [0, 96], sizes = [8, 32], strides = [1, 1]} : vector<8x128xf32> to vector<8x32xf32>
    %cst_183 = arith.constant 5.000000e-01 : f32
    %393 = vector.broadcast %cst_183 : f32 to vector<8x32xf32>
    %394 = arith.mulf %393, %392 : vector<8x32xf32>
    %395 = math.tanh %394 : vector<8x32xf32>
    %cst_184 = arith.constant 1.000000e+00 : f32
    %396 = vector.broadcast %cst_184 : f32 to vector<8x32xf32>
    %397 = arith.addf %395, %396 : vector<8x32xf32>
    %cst_185 = arith.constant 5.000000e-01 : f32
    %398 = vector.broadcast %cst_185 : f32 to vector<8x32xf32>
    %399 = arith.mulf %398, %397 : vector<8x32xf32>
    %400 = arith.mulf %389, %328 : vector<8x32xf32>
    %401 = arith.mulf %381, %391 : vector<8x32xf32>
    %402 = arith.addf %400, %401 : vector<8x32xf32>
    %403 = math.tanh %402 : vector<8x32xf32>
    %404 = arith.mulf %399, %403 : vector<8x32xf32>
    %c0_186 = arith.constant 0 : index
    %c0_187 = arith.constant 0 : index
    %405 = vector.load %arg9[%c0_186, %c0_187] : memref<32x128xf32, #tpu.memory_space<vmem>>, vector<32x128xf32>
    %cst_188 = arith.constant dense<0.000000e+00> : vector<8x128xf32>
    %406 = tpu.matmul %404, %405, %cst_188 {dimension_numbers = #tpu.dot_dimension_numbers<[1], [0], [0], [1], [0, 0, 1, 1], [], []>} : vector<8x32xf32>, vector<32x128xf32>, vector<8x128xf32> -> vector<8x128xf32>
    %407 = vector.extract_strided_slice %58 {offsets = [40, 0], sizes = [8, 128], strides = [1, 1]} : vector<64x128xf32> to vector<8x128xf32>
    %408 = arith.addf %407, %368 : vector<8x128xf32>
    %409 = vector.extract_strided_slice %408 {offsets = [0, 0], sizes = [8, 32], strides = [1, 1]} : vector<8x128xf32> to vector<8x32xf32>
    %cst_189 = arith.constant 5.000000e-01 : f32
    %410 = vector.broadcast %cst_189 : f32 to vector<8x32xf32>
    %411 = arith.mulf %410, %409 : vector<8x32xf32>
    %412 = math.tanh %411 : vector<8x32xf32>
    %cst_190 = arith.constant 1.000000e+00 : f32
    %413 = vector.broadcast %cst_190 : f32 to vector<8x32xf32>
    %414 = arith.addf %412, %413 : vector<8x32xf32>
    %cst_191 = arith.constant 5.000000e-01 : f32
    %415 = vector.broadcast %cst_191 : f32 to vector<8x32xf32>
    %416 = arith.mulf %415, %414 : vector<8x32xf32>
    %417 = vector.extract_strided_slice %408 {offsets = [0, 32], sizes = [8, 32], strides = [1, 1]} : vector<8x128xf32> to vector<8x32xf32>
    %cst_192 = arith.constant 5.000000e-01 : f32
    %418 = vector.broadcast %cst_192 : f32 to vector<8x32xf32>
    %419 = arith.mulf %418, %417 : vector<8x32xf32>
    %420 = math.tanh %419 : vector<8x32xf32>
    %cst_193 = arith.constant 1.000000e+00 : f32
    %421 = vector.broadcast %cst_193 : f32 to vector<8x32xf32>
    %422 = arith.addf %420, %421 : vector<8x32xf32>
    %cst_194 = arith.constant 5.000000e-01 : f32
    %423 = vector.broadcast %cst_194 : f32 to vector<8x32xf32>
    %424 = arith.mulf %423, %422 : vector<8x32xf32>
    %425 = vector.extract_strided_slice %408 {offsets = [0, 64], sizes = [8, 32], strides = [1, 1]} : vector<8x128xf32> to vector<8x32xf32>
    %426 = math.tanh %425 : vector<8x32xf32>
    %427 = vector.extract_strided_slice %408 {offsets = [0, 96], sizes = [8, 32], strides = [1, 1]} : vector<8x128xf32> to vector<8x32xf32>
    %cst_195 = arith.constant 5.000000e-01 : f32
    %428 = vector.broadcast %cst_195 : f32 to vector<8x32xf32>
    %429 = arith.mulf %428, %427 : vector<8x32xf32>
    %430 = math.tanh %429 : vector<8x32xf32>
    %cst_196 = arith.constant 1.000000e+00 : f32
    %431 = vector.broadcast %cst_196 : f32 to vector<8x32xf32>
    %432 = arith.addf %430, %431 : vector<8x32xf32>
    %cst_197 = arith.constant 5.000000e-01 : f32
    %433 = vector.broadcast %cst_197 : f32 to vector<8x32xf32>
    %434 = arith.mulf %433, %432 : vector<8x32xf32>
    %435 = arith.mulf %424, %363 : vector<8x32xf32>
    %436 = arith.mulf %416, %426 : vector<8x32xf32>
    %437 = arith.addf %435, %436 : vector<8x32xf32>
    %438 = math.tanh %437 : vector<8x32xf32>
    %439 = arith.mulf %434, %438 : vector<8x32xf32>
    %c0_198 = arith.constant 0 : index
    %c0_199 = arith.constant 0 : index
    %440 = vector.load %arg8[%c0_198, %c0_199] : memref<32x256xf32, #tpu.memory_space<vmem>>, vector<32x256xf32>
    %cst_200 = arith.constant dense<0.000000e+00> : vector<8x256xf32>
    %441 = tpu.matmul %439, %440, %cst_200 {dimension_numbers = #tpu.dot_dimension_numbers<[1], [0], [0], [1], [0, 0, 1, 1], [], []>} : vector<8x32xf32>, vector<32x256xf32>, vector<8x256xf32> -> vector<8x256xf32>
    %442 = vector.extract_strided_slice %441 {offsets = [0, 0], sizes = [8, 128], strides = [1, 1]} : vector<8x256xf32> to vector<8x128xf32>
    %443 = vector.extract_strided_slice %441 {offsets = [0, 128], sizes = [8, 128], strides = [1, 1]} : vector<8x256xf32> to vector<8x128xf32>
    %c0_201 = arith.constant 0 : index
    %c0_202 = arith.constant 0 : index
    %444 = vector.load %arg10[%c0_201, %c0_202] : memref<1x128xf32, #tpu.memory_space<vmem>>, vector<1x128xf32>
    %445 = vector.broadcast %444 : vector<1x128xf32> to vector<8x128xf32>
    %446 = arith.addf %443, %445 : vector<8x128xf32>
    %447 = arith.addf %446, %406 : vector<8x128xf32>
    %448 = vector.extract_strided_slice %447 {offsets = [0, 0], sizes = [8, 32], strides = [1, 1]} : vector<8x128xf32> to vector<8x32xf32>
    %cst_203 = arith.constant 5.000000e-01 : f32
    %449 = vector.broadcast %cst_203 : f32 to vector<8x32xf32>
    %450 = arith.mulf %449, %448 : vector<8x32xf32>
    %451 = math.tanh %450 : vector<8x32xf32>
    %cst_204 = arith.constant 1.000000e+00 : f32
    %452 = vector.broadcast %cst_204 : f32 to vector<8x32xf32>
    %453 = arith.addf %451, %452 : vector<8x32xf32>
    %cst_205 = arith.constant 5.000000e-01 : f32
    %454 = vector.broadcast %cst_205 : f32 to vector<8x32xf32>
    %455 = arith.mulf %454, %453 : vector<8x32xf32>
    %456 = vector.extract_strided_slice %447 {offsets = [0, 32], sizes = [8, 32], strides = [1, 1]} : vector<8x128xf32> to vector<8x32xf32>
    %cst_206 = arith.constant 5.000000e-01 : f32
    %457 = vector.broadcast %cst_206 : f32 to vector<8x32xf32>
    %458 = arith.mulf %457, %456 : vector<8x32xf32>
    %459 = math.tanh %458 : vector<8x32xf32>
    %cst_207 = arith.constant 1.000000e+00 : f32
    %460 = vector.broadcast %cst_207 : f32 to vector<8x32xf32>
    %461 = arith.addf %459, %460 : vector<8x32xf32>
    %cst_208 = arith.constant 5.000000e-01 : f32
    %462 = vector.broadcast %cst_208 : f32 to vector<8x32xf32>
    %463 = arith.mulf %462, %461 : vector<8x32xf32>
    %464 = vector.extract_strided_slice %447 {offsets = [0, 64], sizes = [8, 32], strides = [1, 1]} : vector<8x128xf32> to vector<8x32xf32>
    %465 = math.tanh %464 : vector<8x32xf32>
    %466 = vector.extract_strided_slice %447 {offsets = [0, 96], sizes = [8, 32], strides = [1, 1]} : vector<8x128xf32> to vector<8x32xf32>
    %cst_209 = arith.constant 5.000000e-01 : f32
    %467 = vector.broadcast %cst_209 : f32 to vector<8x32xf32>
    %468 = arith.mulf %467, %466 : vector<8x32xf32>
    %469 = math.tanh %468 : vector<8x32xf32>
    %cst_210 = arith.constant 1.000000e+00 : f32
    %470 = vector.broadcast %cst_210 : f32 to vector<8x32xf32>
    %471 = arith.addf %469, %470 : vector<8x32xf32>
    %cst_211 = arith.constant 5.000000e-01 : f32
    %472 = vector.broadcast %cst_211 : f32 to vector<8x32xf32>
    %473 = arith.mulf %472, %471 : vector<8x32xf32>
    %474 = arith.mulf %463, %402 : vector<8x32xf32>
    %475 = arith.mulf %455, %465 : vector<8x32xf32>
    %476 = arith.addf %474, %475 : vector<8x32xf32>
    %477 = math.tanh %476 : vector<8x32xf32>
    %478 = arith.mulf %473, %477 : vector<8x32xf32>
    %c0_212 = arith.constant 0 : index
    %c0_213 = arith.constant 0 : index
    %479 = vector.load %arg9[%c0_212, %c0_213] : memref<32x128xf32, #tpu.memory_space<vmem>>, vector<32x128xf32>
    %cst_214 = arith.constant dense<0.000000e+00> : vector<8x128xf32>
    %480 = tpu.matmul %478, %479, %cst_214 {dimension_numbers = #tpu.dot_dimension_numbers<[1], [0], [0], [1], [0, 0, 1, 1], [], []>} : vector<8x32xf32>, vector<32x128xf32>, vector<8x128xf32> -> vector<8x128xf32>
    %481 = vector.extract_strided_slice %58 {offsets = [48, 0], sizes = [8, 128], strides = [1, 1]} : vector<64x128xf32> to vector<8x128xf32>
    %482 = arith.addf %481, %442 : vector<8x128xf32>
    %483 = vector.extract_strided_slice %482 {offsets = [0, 0], sizes = [8, 32], strides = [1, 1]} : vector<8x128xf32> to vector<8x32xf32>
    %cst_215 = arith.constant 5.000000e-01 : f32
    %484 = vector.broadcast %cst_215 : f32 to vector<8x32xf32>
    %485 = arith.mulf %484, %483 : vector<8x32xf32>
    %486 = math.tanh %485 : vector<8x32xf32>
    %cst_216 = arith.constant 1.000000e+00 : f32
    %487 = vector.broadcast %cst_216 : f32 to vector<8x32xf32>
    %488 = arith.addf %486, %487 : vector<8x32xf32>
    %cst_217 = arith.constant 5.000000e-01 : f32
    %489 = vector.broadcast %cst_217 : f32 to vector<8x32xf32>
    %490 = arith.mulf %489, %488 : vector<8x32xf32>
    %491 = vector.extract_strided_slice %482 {offsets = [0, 32], sizes = [8, 32], strides = [1, 1]} : vector<8x128xf32> to vector<8x32xf32>
    %cst_218 = arith.constant 5.000000e-01 : f32
    %492 = vector.broadcast %cst_218 : f32 to vector<8x32xf32>
    %493 = arith.mulf %492, %491 : vector<8x32xf32>
    %494 = math.tanh %493 : vector<8x32xf32>
    %cst_219 = arith.constant 1.000000e+00 : f32
    %495 = vector.broadcast %cst_219 : f32 to vector<8x32xf32>
    %496 = arith.addf %494, %495 : vector<8x32xf32>
    %cst_220 = arith.constant 5.000000e-01 : f32
    %497 = vector.broadcast %cst_220 : f32 to vector<8x32xf32>
    %498 = arith.mulf %497, %496 : vector<8x32xf32>
    %499 = vector.extract_strided_slice %482 {offsets = [0, 64], sizes = [8, 32], strides = [1, 1]} : vector<8x128xf32> to vector<8x32xf32>
    %500 = math.tanh %499 : vector<8x32xf32>
    %501 = vector.extract_strided_slice %482 {offsets = [0, 96], sizes = [8, 32], strides = [1, 1]} : vector<8x128xf32> to vector<8x32xf32>
    %cst_221 = arith.constant 5.000000e-01 : f32
    %502 = vector.broadcast %cst_221 : f32 to vector<8x32xf32>
    %503 = arith.mulf %502, %501 : vector<8x32xf32>
    %504 = math.tanh %503 : vector<8x32xf32>
    %cst_222 = arith.constant 1.000000e+00 : f32
    %505 = vector.broadcast %cst_222 : f32 to vector<8x32xf32>
    %506 = arith.addf %504, %505 : vector<8x32xf32>
    %cst_223 = arith.constant 5.000000e-01 : f32
    %507 = vector.broadcast %cst_223 : f32 to vector<8x32xf32>
    %508 = arith.mulf %507, %506 : vector<8x32xf32>
    %509 = arith.mulf %498, %437 : vector<8x32xf32>
    %510 = arith.mulf %490, %500 : vector<8x32xf32>
    %511 = arith.addf %509, %510 : vector<8x32xf32>
    %512 = math.tanh %511 : vector<8x32xf32>
    %513 = arith.mulf %508, %512 : vector<8x32xf32>
    %c0_224 = arith.constant 0 : index
    %c0_225 = arith.constant 0 : index
    %514 = vector.load %arg8[%c0_224, %c0_225] : memref<32x256xf32, #tpu.memory_space<vmem>>, vector<32x256xf32>
    %cst_226 = arith.constant dense<0.000000e+00> : vector<8x256xf32>
    %515 = tpu.matmul %513, %514, %cst_226 {dimension_numbers = #tpu.dot_dimension_numbers<[1], [0], [0], [1], [0, 0, 1, 1], [], []>} : vector<8x32xf32>, vector<32x256xf32>, vector<8x256xf32> -> vector<8x256xf32>
    %516 = vector.extract_strided_slice %515 {offsets = [0, 0], sizes = [8, 128], strides = [1, 1]} : vector<8x256xf32> to vector<8x128xf32>
    %517 = vector.extract_strided_slice %515 {offsets = [0, 128], sizes = [8, 128], strides = [1, 1]} : vector<8x256xf32> to vector<8x128xf32>
    %c0_227 = arith.constant 0 : index
    %c0_228 = arith.constant 0 : index
    %518 = vector.load %arg10[%c0_227, %c0_228] : memref<1x128xf32, #tpu.memory_space<vmem>>, vector<1x128xf32>
    %519 = vector.broadcast %518 : vector<1x128xf32> to vector<8x128xf32>
    %520 = arith.addf %517, %519 : vector<8x128xf32>
    %521 = arith.addf %520, %480 : vector<8x128xf32>
    %522 = vector.extract_strided_slice %521 {offsets = [0, 0], sizes = [8, 32], strides = [1, 1]} : vector<8x128xf32> to vector<8x32xf32>
    %cst_229 = arith.constant 5.000000e-01 : f32
    %523 = vector.broadcast %cst_229 : f32 to vector<8x32xf32>
    %524 = arith.mulf %523, %522 : vector<8x32xf32>
    %525 = math.tanh %524 : vector<8x32xf32>
    %cst_230 = arith.constant 1.000000e+00 : f32
    %526 = vector.broadcast %cst_230 : f32 to vector<8x32xf32>
    %527 = arith.addf %525, %526 : vector<8x32xf32>
    %cst_231 = arith.constant 5.000000e-01 : f32
    %528 = vector.broadcast %cst_231 : f32 to vector<8x32xf32>
    %529 = arith.mulf %528, %527 : vector<8x32xf32>
    %530 = vector.extract_strided_slice %521 {offsets = [0, 32], sizes = [8, 32], strides = [1, 1]} : vector<8x128xf32> to vector<8x32xf32>
    %cst_232 = arith.constant 5.000000e-01 : f32
    %531 = vector.broadcast %cst_232 : f32 to vector<8x32xf32>
    %532 = arith.mulf %531, %530 : vector<8x32xf32>
    %533 = math.tanh %532 : vector<8x32xf32>
    %cst_233 = arith.constant 1.000000e+00 : f32
    %534 = vector.broadcast %cst_233 : f32 to vector<8x32xf32>
    %535 = arith.addf %533, %534 : vector<8x32xf32>
    %cst_234 = arith.constant 5.000000e-01 : f32
    %536 = vector.broadcast %cst_234 : f32 to vector<8x32xf32>
    %537 = arith.mulf %536, %535 : vector<8x32xf32>
    %538 = vector.extract_strided_slice %521 {offsets = [0, 64], sizes = [8, 32], strides = [1, 1]} : vector<8x128xf32> to vector<8x32xf32>
    %539 = math.tanh %538 : vector<8x32xf32>
    %540 = vector.extract_strided_slice %521 {offsets = [0, 96], sizes = [8, 32], strides = [1, 1]} : vector<8x128xf32> to vector<8x32xf32>
    %cst_235 = arith.constant 5.000000e-01 : f32
    %541 = vector.broadcast %cst_235 : f32 to vector<8x32xf32>
    %542 = arith.mulf %541, %540 : vector<8x32xf32>
    %543 = math.tanh %542 : vector<8x32xf32>
    %cst_236 = arith.constant 1.000000e+00 : f32
    %544 = vector.broadcast %cst_236 : f32 to vector<8x32xf32>
    %545 = arith.addf %543, %544 : vector<8x32xf32>
    %cst_237 = arith.constant 5.000000e-01 : f32
    %546 = vector.broadcast %cst_237 : f32 to vector<8x32xf32>
    %547 = arith.mulf %546, %545 : vector<8x32xf32>
    %548 = arith.mulf %537, %476 : vector<8x32xf32>
    %549 = arith.mulf %529, %539 : vector<8x32xf32>
    %550 = arith.addf %548, %549 : vector<8x32xf32>
    %551 = math.tanh %550 : vector<8x32xf32>
    %552 = arith.mulf %547, %551 : vector<8x32xf32>
    %c0_238 = arith.constant 0 : index
    %c0_239 = arith.constant 0 : index
    %553 = vector.load %arg9[%c0_238, %c0_239] : memref<32x128xf32, #tpu.memory_space<vmem>>, vector<32x128xf32>
    %cst_240 = arith.constant dense<0.000000e+00> : vector<8x128xf32>
    %554 = tpu.matmul %552, %553, %cst_240 {dimension_numbers = #tpu.dot_dimension_numbers<[1], [0], [0], [1], [0, 0, 1, 1], [], []>} : vector<8x32xf32>, vector<32x128xf32>, vector<8x128xf32> -> vector<8x128xf32>
    %555 = vector.extract_strided_slice %58 {offsets = [56, 0], sizes = [8, 128], strides = [1, 1]} : vector<64x128xf32> to vector<8x128xf32>
    %556 = arith.addf %555, %516 : vector<8x128xf32>
    %557 = vector.extract_strided_slice %556 {offsets = [0, 0], sizes = [8, 32], strides = [1, 1]} : vector<8x128xf32> to vector<8x32xf32>
    %cst_241 = arith.constant 5.000000e-01 : f32
    %558 = vector.broadcast %cst_241 : f32 to vector<8x32xf32>
    %559 = arith.mulf %558, %557 : vector<8x32xf32>
    %560 = math.tanh %559 : vector<8x32xf32>
    %cst_242 = arith.constant 1.000000e+00 : f32
    %561 = vector.broadcast %cst_242 : f32 to vector<8x32xf32>
    %562 = arith.addf %560, %561 : vector<8x32xf32>
    %cst_243 = arith.constant 5.000000e-01 : f32
    %563 = vector.broadcast %cst_243 : f32 to vector<8x32xf32>
    %564 = arith.mulf %563, %562 : vector<8x32xf32>
    %565 = vector.extract_strided_slice %556 {offsets = [0, 32], sizes = [8, 32], strides = [1, 1]} : vector<8x128xf32> to vector<8x32xf32>
    %cst_244 = arith.constant 5.000000e-01 : f32
    %566 = vector.broadcast %cst_244 : f32 to vector<8x32xf32>
    %567 = arith.mulf %566, %565 : vector<8x32xf32>
    %568 = math.tanh %567 : vector<8x32xf32>
    %cst_245 = arith.constant 1.000000e+00 : f32
    %569 = vector.broadcast %cst_245 : f32 to vector<8x32xf32>
    %570 = arith.addf %568, %569 : vector<8x32xf32>
    %cst_246 = arith.constant 5.000000e-01 : f32
    %571 = vector.broadcast %cst_246 : f32 to vector<8x32xf32>
    %572 = arith.mulf %571, %570 : vector<8x32xf32>
    %573 = vector.extract_strided_slice %556 {offsets = [0, 64], sizes = [8, 32], strides = [1, 1]} : vector<8x128xf32> to vector<8x32xf32>
    %574 = math.tanh %573 : vector<8x32xf32>
    %575 = vector.extract_strided_slice %556 {offsets = [0, 96], sizes = [8, 32], strides = [1, 1]} : vector<8x128xf32> to vector<8x32xf32>
    %cst_247 = arith.constant 5.000000e-01 : f32
    %576 = vector.broadcast %cst_247 : f32 to vector<8x32xf32>
    %577 = arith.mulf %576, %575 : vector<8x32xf32>
    %578 = math.tanh %577 : vector<8x32xf32>
    %cst_248 = arith.constant 1.000000e+00 : f32
    %579 = vector.broadcast %cst_248 : f32 to vector<8x32xf32>
    %580 = arith.addf %578, %579 : vector<8x32xf32>
    %cst_249 = arith.constant 5.000000e-01 : f32
    %581 = vector.broadcast %cst_249 : f32 to vector<8x32xf32>
    %582 = arith.mulf %581, %580 : vector<8x32xf32>
    %583 = arith.mulf %572, %511 : vector<8x32xf32>
    %584 = arith.mulf %564, %574 : vector<8x32xf32>
    %585 = arith.addf %583, %584 : vector<8x32xf32>
    %586 = math.tanh %585 : vector<8x32xf32>
    %587 = arith.mulf %582, %586 : vector<8x32xf32>
    %c0_250 = arith.constant 0 : index
    %c128 = arith.constant 128 : index
    %588 = vector.load %arg8[%c0_250, %c128] : memref<32x256xf32, #tpu.memory_space<vmem>>, vector<32x128xf32>
    %cst_251 = arith.constant dense<0.000000e+00> : vector<8x128xf32>
    %589 = tpu.matmul %587, %588, %cst_251 {dimension_numbers = #tpu.dot_dimension_numbers<[1], [0], [0], [1], [0, 0, 1, 1], [], []>} : vector<8x32xf32>, vector<32x128xf32>, vector<8x128xf32> -> vector<8x128xf32>
    %c0_252 = arith.constant 0 : index
    %c0_253 = arith.constant 0 : index
    %590 = vector.load %arg10[%c0_252, %c0_253] : memref<1x128xf32, #tpu.memory_space<vmem>>, vector<1x128xf32>
    %591 = vector.broadcast %590 : vector<1x128xf32> to vector<8x128xf32>
    %592 = arith.addf %589, %591 : vector<8x128xf32>
    %593 = arith.addf %592, %554 : vector<8x128xf32>
    %594 = vector.extract_strided_slice %593 {offsets = [0, 0], sizes = [8, 32], strides = [1, 1]} : vector<8x128xf32> to vector<8x32xf32>
    %cst_254 = arith.constant 5.000000e-01 : f32
    %595 = vector.broadcast %cst_254 : f32 to vector<8x32xf32>
    %596 = arith.mulf %595, %594 : vector<8x32xf32>
    %597 = math.tanh %596 : vector<8x32xf32>
    %cst_255 = arith.constant 1.000000e+00 : f32
    %598 = vector.broadcast %cst_255 : f32 to vector<8x32xf32>
    %599 = arith.addf %597, %598 : vector<8x32xf32>
    %cst_256 = arith.constant 5.000000e-01 : f32
    %600 = vector.broadcast %cst_256 : f32 to vector<8x32xf32>
    %601 = arith.mulf %600, %599 : vector<8x32xf32>
    %602 = vector.extract_strided_slice %593 {offsets = [0, 32], sizes = [8, 32], strides = [1, 1]} : vector<8x128xf32> to vector<8x32xf32>
    %cst_257 = arith.constant 5.000000e-01 : f32
    %603 = vector.broadcast %cst_257 : f32 to vector<8x32xf32>
    %604 = arith.mulf %603, %602 : vector<8x32xf32>
    %605 = math.tanh %604 : vector<8x32xf32>
    %cst_258 = arith.constant 1.000000e+00 : f32
    %606 = vector.broadcast %cst_258 : f32 to vector<8x32xf32>
    %607 = arith.addf %605, %606 : vector<8x32xf32>
    %cst_259 = arith.constant 5.000000e-01 : f32
    %608 = vector.broadcast %cst_259 : f32 to vector<8x32xf32>
    %609 = arith.mulf %608, %607 : vector<8x32xf32>
    %610 = vector.extract_strided_slice %593 {offsets = [0, 64], sizes = [8, 32], strides = [1, 1]} : vector<8x128xf32> to vector<8x32xf32>
    %611 = math.tanh %610 : vector<8x32xf32>
    %612 = vector.extract_strided_slice %593 {offsets = [0, 96], sizes = [8, 32], strides = [1, 1]} : vector<8x128xf32> to vector<8x32xf32>
    %cst_260 = arith.constant 5.000000e-01 : f32
    %613 = vector.broadcast %cst_260 : f32 to vector<8x32xf32>
    %614 = arith.mulf %613, %612 : vector<8x32xf32>
    %615 = math.tanh %614 : vector<8x32xf32>
    %cst_261 = arith.constant 1.000000e+00 : f32
    %616 = vector.broadcast %cst_261 : f32 to vector<8x32xf32>
    %617 = arith.addf %615, %616 : vector<8x32xf32>
    %cst_262 = arith.constant 5.000000e-01 : f32
    %618 = vector.broadcast %cst_262 : f32 to vector<8x32xf32>
    %619 = arith.mulf %618, %617 : vector<8x32xf32>
    %620 = arith.mulf %609, %550 : vector<8x32xf32>
    %621 = arith.mulf %601, %611 : vector<8x32xf32>
    %622 = arith.addf %620, %621 : vector<8x32xf32>
    %623 = math.tanh %622 : vector<8x32xf32>
    %624 = arith.mulf %619, %623 : vector<8x32xf32>
    %c0_263 = arith.constant 0 : index
    %c0_264 = arith.constant 0 : index
    %625 = vector.load %arg11[%c0_263, %c0_264] : memref<32x128xf32, #tpu.memory_space<vmem>>, vector<32x128xf32>
    %cst_265 = arith.constant dense<0.000000e+00> : vector<8x128xf32>
    %626 = tpu.matmul %624, %625, %cst_265 {dimension_numbers = #tpu.dot_dimension_numbers<[1], [0], [0], [1], [0, 0, 1, 1], [], []>} : vector<8x32xf32>, vector<32x128xf32>, vector<8x128xf32> -> vector<8x128xf32>
    %c0_266 = arith.constant 0 : index
    %c0_267 = arith.constant 0 : index
    %627 = vector.load %arg12[%c0_266, %c0_267] : memref<1x128xf32, #tpu.memory_space<vmem>>, vector<1x128xf32>
    %628 = vector.broadcast %627 : vector<1x128xf32> to vector<8x128xf32>
    %629 = arith.addf %626, %628 : vector<8x128xf32>
    %630 = vector.extract_strided_slice %629 {offsets = [0, 0], sizes = [8, 32], strides = [1, 1]} : vector<8x128xf32> to vector<8x32xf32>
    %cst_268 = arith.constant 5.000000e-01 : f32
    %631 = vector.broadcast %cst_268 : f32 to vector<8x32xf32>
    %632 = arith.mulf %631, %630 : vector<8x32xf32>
    %633 = math.tanh %632 : vector<8x32xf32>
    %cst_269 = arith.constant 1.000000e+00 : f32
    %634 = vector.broadcast %cst_269 : f32 to vector<8x32xf32>
    %635 = arith.addf %633, %634 : vector<8x32xf32>
    %cst_270 = arith.constant 5.000000e-01 : f32
    %636 = vector.broadcast %cst_270 : f32 to vector<8x32xf32>
    %637 = arith.mulf %636, %635 : vector<8x32xf32>
    %638 = vector.extract_strided_slice %629 {offsets = [0, 64], sizes = [8, 32], strides = [1, 1]} : vector<8x128xf32> to vector<8x32xf32>
    %639 = math.tanh %638 : vector<8x32xf32>
    %640 = vector.extract_strided_slice %629 {offsets = [0, 96], sizes = [8, 32], strides = [1, 1]} : vector<8x128xf32> to vector<8x32xf32>
    %cst_271 = arith.constant 5.000000e-01 : f32
    %641 = vector.broadcast %cst_271 : f32 to vector<8x32xf32>
    %642 = arith.mulf %641, %640 : vector<8x32xf32>
    %643 = math.tanh %642 : vector<8x32xf32>
    %cst_272 = arith.constant 1.000000e+00 : f32
    %644 = vector.broadcast %cst_272 : f32 to vector<8x32xf32>
    %645 = arith.addf %643, %644 : vector<8x32xf32>
    %cst_273 = arith.constant 5.000000e-01 : f32
    %646 = vector.broadcast %cst_273 : f32 to vector<8x32xf32>
    %647 = arith.mulf %646, %645 : vector<8x32xf32>
    %648 = arith.mulf %637, %639 : vector<8x32xf32>
    %649 = math.tanh %648 : vector<8x32xf32>
    %650 = arith.mulf %647, %649 : vector<8x32xf32>
    %c0_274 = arith.constant 0 : index
    %c0_275 = arith.constant 0 : index
    %651 = vector.load %arg13[%c0_274, %c0_275] : memref<32x256xf32, #tpu.memory_space<vmem>>, vector<32x256xf32>
    %cst_276 = arith.constant dense<0.000000e+00> : vector<8x256xf32>
    %652 = tpu.matmul %650, %651, %cst_276 {dimension_numbers = #tpu.dot_dimension_numbers<[1], [0], [0], [1], [0, 0, 1, 1], [], []>} : vector<8x32xf32>, vector<32x256xf32>, vector<8x256xf32> -> vector<8x256xf32>
    %653 = vector.extract_strided_slice %652 {offsets = [0, 0], sizes = [8, 128], strides = [1, 1]} : vector<8x256xf32> to vector<8x128xf32>
    %654 = vector.extract_strided_slice %652 {offsets = [0, 128], sizes = [8, 128], strides = [1, 1]} : vector<8x256xf32> to vector<8x128xf32>
    %c0_277 = arith.constant 0 : index
    %c0_278 = arith.constant 0 : index
    %655 = vector.load %arg15[%c0_277, %c0_278] : memref<1x128xf32, #tpu.memory_space<vmem>>, vector<1x128xf32>
    %656 = vector.broadcast %655 : vector<1x128xf32> to vector<8x128xf32>
    %657 = arith.addf %654, %656 : vector<8x128xf32>
    %658 = vector.extract_strided_slice %657 {offsets = [0, 0], sizes = [8, 32], strides = [1, 1]} : vector<8x128xf32> to vector<8x32xf32>
    %cst_279 = arith.constant 5.000000e-01 : f32
    %659 = vector.broadcast %cst_279 : f32 to vector<8x32xf32>
    %660 = arith.mulf %659, %658 : vector<8x32xf32>
    %661 = math.tanh %660 : vector<8x32xf32>
    %cst_280 = arith.constant 1.000000e+00 : f32
    %662 = vector.broadcast %cst_280 : f32 to vector<8x32xf32>
    %663 = arith.addf %661, %662 : vector<8x32xf32>
    %cst_281 = arith.constant 5.000000e-01 : f32
    %664 = vector.broadcast %cst_281 : f32 to vector<8x32xf32>
    %665 = arith.mulf %664, %663 : vector<8x32xf32>
    %666 = vector.extract_strided_slice %657 {offsets = [0, 64], sizes = [8, 32], strides = [1, 1]} : vector<8x128xf32> to vector<8x32xf32>
    %667 = math.tanh %666 : vector<8x32xf32>
    %668 = vector.extract_strided_slice %657 {offsets = [0, 96], sizes = [8, 32], strides = [1, 1]} : vector<8x128xf32> to vector<8x32xf32>
    %cst_282 = arith.constant 5.000000e-01 : f32
    %669 = vector.broadcast %cst_282 : f32 to vector<8x32xf32>
    %670 = arith.mulf %669, %668 : vector<8x32xf32>
    %671 = math.tanh %670 : vector<8x32xf32>
    %cst_283 = arith.constant 1.000000e+00 : f32
    %672 = vector.broadcast %cst_283 : f32 to vector<8x32xf32>
    %673 = arith.addf %671, %672 : vector<8x32xf32>
    %cst_284 = arith.constant 5.000000e-01 : f32
    %674 = vector.broadcast %cst_284 : f32 to vector<8x32xf32>
    %675 = arith.mulf %674, %673 : vector<8x32xf32>
    %676 = arith.mulf %665, %667 : vector<8x32xf32>
    %677 = math.tanh %676 : vector<8x32xf32>
    %678 = arith.mulf %675, %677 : vector<8x32xf32>
    %c0_285 = arith.constant 0 : index
    %c0_286 = arith.constant 0 : index
    %679 = vector.load %arg14[%c0_285, %c0_286] : memref<32x128xf32, #tpu.memory_space<vmem>>, vector<32x128xf32>
    %cst_287 = arith.constant dense<0.000000e+00> : vector<8x128xf32>
    %680 = tpu.matmul %678, %679, %cst_287 {dimension_numbers = #tpu.dot_dimension_numbers<[1], [0], [0], [1], [0, 0, 1, 1], [], []>} : vector<8x32xf32>, vector<32x128xf32>, vector<8x128xf32> -> vector<8x128xf32>
    %c8_288 = arith.constant 8 : index
    %c0_289 = arith.constant 0 : index
    %681 = vector.load %arg23[%c8_288, %c0_289] : memref<80x32xf32, #tpu.memory_space<vmem>>, vector<8x32xf32>
    tpu.vector_store %arg23[%c8_288, %c0_289], %678 {strides = array<i32>} : memref<80x32xf32, #tpu.memory_space<vmem>>, vector<8x32xf32>,
    %682 = arith.addf %629, %653 : vector<8x128xf32>
    %683 = vector.extract_strided_slice %682 {offsets = [0, 0], sizes = [8, 32], strides = [1, 1]} : vector<8x128xf32> to vector<8x32xf32>
    %cst_290 = arith.constant 5.000000e-01 : f32
    %684 = vector.broadcast %cst_290 : f32 to vector<8x32xf32>
    %685 = arith.mulf %684, %683 : vector<8x32xf32>
    %686 = math.tanh %685 : vector<8x32xf32>
    %cst_291 = arith.constant 1.000000e+00 : f32
    %687 = vector.broadcast %cst_291 : f32 to vector<8x32xf32>
    %688 = arith.addf %686, %687 : vector<8x32xf32>
    %cst_292 = arith.constant 5.000000e-01 : f32
    %689 = vector.broadcast %cst_292 : f32 to vector<8x32xf32>
    %690 = arith.mulf %689, %688 : vector<8x32xf32>
    %691 = vector.extract_strided_slice %682 {offsets = [0, 32], sizes = [8, 32], strides = [1, 1]} : vector<8x128xf32> to vector<8x32xf32>
    %cst_293 = arith.constant 5.000000e-01 : f32
    %692 = vector.broadcast %cst_293 : f32 to vector<8x32xf32>
    %693 = arith.mulf %692, %691 : vector<8x32xf32>
    %694 = math.tanh %693 : vector<8x32xf32>
    %cst_294 = arith.constant 1.000000e+00 : f32
    %695 = vector.broadcast %cst_294 : f32 to vector<8x32xf32>
    %696 = arith.addf %694, %695 : vector<8x32xf32>
    %cst_295 = arith.constant 5.000000e-01 : f32
    %697 = vector.broadcast %cst_295 : f32 to vector<8x32xf32>
    %698 = arith.mulf %697, %696 : vector<8x32xf32>
    %699 = vector.extract_strided_slice %682 {offsets = [0, 64], sizes = [8, 32], strides = [1, 1]} : vector<8x128xf32> to vector<8x32xf32>
    %700 = math.tanh %699 : vector<8x32xf32>
    %701 = vector.extract_strided_slice %682 {offsets = [0, 96], sizes = [8, 32], strides = [1, 1]} : vector<8x128xf32> to vector<8x32xf32>
    %cst_296 = arith.constant 5.000000e-01 : f32
    %702 = vector.broadcast %cst_296 : f32 to vector<8x32xf32>
    %703 = arith.mulf %702, %701 : vector<8x32xf32>
    %704 = math.tanh %703 : vector<8x32xf32>
    %cst_297 = arith.constant 1.000000e+00 : f32
    %705 = vector.broadcast %cst_297 : f32 to vector<8x32xf32>
    %706 = arith.addf %704, %705 : vector<8x32xf32>
    %cst_298 = arith.constant 5.000000e-01 : f32
    %707 = vector.broadcast %cst_298 : f32 to vector<8x32xf32>
    %708 = arith.mulf %707, %706 : vector<8x32xf32>
    %709 = arith.mulf %698, %648 : vector<8x32xf32>
    %710 = arith.mulf %690, %700 : vector<8x32xf32>
    %711 = arith.addf %709, %710 : vector<8x32xf32>
    %712 = math.tanh %711 : vector<8x32xf32>
    %713 = arith.mulf %708, %712 : vector<8x32xf32>
    %c0_299 = arith.constant 0 : index
    %c0_300 = arith.constant 0 : index
    %714 = vector.load %arg13[%c0_299, %c0_300] : memref<32x256xf32, #tpu.memory_space<vmem>>, vector<32x256xf32>
    %cst_301 = arith.constant dense<0.000000e+00> : vector<8x256xf32>
    %715 = tpu.matmul %713, %714, %cst_301 {dimension_numbers = #tpu.dot_dimension_numbers<[1], [0], [0], [1], [0, 0, 1, 1], [], []>} : vector<8x32xf32>, vector<32x256xf32>, vector<8x256xf32> -> vector<8x256xf32>
    %716 = vector.extract_strided_slice %715 {offsets = [0, 0], sizes = [8, 128], strides = [1, 1]} : vector<8x256xf32> to vector<8x128xf32>
    %717 = vector.extract_strided_slice %715 {offsets = [0, 128], sizes = [8, 128], strides = [1, 1]} : vector<8x256xf32> to vector<8x128xf32>
    %c0_302 = arith.constant 0 : index
    %c0_303 = arith.constant 0 : index
    %718 = vector.load %arg15[%c0_302, %c0_303] : memref<1x128xf32, #tpu.memory_space<vmem>>, vector<1x128xf32>
    %719 = vector.broadcast %718 : vector<1x128xf32> to vector<8x128xf32>
    %720 = arith.addf %717, %719 : vector<8x128xf32>
    %721 = arith.addf %720, %680 : vector<8x128xf32>
    %722 = vector.extract_strided_slice %721 {offsets = [0, 0], sizes = [8, 32], strides = [1, 1]} : vector<8x128xf32> to vector<8x32xf32>
    %cst_304 = arith.constant 5.000000e-01 : f32
    %723 = vector.broadcast %cst_304 : f32 to vector<8x32xf32>
    %724 = arith.mulf %723, %722 : vector<8x32xf32>
    %725 = math.tanh %724 : vector<8x32xf32>
    %cst_305 = arith.constant 1.000000e+00 : f32
    %726 = vector.broadcast %cst_305 : f32 to vector<8x32xf32>
    %727 = arith.addf %725, %726 : vector<8x32xf32>
    %cst_306 = arith.constant 5.000000e-01 : f32
    %728 = vector.broadcast %cst_306 : f32 to vector<8x32xf32>
    %729 = arith.mulf %728, %727 : vector<8x32xf32>
    %730 = vector.extract_strided_slice %721 {offsets = [0, 32], sizes = [8, 32], strides = [1, 1]} : vector<8x128xf32> to vector<8x32xf32>
    %cst_307 = arith.constant 5.000000e-01 : f32
    %731 = vector.broadcast %cst_307 : f32 to vector<8x32xf32>
    %732 = arith.mulf %731, %730 : vector<8x32xf32>
    %733 = math.tanh %732 : vector<8x32xf32>
    %cst_308 = arith.constant 1.000000e+00 : f32
    %734 = vector.broadcast %cst_308 : f32 to vector<8x32xf32>
    %735 = arith.addf %733, %734 : vector<8x32xf32>
    %cst_309 = arith.constant 5.000000e-01 : f32
    %736 = vector.broadcast %cst_309 : f32 to vector<8x32xf32>
    %737 = arith.mulf %736, %735 : vector<8x32xf32>
    %738 = vector.extract_strided_slice %721 {offsets = [0, 64], sizes = [8, 32], strides = [1, 1]} : vector<8x128xf32> to vector<8x32xf32>
    %739 = math.tanh %738 : vector<8x32xf32>
    %740 = vector.extract_strided_slice %721 {offsets = [0, 96], sizes = [8, 32], strides = [1, 1]} : vector<8x128xf32> to vector<8x32xf32>
    %cst_310 = arith.constant 5.000000e-01 : f32
    %741 = vector.broadcast %cst_310 : f32 to vector<8x32xf32>
    %742 = arith.mulf %741, %740 : vector<8x32xf32>
    %743 = math.tanh %742 : vector<8x32xf32>
    %cst_311 = arith.constant 1.000000e+00 : f32
    %744 = vector.broadcast %cst_311 : f32 to vector<8x32xf32>
    %745 = arith.addf %743, %744 : vector<8x32xf32>
    %cst_312 = arith.constant 5.000000e-01 : f32
    %746 = vector.broadcast %cst_312 : f32 to vector<8x32xf32>
    %747 = arith.mulf %746, %745 : vector<8x32xf32>
    %748 = arith.mulf %737, %676 : vector<8x32xf32>
    %749 = arith.mulf %729, %739 : vector<8x32xf32>
    %750 = arith.addf %748, %749 : vector<8x32xf32>
    %751 = math.tanh %750 : vector<8x32xf32>
    %752 = arith.mulf %747, %751 : vector<8x32xf32>
    %c0_313 = arith.constant 0 : index
    %c0_314 = arith.constant 0 : index
    %753 = vector.load %arg14[%c0_313, %c0_314] : memref<32x128xf32, #tpu.memory_space<vmem>>, vector<32x128xf32>
    %cst_315 = arith.constant dense<0.000000e+00> : vector<8x128xf32>
    %754 = tpu.matmul %752, %753, %cst_315 {dimension_numbers = #tpu.dot_dimension_numbers<[1], [0], [0], [1], [0, 0, 1, 1], [], []>} : vector<8x32xf32>, vector<32x128xf32>, vector<8x128xf32> -> vector<8x128xf32>
    %c16_316 = arith.constant 16 : index
    %c0_317 = arith.constant 0 : index
    %755 = vector.load %arg23[%c16_316, %c0_317] : memref<80x32xf32, #tpu.memory_space<vmem>>, vector<8x32xf32>
    tpu.vector_store %arg23[%c16_316, %c0_317], %752 {strides = array<i32>} : memref<80x32xf32, #tpu.memory_space<vmem>>, vector<8x32xf32>,
    %756 = arith.addf %629, %716 : vector<8x128xf32>
    %757 = vector.extract_strided_slice %756 {offsets = [0, 0], sizes = [8, 32], strides = [1, 1]} : vector<8x128xf32> to vector<8x32xf32>
    %cst_318 = arith.constant 5.000000e-01 : f32
    %758 = vector.broadcast %cst_318 : f32 to vector<8x32xf32>
    %759 = arith.mulf %758, %757 : vector<8x32xf32>
    %760 = math.tanh %759 : vector<8x32xf32>
    %cst_319 = arith.constant 1.000000e+00 : f32
    %761 = vector.broadcast %cst_319 : f32 to vector<8x32xf32>
    %762 = arith.addf %760, %761 : vector<8x32xf32>
    %cst_320 = arith.constant 5.000000e-01 : f32
    %763 = vector.broadcast %cst_320 : f32 to vector<8x32xf32>
    %764 = arith.mulf %763, %762 : vector<8x32xf32>
    %765 = vector.extract_strided_slice %756 {offsets = [0, 32], sizes = [8, 32], strides = [1, 1]} : vector<8x128xf32> to vector<8x32xf32>
    %cst_321 = arith.constant 5.000000e-01 : f32
    %766 = vector.broadcast %cst_321 : f32 to vector<8x32xf32>
    %767 = arith.mulf %766, %765 : vector<8x32xf32>
    %768 = math.tanh %767 : vector<8x32xf32>
    %cst_322 = arith.constant 1.000000e+00 : f32
    %769 = vector.broadcast %cst_322 : f32 to vector<8x32xf32>
    %770 = arith.addf %768, %769 : vector<8x32xf32>
    %cst_323 = arith.constant 5.000000e-01 : f32
    %771 = vector.broadcast %cst_323 : f32 to vector<8x32xf32>
    %772 = arith.mulf %771, %770 : vector<8x32xf32>
    %773 = vector.extract_strided_slice %756 {offsets = [0, 64], sizes = [8, 32], strides = [1, 1]} : vector<8x128xf32> to vector<8x32xf32>
    %774 = math.tanh %773 : vector<8x32xf32>
    %775 = vector.extract_strided_slice %756 {offsets = [0, 96], sizes = [8, 32], strides = [1, 1]} : vector<8x128xf32> to vector<8x32xf32>
    %cst_324 = arith.constant 5.000000e-01 : f32
    %776 = vector.broadcast %cst_324 : f32 to vector<8x32xf32>
    %777 = arith.mulf %776, %775 : vector<8x32xf32>
    %778 = math.tanh %777 : vector<8x32xf32>
    %cst_325 = arith.constant 1.000000e+00 : f32
    %779 = vector.broadcast %cst_325 : f32 to vector<8x32xf32>
    %780 = arith.addf %778, %779 : vector<8x32xf32>
    %cst_326 = arith.constant 5.000000e-01 : f32
    %781 = vector.broadcast %cst_326 : f32 to vector<8x32xf32>
    %782 = arith.mulf %781, %780 : vector<8x32xf32>
    %783 = arith.mulf %772, %711 : vector<8x32xf32>
    %784 = arith.mulf %764, %774 : vector<8x32xf32>
    %785 = arith.addf %783, %784 : vector<8x32xf32>
    %786 = math.tanh %785 : vector<8x32xf32>
    %787 = arith.mulf %782, %786 : vector<8x32xf32>
    %c0_327 = arith.constant 0 : index
    %c0_328 = arith.constant 0 : index
    %788 = vector.load %arg13[%c0_327, %c0_328] : memref<32x256xf32, #tpu.memory_space<vmem>>, vector<32x256xf32>
    %cst_329 = arith.constant dense<0.000000e+00> : vector<8x256xf32>
    %789 = tpu.matmul %787, %788, %cst_329 {dimension_numbers = #tpu.dot_dimension_numbers<[1], [0], [0], [1], [0, 0, 1, 1], [], []>} : vector<8x32xf32>, vector<32x256xf32>, vector<8x256xf32> -> vector<8x256xf32>
    %790 = vector.extract_strided_slice %789 {offsets = [0, 0], sizes = [8, 128], strides = [1, 1]} : vector<8x256xf32> to vector<8x128xf32>
    %791 = vector.extract_strided_slice %789 {offsets = [0, 128], sizes = [8, 128], strides = [1, 1]} : vector<8x256xf32> to vector<8x128xf32>
    %c0_330 = arith.constant 0 : index
    %c0_331 = arith.constant 0 : index
    %792 = vector.load %arg15[%c0_330, %c0_331] : memref<1x128xf32, #tpu.memory_space<vmem>>, vector<1x128xf32>
    %793 = vector.broadcast %792 : vector<1x128xf32> to vector<8x128xf32>
    %794 = arith.addf %791, %793 : vector<8x128xf32>
    %795 = arith.addf %794, %754 : vector<8x128xf32>
    %796 = vector.extract_strided_slice %795 {offsets = [0, 0], sizes = [8, 32], strides = [1, 1]} : vector<8x128xf32> to vector<8x32xf32>
    %cst_332 = arith.constant 5.000000e-01 : f32
    %797 = vector.broadcast %cst_332 : f32 to vector<8x32xf32>
    %798 = arith.mulf %797, %796 : vector<8x32xf32>
    %799 = math.tanh %798 : vector<8x32xf32>
    %cst_333 = arith.constant 1.000000e+00 : f32
    %800 = vector.broadcast %cst_333 : f32 to vector<8x32xf32>
    %801 = arith.addf %799, %800 : vector<8x32xf32>
    %cst_334 = arith.constant 5.000000e-01 : f32
    %802 = vector.broadcast %cst_334 : f32 to vector<8x32xf32>
    %803 = arith.mulf %802, %801 : vector<8x32xf32>
    %804 = vector.extract_strided_slice %795 {offsets = [0, 32], sizes = [8, 32], strides = [1, 1]} : vector<8x128xf32> to vector<8x32xf32>
    %cst_335 = arith.constant 5.000000e-01 : f32
    %805 = vector.broadcast %cst_335 : f32 to vector<8x32xf32>
    %806 = arith.mulf %805, %804 : vector<8x32xf32>
    %807 = math.tanh %806 : vector<8x32xf32>
    %cst_336 = arith.constant 1.000000e+00 : f32
    %808 = vector.broadcast %cst_336 : f32 to vector<8x32xf32>
    %809 = arith.addf %807, %808 : vector<8x32xf32>
    %cst_337 = arith.constant 5.000000e-01 : f32
    %810 = vector.broadcast %cst_337 : f32 to vector<8x32xf32>
    %811 = arith.mulf %810, %809 : vector<8x32xf32>
    %812 = vector.extract_strided_slice %795 {offsets = [0, 64], sizes = [8, 32], strides = [1, 1]} : vector<8x128xf32> to vector<8x32xf32>
    %813 = math.tanh %812 : vector<8x32xf32>
    %814 = vector.extract_strided_slice %795 {offsets = [0, 96], sizes = [8, 32], strides = [1, 1]} : vector<8x128xf32> to vector<8x32xf32>
    %cst_338 = arith.constant 5.000000e-01 : f32
    %815 = vector.broadcast %cst_338 : f32 to vector<8x32xf32>
    %816 = arith.mulf %815, %814 : vector<8x32xf32>
    %817 = math.tanh %816 : vector<8x32xf32>
    %cst_339 = arith.constant 1.000000e+00 : f32
    %818 = vector.broadcast %cst_339 : f32 to vector<8x32xf32>
    %819 = arith.addf %817, %818 : vector<8x32xf32>
    %cst_340 = arith.constant 5.000000e-01 : f32
    %820 = vector.broadcast %cst_340 : f32 to vector<8x32xf32>
    %821 = arith.mulf %820, %819 : vector<8x32xf32>
    %822 = arith.mulf %811, %750 : vector<8x32xf32>
    %823 = arith.mulf %803, %813 : vector<8x32xf32>
    %824 = arith.addf %822, %823 : vector<8x32xf32>
    %825 = math.tanh %824 : vector<8x32xf32>
    %826 = arith.mulf %821, %825 : vector<8x32xf32>
    %c0_341 = arith.constant 0 : index
    %c0_342 = arith.constant 0 : index
    %827 = vector.load %arg14[%c0_341, %c0_342] : memref<32x128xf32, #tpu.memory_space<vmem>>, vector<32x128xf32>
    %cst_343 = arith.constant dense<0.000000e+00> : vector<8x128xf32>
    %828 = tpu.matmul %826, %827, %cst_343 {dimension_numbers = #tpu.dot_dimension_numbers<[1], [0], [0], [1], [0, 0, 1, 1], [], []>} : vector<8x32xf32>, vector<32x128xf32>, vector<8x128xf32> -> vector<8x128xf32>
    %c24 = arith.constant 24 : index
    %c0_344 = arith.constant 0 : index
    %829 = vector.load %arg23[%c24, %c0_344] : memref<80x32xf32, #tpu.memory_space<vmem>>, vector<8x32xf32>
    tpu.vector_store %arg23[%c24, %c0_344], %826 {strides = array<i32>} : memref<80x32xf32, #tpu.memory_space<vmem>>, vector<8x32xf32>,
    %830 = arith.addf %629, %790 : vector<8x128xf32>
    %831 = vector.extract_strided_slice %830 {offsets = [0, 0], sizes = [8, 32], strides = [1, 1]} : vector<8x128xf32> to vector<8x32xf32>
    %cst_345 = arith.constant 5.000000e-01 : f32
    %832 = vector.broadcast %cst_345 : f32 to vector<8x32xf32>
    %833 = arith.mulf %832, %831 : vector<8x32xf32>
    %834 = math.tanh %833 : vector<8x32xf32>
    %cst_346 = arith.constant 1.000000e+00 : f32
    %835 = vector.broadcast %cst_346 : f32 to vector<8x32xf32>
    %836 = arith.addf %834, %835 : vector<8x32xf32>
    %cst_347 = arith.constant 5.000000e-01 : f32
    %837 = vector.broadcast %cst_347 : f32 to vector<8x32xf32>
    %838 = arith.mulf %837, %836 : vector<8x32xf32>
    %839 = vector.extract_strided_slice %830 {offsets = [0, 32], sizes = [8, 32], strides = [1, 1]} : vector<8x128xf32> to vector<8x32xf32>
    %cst_348 = arith.constant 5.000000e-01 : f32
    %840 = vector.broadcast %cst_348 : f32 to vector<8x32xf32>
    %841 = arith.mulf %840, %839 : vector<8x32xf32>
    %842 = math.tanh %841 : vector<8x32xf32>
    %cst_349 = arith.constant 1.000000e+00 : f32
    %843 = vector.broadcast %cst_349 : f32 to vector<8x32xf32>
    %844 = arith.addf %842, %843 : vector<8x32xf32>
    %cst_350 = arith.constant 5.000000e-01 : f32
    %845 = vector.broadcast %cst_350 : f32 to vector<8x32xf32>
    %846 = arith.mulf %845, %844 : vector<8x32xf32>
    %847 = vector.extract_strided_slice %830 {offsets = [0, 64], sizes = [8, 32], strides = [1, 1]} : vector<8x128xf32> to vector<8x32xf32>
    %848 = math.tanh %847 : vector<8x32xf32>
    %849 = vector.extract_strided_slice %830 {offsets = [0, 96], sizes = [8, 32], strides = [1, 1]} : vector<8x128xf32> to vector<8x32xf32>
    %cst_351 = arith.constant 5.000000e-01 : f32
    %850 = vector.broadcast %cst_351 : f32 to vector<8x32xf32>
    %851 = arith.mulf %850, %849 : vector<8x32xf32>
    %852 = math.tanh %851 : vector<8x32xf32>
    %cst_352 = arith.constant 1.000000e+00 : f32
    %853 = vector.broadcast %cst_352 : f32 to vector<8x32xf32>
    %854 = arith.addf %852, %853 : vector<8x32xf32>
    %cst_353 = arith.constant 5.000000e-01 : f32
    %855 = vector.broadcast %cst_353 : f32 to vector<8x32xf32>
    %856 = arith.mulf %855, %854 : vector<8x32xf32>
    %857 = arith.mulf %846, %785 : vector<8x32xf32>
    %858 = arith.mulf %838, %848 : vector<8x32xf32>
    %859 = arith.addf %857, %858 : vector<8x32xf32>
    %860 = math.tanh %859 : vector<8x32xf32>
    %861 = arith.mulf %856, %860 : vector<8x32xf32>
    %c0_354 = arith.constant 0 : index
    %c0_355 = arith.constant 0 : index
    %862 = vector.load %arg13[%c0_354, %c0_355] : memref<32x256xf32, #tpu.memory_space<vmem>>, vector<32x256xf32>
    %cst_356 = arith.constant dense<0.000000e+00> : vector<8x256xf32>
    %863 = tpu.matmul %861, %862, %cst_356 {dimension_numbers = #tpu.dot_dimension_numbers<[1], [0], [0], [1], [0, 0, 1, 1], [], []>} : vector<8x32xf32>, vector<32x256xf32>, vector<8x256xf32> -> vector<8x256xf32>
    %864 = vector.extract_strided_slice %863 {offsets = [0, 0], sizes = [8, 128], strides = [1, 1]} : vector<8x256xf32> to vector<8x128xf32>
    %865 = vector.extract_strided_slice %863 {offsets = [0, 128], sizes = [8, 128], strides = [1, 1]} : vector<8x256xf32> to vector<8x128xf32>
    %c0_357 = arith.constant 0 : index
    %c0_358 = arith.constant 0 : index
    %866 = vector.load %arg15[%c0_357, %c0_358] : memref<1x128xf32, #tpu.memory_space<vmem>>, vector<1x128xf32>
    %867 = vector.broadcast %866 : vector<1x128xf32> to vector<8x128xf32>
    %868 = arith.addf %865, %867 : vector<8x128xf32>
    %869 = arith.addf %868, %828 : vector<8x128xf32>
    %870 = vector.extract_strided_slice %869 {offsets = [0, 0], sizes = [8, 32], strides = [1, 1]} : vector<8x128xf32> to vector<8x32xf32>
    %cst_359 = arith.constant 5.000000e-01 : f32
    %871 = vector.broadcast %cst_359 : f32 to vector<8x32xf32>
    %872 = arith.mulf %871, %870 : vector<8x32xf32>
    %873 = math.tanh %872 : vector<8x32xf32>
    %cst_360 = arith.constant 1.000000e+00 : f32
    %874 = vector.broadcast %cst_360 : f32 to vector<8x32xf32>
    %875 = arith.addf %873, %874 : vector<8x32xf32>
    %cst_361 = arith.constant 5.000000e-01 : f32
    %876 = vector.broadcast %cst_361 : f32 to vector<8x32xf32>
    %877 = arith.mulf %876, %875 : vector<8x32xf32>
    %878 = vector.extract_strided_slice %869 {offsets = [0, 32], sizes = [8, 32], strides = [1, 1]} : vector<8x128xf32> to vector<8x32xf32>
    %cst_362 = arith.constant 5.000000e-01 : f32
    %879 = vector.broadcast %cst_362 : f32 to vector<8x32xf32>
    %880 = arith.mulf %879, %878 : vector<8x32xf32>
    %881 = math.tanh %880 : vector<8x32xf32>
    %cst_363 = arith.constant 1.000000e+00 : f32
    %882 = vector.broadcast %cst_363 : f32 to vector<8x32xf32>
    %883 = arith.addf %881, %882 : vector<8x32xf32>
    %cst_364 = arith.constant 5.000000e-01 : f32
    %884 = vector.broadcast %cst_364 : f32 to vector<8x32xf32>
    %885 = arith.mulf %884, %883 : vector<8x32xf32>
    %886 = vector.extract_strided_slice %869 {offsets = [0, 64], sizes = [8, 32], strides = [1, 1]} : vector<8x128xf32> to vector<8x32xf32>
    %887 = math.tanh %886 : vector<8x32xf32>
    %888 = vector.extract_strided_slice %869 {offsets = [0, 96], sizes = [8, 32], strides = [1, 1]} : vector<8x128xf32> to vector<8x32xf32>
    %cst_365 = arith.constant 5.000000e-01 : f32
    %889 = vector.broadcast %cst_365 : f32 to vector<8x32xf32>
    %890 = arith.mulf %889, %888 : vector<8x32xf32>
    %891 = math.tanh %890 : vector<8x32xf32>
    %cst_366 = arith.constant 1.000000e+00 : f32
    %892 = vector.broadcast %cst_366 : f32 to vector<8x32xf32>
    %893 = arith.addf %891, %892 : vector<8x32xf32>
    %cst_367 = arith.constant 5.000000e-01 : f32
    %894 = vector.broadcast %cst_367 : f32 to vector<8x32xf32>
    %895 = arith.mulf %894, %893 : vector<8x32xf32>
    %896 = arith.mulf %885, %824 : vector<8x32xf32>
    %897 = arith.mulf %877, %887 : vector<8x32xf32>
    %898 = arith.addf %896, %897 : vector<8x32xf32>
    %899 = math.tanh %898 : vector<8x32xf32>
    %900 = arith.mulf %895, %899 : vector<8x32xf32>
    %c0_368 = arith.constant 0 : index
    %c0_369 = arith.constant 0 : index
    %901 = vector.load %arg14[%c0_368, %c0_369] : memref<32x128xf32, #tpu.memory_space<vmem>>, vector<32x128xf32>
    %cst_370 = arith.constant dense<0.000000e+00> : vector<8x128xf32>
    %902 = tpu.matmul %900, %901, %cst_370 {dimension_numbers = #tpu.dot_dimension_numbers<[1], [0], [0], [1], [0, 0, 1, 1], [], []>} : vector<8x32xf32>, vector<32x128xf32>, vector<8x128xf32> -> vector<8x128xf32>
    %c32 = arith.constant 32 : index
    %c0_371 = arith.constant 0 : index
    %903 = vector.load %arg23[%c32, %c0_371] : memref<80x32xf32, #tpu.memory_space<vmem>>, vector<8x32xf32>
    tpu.vector_store %arg23[%c32, %c0_371], %900 {strides = array<i32>} : memref<80x32xf32, #tpu.memory_space<vmem>>, vector<8x32xf32>,
    %904 = arith.addf %629, %864 : vector<8x128xf32>
    %905 = vector.extract_strided_slice %904 {offsets = [0, 0], sizes = [8, 32], strides = [1, 1]} : vector<8x128xf32> to vector<8x32xf32>
    %cst_372 = arith.constant 5.000000e-01 : f32
    %906 = vector.broadcast %cst_372 : f32 to vector<8x32xf32>
    %907 = arith.mulf %906, %905 : vector<8x32xf32>
    %908 = math.tanh %907 : vector<8x32xf32>
    %cst_373 = arith.constant 1.000000e+00 : f32
    %909 = vector.broadcast %cst_373 : f32 to vector<8x32xf32>
    %910 = arith.addf %908, %909 : vector<8x32xf32>
    %cst_374 = arith.constant 5.000000e-01 : f32
    %911 = vector.broadcast %cst_374 : f32 to vector<8x32xf32>
    %912 = arith.mulf %911, %910 : vector<8x32xf32>
    %913 = vector.extract_strided_slice %904 {offsets = [0, 32], sizes = [8, 32], strides = [1, 1]} : vector<8x128xf32> to vector<8x32xf32>
    %cst_375 = arith.constant 5.000000e-01 : f32
    %914 = vector.broadcast %cst_375 : f32 to vector<8x32xf32>
    %915 = arith.mulf %914, %913 : vector<8x32xf32>
    %916 = math.tanh %915 : vector<8x32xf32>
    %cst_376 = arith.constant 1.000000e+00 : f32
    %917 = vector.broadcast %cst_376 : f32 to vector<8x32xf32>
    %918 = arith.addf %916, %917 : vector<8x32xf32>
    %cst_377 = arith.constant 5.000000e-01 : f32
    %919 = vector.broadcast %cst_377 : f32 to vector<8x32xf32>
    %920 = arith.mulf %919, %918 : vector<8x32xf32>
    %921 = vector.extract_strided_slice %904 {offsets = [0, 64], sizes = [8, 32], strides = [1, 1]} : vector<8x128xf32> to vector<8x32xf32>
    %922 = math.tanh %921 : vector<8x32xf32>
    %923 = vector.extract_strided_slice %904 {offsets = [0, 96], sizes = [8, 32], strides = [1, 1]} : vector<8x128xf32> to vector<8x32xf32>
    %cst_378 = arith.constant 5.000000e-01 : f32
    %924 = vector.broadcast %cst_378 : f32 to vector<8x32xf32>
    %925 = arith.mulf %924, %923 : vector<8x32xf32>
    %926 = math.tanh %925 : vector<8x32xf32>
    %cst_379 = arith.constant 1.000000e+00 : f32
    %927 = vector.broadcast %cst_379 : f32 to vector<8x32xf32>
    %928 = arith.addf %926, %927 : vector<8x32xf32>
    %cst_380 = arith.constant 5.000000e-01 : f32
    %929 = vector.broadcast %cst_380 : f32 to vector<8x32xf32>
    %930 = arith.mulf %929, %928 : vector<8x32xf32>
    %931 = arith.mulf %920, %859 : vector<8x32xf32>
    %932 = arith.mulf %912, %922 : vector<8x32xf32>
    %933 = arith.addf %931, %932 : vector<8x32xf32>
    %934 = math.tanh %933 : vector<8x32xf32>
    %935 = arith.mulf %930, %934 : vector<8x32xf32>
    %c0_381 = arith.constant 0 : index
    %c0_382 = arith.constant 0 : index
    %936 = vector.load %arg13[%c0_381, %c0_382] : memref<32x256xf32, #tpu.memory_space<vmem>>, vector<32x256xf32>
    %cst_383 = arith.constant dense<0.000000e+00> : vector<8x256xf32>
    %937 = tpu.matmul %935, %936, %cst_383 {dimension_numbers = #tpu.dot_dimension_numbers<[1], [0], [0], [1], [0, 0, 1, 1], [], []>} : vector<8x32xf32>, vector<32x256xf32>, vector<8x256xf32> -> vector<8x256xf32>
    %938 = vector.extract_strided_slice %937 {offsets = [0, 0], sizes = [8, 128], strides = [1, 1]} : vector<8x256xf32> to vector<8x128xf32>
    %939 = vector.extract_strided_slice %937 {offsets = [0, 128], sizes = [8, 128], strides = [1, 1]} : vector<8x256xf32> to vector<8x128xf32>
    %c0_384 = arith.constant 0 : index
    %c0_385 = arith.constant 0 : index
    %940 = vector.load %arg15[%c0_384, %c0_385] : memref<1x128xf32, #tpu.memory_space<vmem>>, vector<1x128xf32>
    %941 = vector.broadcast %940 : vector<1x128xf32> to vector<8x128xf32>
    %942 = arith.addf %939, %941 : vector<8x128xf32>
    %943 = arith.addf %942, %902 : vector<8x128xf32>
    %944 = vector.extract_strided_slice %943 {offsets = [0, 0], sizes = [8, 32], strides = [1, 1]} : vector<8x128xf32> to vector<8x32xf32>
    %cst_386 = arith.constant 5.000000e-01 : f32
    %945 = vector.broadcast %cst_386 : f32 to vector<8x32xf32>
    %946 = arith.mulf %945, %944 : vector<8x32xf32>
    %947 = math.tanh %946 : vector<8x32xf32>
    %cst_387 = arith.constant 1.000000e+00 : f32
    %948 = vector.broadcast %cst_387 : f32 to vector<8x32xf32>
    %949 = arith.addf %947, %948 : vector<8x32xf32>
    %cst_388 = arith.constant 5.000000e-01 : f32
    %950 = vector.broadcast %cst_388 : f32 to vector<8x32xf32>
    %951 = arith.mulf %950, %949 : vector<8x32xf32>
    %952 = vector.extract_strided_slice %943 {offsets = [0, 32], sizes = [8, 32], strides = [1, 1]} : vector<8x128xf32> to vector<8x32xf32>
    %cst_389 = arith.constant 5.000000e-01 : f32
    %953 = vector.broadcast %cst_389 : f32 to vector<8x32xf32>
    %954 = arith.mulf %953, %952 : vector<8x32xf32>
    %955 = math.tanh %954 : vector<8x32xf32>
    %cst_390 = arith.constant 1.000000e+00 : f32
    %956 = vector.broadcast %cst_390 : f32 to vector<8x32xf32>
    %957 = arith.addf %955, %956 : vector<8x32xf32>
    %cst_391 = arith.constant 5.000000e-01 : f32
    %958 = vector.broadcast %cst_391 : f32 to vector<8x32xf32>
    %959 = arith.mulf %958, %957 : vector<8x32xf32>
    %960 = vector.extract_strided_slice %943 {offsets = [0, 64], sizes = [8, 32], strides = [1, 1]} : vector<8x128xf32> to vector<8x32xf32>
    %961 = math.tanh %960 : vector<8x32xf32>
    %962 = vector.extract_strided_slice %943 {offsets = [0, 96], sizes = [8, 32], strides = [1, 1]} : vector<8x128xf32> to vector<8x32xf32>
    %cst_392 = arith.constant 5.000000e-01 : f32
    %963 = vector.broadcast %cst_392 : f32 to vector<8x32xf32>
    %964 = arith.mulf %963, %962 : vector<8x32xf32>
    %965 = math.tanh %964 : vector<8x32xf32>
    %cst_393 = arith.constant 1.000000e+00 : f32
    %966 = vector.broadcast %cst_393 : f32 to vector<8x32xf32>
    %967 = arith.addf %965, %966 : vector<8x32xf32>
    %cst_394 = arith.constant 5.000000e-01 : f32
    %968 = vector.broadcast %cst_394 : f32 to vector<8x32xf32>
    %969 = arith.mulf %968, %967 : vector<8x32xf32>
    %970 = arith.mulf %959, %898 : vector<8x32xf32>
    %971 = arith.mulf %951, %961 : vector<8x32xf32>
    %972 = arith.addf %970, %971 : vector<8x32xf32>
    %973 = math.tanh %972 : vector<8x32xf32>
    %974 = arith.mulf %969, %973 : vector<8x32xf32>
    %c0_395 = arith.constant 0 : index
    %c0_396 = arith.constant 0 : index
    %975 = vector.load %arg14[%c0_395, %c0_396] : memref<32x128xf32, #tpu.memory_space<vmem>>, vector<32x128xf32>
    %cst_397 = arith.constant dense<0.000000e+00> : vector<8x128xf32>
    %976 = tpu.matmul %974, %975, %cst_397 {dimension_numbers = #tpu.dot_dimension_numbers<[1], [0], [0], [1], [0, 0, 1, 1], [], []>} : vector<8x32xf32>, vector<32x128xf32>, vector<8x128xf32> -> vector<8x128xf32>
    %c40 = arith.constant 40 : index
    %c0_398 = arith.constant 0 : index
    %977 = vector.load %arg23[%c40, %c0_398] : memref<80x32xf32, #tpu.memory_space<vmem>>, vector<8x32xf32>
    tpu.vector_store %arg23[%c40, %c0_398], %974 {strides = array<i32>} : memref<80x32xf32, #tpu.memory_space<vmem>>, vector<8x32xf32>,
    %978 = arith.addf %629, %938 : vector<8x128xf32>
    %979 = vector.extract_strided_slice %978 {offsets = [0, 0], sizes = [8, 32], strides = [1, 1]} : vector<8x128xf32> to vector<8x32xf32>
    %cst_399 = arith.constant 5.000000e-01 : f32
    %980 = vector.broadcast %cst_399 : f32 to vector<8x32xf32>
    %981 = arith.mulf %980, %979 : vector<8x32xf32>
    %982 = math.tanh %981 : vector<8x32xf32>
    %cst_400 = arith.constant 1.000000e+00 : f32
    %983 = vector.broadcast %cst_400 : f32 to vector<8x32xf32>
    %984 = arith.addf %982, %983 : vector<8x32xf32>
    %cst_401 = arith.constant 5.000000e-01 : f32
    %985 = vector.broadcast %cst_401 : f32 to vector<8x32xf32>
    %986 = arith.mulf %985, %984 : vector<8x32xf32>
    %987 = vector.extract_strided_slice %978 {offsets = [0, 32], sizes = [8, 32], strides = [1, 1]} : vector<8x128xf32> to vector<8x32xf32>
    %cst_402 = arith.constant 5.000000e-01 : f32
    %988 = vector.broadcast %cst_402 : f32 to vector<8x32xf32>
    %989 = arith.mulf %988, %987 : vector<8x32xf32>
    %990 = math.tanh %989 : vector<8x32xf32>
    %cst_403 = arith.constant 1.000000e+00 : f32
    %991 = vector.broadcast %cst_403 : f32 to vector<8x32xf32>
    %992 = arith.addf %990, %991 : vector<8x32xf32>
    %cst_404 = arith.constant 5.000000e-01 : f32
    %993 = vector.broadcast %cst_404 : f32 to vector<8x32xf32>
    %994 = arith.mulf %993, %992 : vector<8x32xf32>
    %995 = vector.extract_strided_slice %978 {offsets = [0, 64], sizes = [8, 32], strides = [1, 1]} : vector<8x128xf32> to vector<8x32xf32>
    %996 = math.tanh %995 : vector<8x32xf32>
    %997 = vector.extract_strided_slice %978 {offsets = [0, 96], sizes = [8, 32], strides = [1, 1]} : vector<8x128xf32> to vector<8x32xf32>
    %cst_405 = arith.constant 5.000000e-01 : f32
    %998 = vector.broadcast %cst_405 : f32 to vector<8x32xf32>
    %999 = arith.mulf %998, %997 : vector<8x32xf32>
    %1000 = math.tanh %999 : vector<8x32xf32>
    %cst_406 = arith.constant 1.000000e+00 : f32
    %1001 = vector.broadcast %cst_406 : f32 to vector<8x32xf32>
    %1002 = arith.addf %1000, %1001 : vector<8x32xf32>
    %cst_407 = arith.constant 5.000000e-01 : f32
    %1003 = vector.broadcast %cst_407 : f32 to vector<8x32xf32>
    %1004 = arith.mulf %1003, %1002 : vector<8x32xf32>
    %1005 = arith.mulf %994, %933 : vector<8x32xf32>
    %1006 = arith.mulf %986, %996 : vector<8x32xf32>
    %1007 = arith.addf %1005, %1006 : vector<8x32xf32>
    %1008 = math.tanh %1007 : vector<8x32xf32>
    %1009 = arith.mulf %1004, %1008 : vector<8x32xf32>
    %c0_408 = arith.constant 0 : index
    %c0_409 = arith.constant 0 : index
    %1010 = vector.load %arg13[%c0_408, %c0_409] : memref<32x256xf32, #tpu.memory_space<vmem>>, vector<32x256xf32>
    %cst_410 = arith.constant dense<0.000000e+00> : vector<8x256xf32>
    %1011 = tpu.matmul %1009, %1010, %cst_410 {dimension_numbers = #tpu.dot_dimension_numbers<[1], [0], [0], [1], [0, 0, 1, 1], [], []>} : vector<8x32xf32>, vector<32x256xf32>, vector<8x256xf32> -> vector<8x256xf32>
    %1012 = vector.extract_strided_slice %1011 {offsets = [0, 0], sizes = [8, 128], strides = [1, 1]} : vector<8x256xf32> to vector<8x128xf32>
    %1013 = vector.extract_strided_slice %1011 {offsets = [0, 128], sizes = [8, 128], strides = [1, 1]} : vector<8x256xf32> to vector<8x128xf32>
    %c0_411 = arith.constant 0 : index
    %c0_412 = arith.constant 0 : index
    %1014 = vector.load %arg15[%c0_411, %c0_412] : memref<1x128xf32, #tpu.memory_space<vmem>>, vector<1x128xf32>
    %1015 = vector.broadcast %1014 : vector<1x128xf32> to vector<8x128xf32>
    %1016 = arith.addf %1013, %1015 : vector<8x128xf32>
    %1017 = arith.addf %1016, %976 : vector<8x128xf32>
    %1018 = vector.extract_strided_slice %1017 {offsets = [0, 0], sizes = [8, 32], strides = [1, 1]} : vector<8x128xf32> to vector<8x32xf32>
    %cst_413 = arith.constant 5.000000e-01 : f32
    %1019 = vector.broadcast %cst_413 : f32 to vector<8x32xf32>
    %1020 = arith.mulf %1019, %1018 : vector<8x32xf32>
    %1021 = math.tanh %1020 : vector<8x32xf32>
    %cst_414 = arith.constant 1.000000e+00 : f32
    %1022 = vector.broadcast %cst_414 : f32 to vector<8x32xf32>
    %1023 = arith.addf %1021, %1022 : vector<8x32xf32>
    %cst_415 = arith.constant 5.000000e-01 : f32
    %1024 = vector.broadcast %cst_415 : f32 to vector<8x32xf32>
    %1025 = arith.mulf %1024, %1023 : vector<8x32xf32>
    %1026 = vector.extract_strided_slice %1017 {offsets = [0, 32], sizes = [8, 32], strides = [1, 1]} : vector<8x128xf32> to vector<8x32xf32>
    %cst_416 = arith.constant 5.000000e-01 : f32
    %1027 = vector.broadcast %cst_416 : f32 to vector<8x32xf32>
    %1028 = arith.mulf %1027, %1026 : vector<8x32xf32>
    %1029 = math.tanh %1028 : vector<8x32xf32>
    %cst_417 = arith.constant 1.000000e+00 : f32
    %1030 = vector.broadcast %cst_417 : f32 to vector<8x32xf32>
    %1031 = arith.addf %1029, %1030 : vector<8x32xf32>
    %cst_418 = arith.constant 5.000000e-01 : f32
    %1032 = vector.broadcast %cst_418 : f32 to vector<8x32xf32>
    %1033 = arith.mulf %1032, %1031 : vector<8x32xf32>
    %1034 = vector.extract_strided_slice %1017 {offsets = [0, 64], sizes = [8, 32], strides = [1, 1]} : vector<8x128xf32> to vector<8x32xf32>
    %1035 = math.tanh %1034 : vector<8x32xf32>
    %1036 = vector.extract_strided_slice %1017 {offsets = [0, 96], sizes = [8, 32], strides = [1, 1]} : vector<8x128xf32> to vector<8x32xf32>
    %cst_419 = arith.constant 5.000000e-01 : f32
    %1037 = vector.broadcast %cst_419 : f32 to vector<8x32xf32>
    %1038 = arith.mulf %1037, %1036 : vector<8x32xf32>
    %1039 = math.tanh %1038 : vector<8x32xf32>
    %cst_420 = arith.constant 1.000000e+00 : f32
    %1040 = vector.broadcast %cst_420 : f32 to vector<8x32xf32>
    %1041 = arith.addf %1039, %1040 : vector<8x32xf32>
    %cst_421 = arith.constant 5.000000e-01 : f32
    %1042 = vector.broadcast %cst_421 : f32 to vector<8x32xf32>
    %1043 = arith.mulf %1042, %1041 : vector<8x32xf32>
    %1044 = arith.mulf %1033, %972 : vector<8x32xf32>
    %1045 = arith.mulf %1025, %1035 : vector<8x32xf32>
    %1046 = arith.addf %1044, %1045 : vector<8x32xf32>
    %1047 = math.tanh %1046 : vector<8x32xf32>
    %1048 = arith.mulf %1043, %1047 : vector<8x32xf32>
    %c0_422 = arith.constant 0 : index
    %c0_423 = arith.constant 0 : index
    %1049 = vector.load %arg14[%c0_422, %c0_423] : memref<32x128xf32, #tpu.memory_space<vmem>>, vector<32x128xf32>
    %cst_424 = arith.constant dense<0.000000e+00> : vector<8x128xf32>
    %1050 = tpu.matmul %1048, %1049, %cst_424 {dimension_numbers = #tpu.dot_dimension_numbers<[1], [0], [0], [1], [0, 0, 1, 1], [], []>} : vector<8x32xf32>, vector<32x128xf32>, vector<8x128xf32> -> vector<8x128xf32>
    %c48 = arith.constant 48 : index
    %c0_425 = arith.constant 0 : index
    %1051 = vector.load %arg23[%c48, %c0_425] : memref<80x32xf32, #tpu.memory_space<vmem>>, vector<8x32xf32>
    tpu.vector_store %arg23[%c48, %c0_425], %1048 {strides = array<i32>} : memref<80x32xf32, #tpu.memory_space<vmem>>, vector<8x32xf32>,
    %1052 = arith.addf %629, %1012 : vector<8x128xf32>
    %1053 = vector.extract_strided_slice %1052 {offsets = [0, 0], sizes = [8, 32], strides = [1, 1]} : vector<8x128xf32> to vector<8x32xf32>
    %cst_426 = arith.constant 5.000000e-01 : f32
    %1054 = vector.broadcast %cst_426 : f32 to vector<8x32xf32>
    %1055 = arith.mulf %1054, %1053 : vector<8x32xf32>
    %1056 = math.tanh %1055 : vector<8x32xf32>
    %cst_427 = arith.constant 1.000000e+00 : f32
    %1057 = vector.broadcast %cst_427 : f32 to vector<8x32xf32>
    %1058 = arith.addf %1056, %1057 : vector<8x32xf32>
    %cst_428 = arith.constant 5.000000e-01 : f32
    %1059 = vector.broadcast %cst_428 : f32 to vector<8x32xf32>
    %1060 = arith.mulf %1059, %1058 : vector<8x32xf32>
    %1061 = vector.extract_strided_slice %1052 {offsets = [0, 32], sizes = [8, 32], strides = [1, 1]} : vector<8x128xf32> to vector<8x32xf32>
    %cst_429 = arith.constant 5.000000e-01 : f32
    %1062 = vector.broadcast %cst_429 : f32 to vector<8x32xf32>
    %1063 = arith.mulf %1062, %1061 : vector<8x32xf32>
    %1064 = math.tanh %1063 : vector<8x32xf32>
    %cst_430 = arith.constant 1.000000e+00 : f32
    %1065 = vector.broadcast %cst_430 : f32 to vector<8x32xf32>
    %1066 = arith.addf %1064, %1065 : vector<8x32xf32>
    %cst_431 = arith.constant 5.000000e-01 : f32
    %1067 = vector.broadcast %cst_431 : f32 to vector<8x32xf32>
    %1068 = arith.mulf %1067, %1066 : vector<8x32xf32>
    %1069 = vector.extract_strided_slice %1052 {offsets = [0, 64], sizes = [8, 32], strides = [1, 1]} : vector<8x128xf32> to vector<8x32xf32>
    %1070 = math.tanh %1069 : vector<8x32xf32>
    %1071 = vector.extract_strided_slice %1052 {offsets = [0, 96], sizes = [8, 32], strides = [1, 1]} : vector<8x128xf32> to vector<8x32xf32>
    %cst_432 = arith.constant 5.000000e-01 : f32
    %1072 = vector.broadcast %cst_432 : f32 to vector<8x32xf32>
    %1073 = arith.mulf %1072, %1071 : vector<8x32xf32>
    %1074 = math.tanh %1073 : vector<8x32xf32>
    %cst_433 = arith.constant 1.000000e+00 : f32
    %1075 = vector.broadcast %cst_433 : f32 to vector<8x32xf32>
    %1076 = arith.addf %1074, %1075 : vector<8x32xf32>
    %cst_434 = arith.constant 5.000000e-01 : f32
    %1077 = vector.broadcast %cst_434 : f32 to vector<8x32xf32>
    %1078 = arith.mulf %1077, %1076 : vector<8x32xf32>
    %1079 = arith.mulf %1068, %1007 : vector<8x32xf32>
    %1080 = arith.mulf %1060, %1070 : vector<8x32xf32>
    %1081 = arith.addf %1079, %1080 : vector<8x32xf32>
    %1082 = math.tanh %1081 : vector<8x32xf32>
    %1083 = arith.mulf %1078, %1082 : vector<8x32xf32>
    %c0_435 = arith.constant 0 : index
    %c0_436 = arith.constant 0 : index
    %1084 = vector.load %arg13[%c0_435, %c0_436] : memref<32x256xf32, #tpu.memory_space<vmem>>, vector<32x256xf32>
    %cst_437 = arith.constant dense<0.000000e+00> : vector<8x256xf32>
    %1085 = tpu.matmul %1083, %1084, %cst_437 {dimension_numbers = #tpu.dot_dimension_numbers<[1], [0], [0], [1], [0, 0, 1, 1], [], []>} : vector<8x32xf32>, vector<32x256xf32>, vector<8x256xf32> -> vector<8x256xf32>
    %1086 = vector.extract_strided_slice %1085 {offsets = [0, 0], sizes = [8, 128], strides = [1, 1]} : vector<8x256xf32> to vector<8x128xf32>
    %1087 = vector.extract_strided_slice %1085 {offsets = [0, 128], sizes = [8, 128], strides = [1, 1]} : vector<8x256xf32> to vector<8x128xf32>
    %c0_438 = arith.constant 0 : index
    %c0_439 = arith.constant 0 : index
    %1088 = vector.load %arg15[%c0_438, %c0_439] : memref<1x128xf32, #tpu.memory_space<vmem>>, vector<1x128xf32>
    %1089 = vector.broadcast %1088 : vector<1x128xf32> to vector<8x128xf32>
    %1090 = arith.addf %1087, %1089 : vector<8x128xf32>
    %1091 = arith.addf %1090, %1050 : vector<8x128xf32>
    %1092 = vector.extract_strided_slice %1091 {offsets = [0, 0], sizes = [8, 32], strides = [1, 1]} : vector<8x128xf32> to vector<8x32xf32>
    %cst_440 = arith.constant 5.000000e-01 : f32
    %1093 = vector.broadcast %cst_440 : f32 to vector<8x32xf32>
    %1094 = arith.mulf %1093, %1092 : vector<8x32xf32>
    %1095 = math.tanh %1094 : vector<8x32xf32>
    %cst_441 = arith.constant 1.000000e+00 : f32
    %1096 = vector.broadcast %cst_441 : f32 to vector<8x32xf32>
    %1097 = arith.addf %1095, %1096 : vector<8x32xf32>
    %cst_442 = arith.constant 5.000000e-01 : f32
    %1098 = vector.broadcast %cst_442 : f32 to vector<8x32xf32>
    %1099 = arith.mulf %1098, %1097 : vector<8x32xf32>
    %1100 = vector.extract_strided_slice %1091 {offsets = [0, 32], sizes = [8, 32], strides = [1, 1]} : vector<8x128xf32> to vector<8x32xf32>
    %cst_443 = arith.constant 5.000000e-01 : f32
    %1101 = vector.broadcast %cst_443 : f32 to vector<8x32xf32>
    %1102 = arith.mulf %1101, %1100 : vector<8x32xf32>
    %1103 = math.tanh %1102 : vector<8x32xf32>
    %cst_444 = arith.constant 1.000000e+00 : f32
    %1104 = vector.broadcast %cst_444 : f32 to vector<8x32xf32>
    %1105 = arith.addf %1103, %1104 : vector<8x32xf32>
    %cst_445 = arith.constant 5.000000e-01 : f32
    %1106 = vector.broadcast %cst_445 : f32 to vector<8x32xf32>
    %1107 = arith.mulf %1106, %1105 : vector<8x32xf32>
    %1108 = vector.extract_strided_slice %1091 {offsets = [0, 64], sizes = [8, 32], strides = [1, 1]} : vector<8x128xf32> to vector<8x32xf32>
    %1109 = math.tanh %1108 : vector<8x32xf32>
    %1110 = vector.extract_strided_slice %1091 {offsets = [0, 96], sizes = [8, 32], strides = [1, 1]} : vector<8x128xf32> to vector<8x32xf32>
    %cst_446 = arith.constant 5.000000e-01 : f32
    %1111 = vector.broadcast %cst_446 : f32 to vector<8x32xf32>
    %1112 = arith.mulf %1111, %1110 : vector<8x32xf32>
    %1113 = math.tanh %1112 : vector<8x32xf32>
    %cst_447 = arith.constant 1.000000e+00 : f32
    %1114 = vector.broadcast %cst_447 : f32 to vector<8x32xf32>
    %1115 = arith.addf %1113, %1114 : vector<8x32xf32>
    %cst_448 = arith.constant 5.000000e-01 : f32
    %1116 = vector.broadcast %cst_448 : f32 to vector<8x32xf32>
    %1117 = arith.mulf %1116, %1115 : vector<8x32xf32>
    %1118 = arith.mulf %1107, %1046 : vector<8x32xf32>
    %1119 = arith.mulf %1099, %1109 : vector<8x32xf32>
    %1120 = arith.addf %1118, %1119 : vector<8x32xf32>
    %1121 = math.tanh %1120 : vector<8x32xf32>
    %1122 = arith.mulf %1117, %1121 : vector<8x32xf32>
    %c0_449 = arith.constant 0 : index
    %c0_450 = arith.constant 0 : index
    %1123 = vector.load %arg14[%c0_449, %c0_450] : memref<32x128xf32, #tpu.memory_space<vmem>>, vector<32x128xf32>
    %cst_451 = arith.constant dense<0.000000e+00> : vector<8x128xf32>
    %1124 = tpu.matmul %1122, %1123, %cst_451 {dimension_numbers = #tpu.dot_dimension_numbers<[1], [0], [0], [1], [0, 0, 1, 1], [], []>} : vector<8x32xf32>, vector<32x128xf32>, vector<8x128xf32> -> vector<8x128xf32>
    %c56 = arith.constant 56 : index
    %c0_452 = arith.constant 0 : index
    %1125 = vector.load %arg23[%c56, %c0_452] : memref<80x32xf32, #tpu.memory_space<vmem>>, vector<8x32xf32>
    tpu.vector_store %arg23[%c56, %c0_452], %1122 {strides = array<i32>} : memref<80x32xf32, #tpu.memory_space<vmem>>, vector<8x32xf32>,
    %1126 = arith.addf %629, %1086 : vector<8x128xf32>
    %1127 = vector.extract_strided_slice %1126 {offsets = [0, 0], sizes = [8, 32], strides = [1, 1]} : vector<8x128xf32> to vector<8x32xf32>
    %cst_453 = arith.constant 5.000000e-01 : f32
    %1128 = vector.broadcast %cst_453 : f32 to vector<8x32xf32>
    %1129 = arith.mulf %1128, %1127 : vector<8x32xf32>
    %1130 = math.tanh %1129 : vector<8x32xf32>
    %cst_454 = arith.constant 1.000000e+00 : f32
    %1131 = vector.broadcast %cst_454 : f32 to vector<8x32xf32>
    %1132 = arith.addf %1130, %1131 : vector<8x32xf32>
    %cst_455 = arith.constant 5.000000e-01 : f32
    %1133 = vector.broadcast %cst_455 : f32 to vector<8x32xf32>
    %1134 = arith.mulf %1133, %1132 : vector<8x32xf32>
    %1135 = vector.extract_strided_slice %1126 {offsets = [0, 32], sizes = [8, 32], strides = [1, 1]} : vector<8x128xf32> to vector<8x32xf32>
    %cst_456 = arith.constant 5.000000e-01 : f32
    %1136 = vector.broadcast %cst_456 : f32 to vector<8x32xf32>
    %1137 = arith.mulf %1136, %1135 : vector<8x32xf32>
    %1138 = math.tanh %1137 : vector<8x32xf32>
    %cst_457 = arith.constant 1.000000e+00 : f32
    %1139 = vector.broadcast %cst_457 : f32 to vector<8x32xf32>
    %1140 = arith.addf %1138, %1139 : vector<8x32xf32>
    %cst_458 = arith.constant 5.000000e-01 : f32
    %1141 = vector.broadcast %cst_458 : f32 to vector<8x32xf32>
    %1142 = arith.mulf %1141, %1140 : vector<8x32xf32>
    %1143 = vector.extract_strided_slice %1126 {offsets = [0, 64], sizes = [8, 32], strides = [1, 1]} : vector<8x128xf32> to vector<8x32xf32>
    %1144 = math.tanh %1143 : vector<8x32xf32>
    %1145 = vector.extract_strided_slice %1126 {offsets = [0, 96], sizes = [8, 32], strides = [1, 1]} : vector<8x128xf32> to vector<8x32xf32>
    %cst_459 = arith.constant 5.000000e-01 : f32
    %1146 = vector.broadcast %cst_459 : f32 to vector<8x32xf32>
    %1147 = arith.mulf %1146, %1145 : vector<8x32xf32>
    %1148 = math.tanh %1147 : vector<8x32xf32>
    %cst_460 = arith.constant 1.000000e+00 : f32
    %1149 = vector.broadcast %cst_460 : f32 to vector<8x32xf32>
    %1150 = arith.addf %1148, %1149 : vector<8x32xf32>
    %cst_461 = arith.constant 5.000000e-01 : f32
    %1151 = vector.broadcast %cst_461 : f32 to vector<8x32xf32>
    %1152 = arith.mulf %1151, %1150 : vector<8x32xf32>
    %1153 = arith.mulf %1142, %1081 : vector<8x32xf32>
    %1154 = arith.mulf %1134, %1144 : vector<8x32xf32>
    %1155 = arith.addf %1153, %1154 : vector<8x32xf32>
    %1156 = math.tanh %1155 : vector<8x32xf32>
    %1157 = arith.mulf %1152, %1156 : vector<8x32xf32>
    %c0_462 = arith.constant 0 : index
    %c128_463 = arith.constant 128 : index
    %1158 = vector.load %arg13[%c0_462, %c128_463] : memref<32x256xf32, #tpu.memory_space<vmem>>, vector<32x128xf32>
    %cst_464 = arith.constant dense<0.000000e+00> : vector<8x128xf32>
    %1159 = tpu.matmul %1157, %1158, %cst_464 {dimension_numbers = #tpu.dot_dimension_numbers<[1], [0], [0], [1], [0, 0, 1, 1], [], []>} : vector<8x32xf32>, vector<32x128xf32>, vector<8x128xf32> -> vector<8x128xf32>
    %c0_465 = arith.constant 0 : index
    %c0_466 = arith.constant 0 : index
    %1160 = vector.load %arg15[%c0_465, %c0_466] : memref<1x128xf32, #tpu.memory_space<vmem>>, vector<1x128xf32>
    %1161 = vector.broadcast %1160 : vector<1x128xf32> to vector<8x128xf32>
    %1162 = arith.addf %1159, %1161 : vector<8x128xf32>
    %1163 = arith.addf %1162, %1124 : vector<8x128xf32>
    %1164 = vector.extract_strided_slice %1163 {offsets = [0, 0], sizes = [8, 32], strides = [1, 1]} : vector<8x128xf32> to vector<8x32xf32>
    %cst_467 = arith.constant 5.000000e-01 : f32
    %1165 = vector.broadcast %cst_467 : f32 to vector<8x32xf32>
    %1166 = arith.mulf %1165, %1164 : vector<8x32xf32>
    %1167 = math.tanh %1166 : vector<8x32xf32>
    %cst_468 = arith.constant 1.000000e+00 : f32
    %1168 = vector.broadcast %cst_468 : f32 to vector<8x32xf32>
    %1169 = arith.addf %1167, %1168 : vector<8x32xf32>
    %cst_469 = arith.constant 5.000000e-01 : f32
    %1170 = vector.broadcast %cst_469 : f32 to vector<8x32xf32>
    %1171 = arith.mulf %1170, %1169 : vector<8x32xf32>
    %1172 = vector.extract_strided_slice %1163 {offsets = [0, 32], sizes = [8, 32], strides = [1, 1]} : vector<8x128xf32> to vector<8x32xf32>
    %cst_470 = arith.constant 5.000000e-01 : f32
    %1173 = vector.broadcast %cst_470 : f32 to vector<8x32xf32>
    %1174 = arith.mulf %1173, %1172 : vector<8x32xf32>
    %1175 = math.tanh %1174 : vector<8x32xf32>
    %cst_471 = arith.constant 1.000000e+00 : f32
    %1176 = vector.broadcast %cst_471 : f32 to vector<8x32xf32>
    %1177 = arith.addf %1175, %1176 : vector<8x32xf32>
    %cst_472 = arith.constant 5.000000e-01 : f32
    %1178 = vector.broadcast %cst_472 : f32 to vector<8x32xf32>
    %1179 = arith.mulf %1178, %1177 : vector<8x32xf32>
    %1180 = vector.extract_strided_slice %1163 {offsets = [0, 64], sizes = [8, 32], strides = [1, 1]} : vector<8x128xf32> to vector<8x32xf32>
    %1181 = math.tanh %1180 : vector<8x32xf32>
    %1182 = vector.extract_strided_slice %1163 {offsets = [0, 96], sizes = [8, 32], strides = [1, 1]} : vector<8x128xf32> to vector<8x32xf32>
    %cst_473 = arith.constant 5.000000e-01 : f32
    %1183 = vector.broadcast %cst_473 : f32 to vector<8x32xf32>
    %1184 = arith.mulf %1183, %1182 : vector<8x32xf32>
    %1185 = math.tanh %1184 : vector<8x32xf32>
    %cst_474 = arith.constant 1.000000e+00 : f32
    %1186 = vector.broadcast %cst_474 : f32 to vector<8x32xf32>
    %1187 = arith.addf %1185, %1186 : vector<8x32xf32>
    %cst_475 = arith.constant 5.000000e-01 : f32
    %1188 = vector.broadcast %cst_475 : f32 to vector<8x32xf32>
    %1189 = arith.mulf %1188, %1187 : vector<8x32xf32>
    %1190 = arith.mulf %1179, %1120 : vector<8x32xf32>
    %1191 = arith.mulf %1171, %1181 : vector<8x32xf32>
    %1192 = arith.addf %1190, %1191 : vector<8x32xf32>
    %1193 = math.tanh %1192 : vector<8x32xf32>
    %1194 = arith.mulf %1189, %1193 : vector<8x32xf32>
    %c64 = arith.constant 64 : index
    %c0_476 = arith.constant 0 : index
    %1195 = vector.load %arg23[%c64, %c0_476] : memref<80x32xf32, #tpu.memory_space<vmem>>, vector<8x32xf32>
    tpu.vector_store %arg23[%c64, %c0_476], %1194 {strides = array<i32>} : memref<80x32xf32, #tpu.memory_space<vmem>>, vector<8x32xf32>,
    %c0_477 = arith.constant 0 : index
    %c0_478 = arith.constant 0 : index
    %1196 = vector.load %arg23[%c0_477, %c0_478] : memref<80x32xf32, #tpu.memory_space<vmem>>, vector<64x32xf32>
    %c0_479 = arith.constant 0 : index
    %c0_480 = arith.constant 0 : index
    %c0_481 = arith.constant 0 : index
    %1197 = vector.load %arg16[%c0_479, %c0_480, %c0_481] : memref<3x32x32xf32, #tpu.memory_space<vmem>>, vector<1x32x32xf32>
    %1198 = vector.shape_cast %1197 : vector<1x32x32xf32> to vector<32x32xf32>
    %cst_482 = arith.constant dense<0.000000e+00> : vector<64x32xf32>
    %1199 = tpu.matmul %1196, %1198, %cst_482 {dimension_numbers = #tpu.dot_dimension_numbers<[1], [0], [0], [1], [0, 0, 1, 1], [], []>} : vector<64x32xf32>, vector<32x32xf32>, vector<64x32xf32> -> vector<64x32xf32>
    %c8_483 = arith.constant 8 : index
    %c0_484 = arith.constant 0 : index
    %1200 = vector.load %arg23[%c8_483, %c0_484] : memref<80x32xf32, #tpu.memory_space<vmem>>, vector<64x32xf32>
    %c1_485 = arith.constant 1 : index
    %c0_486 = arith.constant 0 : index
    %c0_487 = arith.constant 0 : index
    %1201 = vector.load %arg16[%c1_485, %c0_486, %c0_487] : memref<3x32x32xf32, #tpu.memory_space<vmem>>, vector<1x32x32xf32>
    %1202 = vector.shape_cast %1201 : vector<1x32x32xf32> to vector<32x32xf32>
    %cst_488 = arith.constant dense<0.000000e+00> : vector<64x32xf32>
    %1203 = tpu.matmul %1200, %1202, %cst_488 {dimension_numbers = #tpu.dot_dimension_numbers<[1], [0], [0], [1], [0, 0, 1, 1], [], []>} : vector<64x32xf32>, vector<32x32xf32>, vector<64x32xf32> -> vector<64x32xf32>
    %1204 = arith.addf %1199, %1203 : vector<64x32xf32>
    %c16_489 = arith.constant 16 : index
    %c0_490 = arith.constant 0 : index
    %1205 = vector.load %arg23[%c16_489, %c0_490] : memref<80x32xf32, #tpu.memory_space<vmem>>, vector<64x32xf32>
    %c2_491 = arith.constant 2 : index
    %c0_492 = arith.constant 0 : index
    %c0_493 = arith.constant 0 : index
    %1206 = vector.load %arg16[%c2_491, %c0_492, %c0_493] : memref<3x32x32xf32, #tpu.memory_space<vmem>>, vector<1x32x32xf32>
    %1207 = vector.shape_cast %1206 : vector<1x32x32xf32> to vector<32x32xf32>
    %cst_494 = arith.constant dense<0.000000e+00> : vector<64x32xf32>
    %1208 = tpu.matmul %1205, %1207, %cst_494 {dimension_numbers = #tpu.dot_dimension_numbers<[1], [0], [0], [1], [0, 0, 1, 1], [], []>} : vector<64x32xf32>, vector<32x32xf32>, vector<64x32xf32> -> vector<64x32xf32>
    %1209 = arith.addf %1204, %1208 : vector<64x32xf32>
    %c0_495 = arith.constant 0 : index
    %c0_496 = arith.constant 0 : index
    %1210 = vector.load %arg17[%c0_495, %c0_496] : memref<1x32xf32, #tpu.memory_space<vmem>>, vector<1x32xf32>
    %1211 = vector.broadcast %1210 : vector<1x32xf32> to vector<64x32xf32>
    %1212 = arith.addf %1209, %1211 : vector<64x32xf32>
    %cst_497 = arith.constant 0.000000e+00 : f32
    %1213 = vector.broadcast %cst_497 : f32 to vector<64x32xf32>
    %1214 = arith.maximumf %1212, %1213 : vector<64x32xf32>
    %c8_498 = arith.constant 8 : index
    %c0_499 = arith.constant 0 : index
    %1215 = vector.load %arg22[%c8_498, %c0_499] : memref<80x32xf32, #tpu.memory_space<vmem>>, vector<64x32xf32>
    tpu.vector_store %arg22[%c8_498, %c0_499], %1214 {strides = array<i32>} : memref<80x32xf32, #tpu.memory_space<vmem>>, vector<64x32xf32>,
    %c0_500 = arith.constant 0 : index
    %c0_501 = arith.constant 0 : index
    %1216 = vector.load %arg22[%c0_500, %c0_501] : memref<80x32xf32, #tpu.memory_space<vmem>>, vector<64x32xf32>
    %c0_502 = arith.constant 0 : index
    %c0_503 = arith.constant 0 : index
    %c0_504 = arith.constant 0 : index
    %1217 = vector.load %arg18[%c0_502, %c0_503, %c0_504] : memref<3x32x4xf32, #tpu.memory_space<vmem>>, vector<1x32x4xf32>
    %1218 = vector.shape_cast %1217 : vector<1x32x4xf32> to vector<32x4xf32>
    %cst_505 = arith.constant dense<0.000000e+00> : vector<64x4xf32>
    %1219 = tpu.matmul %1216, %1218, %cst_505 {dimension_numbers = #tpu.dot_dimension_numbers<[1], [0], [0], [1], [0, 0, 1, 1], [], []>} : vector<64x32xf32>, vector<32x4xf32>, vector<64x4xf32> -> vector<64x4xf32>
    %c8_506 = arith.constant 8 : index
    %c0_507 = arith.constant 0 : index
    %1220 = vector.load %arg22[%c8_506, %c0_507] : memref<80x32xf32, #tpu.memory_space<vmem>>, vector<64x32xf32>
    %c1_508 = arith.constant 1 : index
    %c0_509 = arith.constant 0 : index
    %c0_510 = arith.constant 0 : index
    %1221 = vector.load %arg18[%c1_508, %c0_509, %c0_510] : memref<3x32x4xf32, #tpu.memory_space<vmem>>, vector<1x32x4xf32>
    %1222 = vector.shape_cast %1221 : vector<1x32x4xf32> to vector<32x4xf32>
    %cst_511 = arith.constant dense<0.000000e+00> : vector<64x4xf32>
    %1223 = tpu.matmul %1220, %1222, %cst_511 {dimension_numbers = #tpu.dot_dimension_numbers<[1], [0], [0], [1], [0, 0, 1, 1], [], []>} : vector<64x32xf32>, vector<32x4xf32>, vector<64x4xf32> -> vector<64x4xf32>
    %1224 = arith.addf %1219, %1223 : vector<64x4xf32>
    %c16_512 = arith.constant 16 : index
    %c0_513 = arith.constant 0 : index
    %1225 = vector.load %arg22[%c16_512, %c0_513] : memref<80x32xf32, #tpu.memory_space<vmem>>, vector<64x32xf32>
    %c2_514 = arith.constant 2 : index
    %c0_515 = arith.constant 0 : index
    %c0_516 = arith.constant 0 : index
    %1226 = vector.load %arg18[%c2_514, %c0_515, %c0_516] : memref<3x32x4xf32, #tpu.memory_space<vmem>>, vector<1x32x4xf32>
    %1227 = vector.shape_cast %1226 : vector<1x32x4xf32> to vector<32x4xf32>
    %cst_517 = arith.constant dense<0.000000e+00> : vector<64x4xf32>
    %1228 = tpu.matmul %1225, %1227, %cst_517 {dimension_numbers = #tpu.dot_dimension_numbers<[1], [0], [0], [1], [0, 0, 1, 1], [], []>} : vector<64x32xf32>, vector<32x4xf32>, vector<64x4xf32> -> vector<64x4xf32>
    %1229 = arith.addf %1224, %1228 : vector<64x4xf32>
    %c0_518 = arith.constant 0 : index
    %c0_519 = arith.constant 0 : index
    %1230 = vector.load %arg19[%c0_518, %c0_519] : memref<1x4xf32, #tpu.memory_space<vmem>>, vector<1x4xf32>
    %1231 = vector.broadcast %1230 : vector<1x4xf32> to vector<64x4xf32>
    %1232 = arith.addf %1229, %1231 : vector<64x4xf32>
    %1233 = vector.shape_cast %1232 : vector<64x4xf32> to vector<8x8x4xf32>
    %c0_520 = arith.constant 0 : index
    %c0_521 = arith.constant 0 : index
    %c0_522 = arith.constant 0 : index
    %1234 = vector.load %arg20[%c0_520, %c0_521, %c0_522] : memref<8x8x4xf32, #tpu.memory_space<vmem>>, vector<8x8x4xf32>
    tpu.vector_store %arg20[%c0_520, %c0_521, %c0_522], %1233 {strides = array<i32>} : memref<8x8x4xf32, #tpu.memory_space<vmem>>, vector<8x8x4xf32>,
    return
  }
  func.func @transform_0(%arg0: i32) -> (i32, i32, i32) {
    %c0_i32 = arith.constant 0 : i32
    %c0_i32_0 = arith.constant 0 : i32
    %c0_i32_1 = arith.constant 0 : i32
    return %c0_i32, %arg0, %c0_i32_0 : i32, i32, i32
  }
  func.func @transform_1(%arg0: i32) -> (i32, i32, i32) {
    %c0_i32 = arith.constant 0 : i32
    %c0_i32_0 = arith.constant 0 : i32
    %c0_i32_1 = arith.constant 0 : i32
    %c0_i32_2 = arith.constant 0 : i32
    return %c0_i32, %c0_i32_0, %c0_i32_1 : i32, i32, i32
  }
  func.func @transform_2(%arg0: i32) -> (i32, i32) {
    %c0_i32 = arith.constant 0 : i32
    %c0_i32_0 = arith.constant 0 : i32
    %c0_i32_1 = arith.constant 0 : i32
    return %c0_i32, %c0_i32_0 : i32, i32
  }
  func.func @transform_3(%arg0: i32) -> (i32, i32, i32) {
    %c0_i32 = arith.constant 0 : i32
    %c0_i32_0 = arith.constant 0 : i32
    %c0_i32_1 = arith.constant 0 : i32
    %c0_i32_2 = arith.constant 0 : i32
    return %c0_i32, %c0_i32_0, %c0_i32_1 : i32, i32, i32
  }
  func.func @transform_4(%arg0: i32) -> (i32, i32) {
    %c0_i32 = arith.constant 0 : i32
    %c0_i32_0 = arith.constant 0 : i32
    %c0_i32_1 = arith.constant 0 : i32
    return %c0_i32, %c0_i32_0 : i32, i32
  }
  func.func @transform_5(%arg0: i32) -> (i32, i32) {
    %c0_i32 = arith.constant 0 : i32
    %c0_i32_0 = arith.constant 0 : i32
    %c0_i32_1 = arith.constant 0 : i32
    return %c0_i32, %c0_i32_0 : i32, i32
  }
  func.func @transform_6(%arg0: i32) -> (i32, i32) {
    %c0_i32 = arith.constant 0 : i32
    %c0_i32_0 = arith.constant 0 : i32
    %c0_i32_1 = arith.constant 0 : i32
    return %c0_i32, %c0_i32_0 : i32, i32
  }
  func.func @transform_7(%arg0: i32) -> (i32, i32) {
    %c0_i32 = arith.constant 0 : i32
    %c0_i32_0 = arith.constant 0 : i32
    %c0_i32_1 = arith.constant 0 : i32
    return %c0_i32, %c0_i32_0 : i32, i32
  }
  func.func @transform_8(%arg0: i32) -> (i32, i32) {
    %c0_i32 = arith.constant 0 : i32
    %c0_i32_0 = arith.constant 0 : i32
    %c0_i32_1 = arith.constant 0 : i32
    return %c0_i32, %c0_i32_0 : i32, i32
  }
  func.func @transform_9(%arg0: i32) -> (i32, i32) {
    %c0_i32 = arith.constant 0 : i32
    %c0_i32_0 = arith.constant 0 : i32
    %c0_i32_1 = arith.constant 0 : i32
    return %c0_i32, %c0_i32_0 : i32, i32
  }
  func.func @transform_10(%arg0: i32) -> (i32, i32) {
    %c0_i32 = arith.constant 0 : i32
    %c0_i32_0 = arith.constant 0 : i32
    %c0_i32_1 = arith.constant 0 : i32
    return %c0_i32, %c0_i32_0 : i32, i32
  }
  func.func @transform_11(%arg0: i32) -> (i32, i32) {
    %c0_i32 = arith.constant 0 : i32
    %c0_i32_0 = arith.constant 0 : i32
    %c0_i32_1 = arith.constant 0 : i32
    return %c0_i32, %c0_i32_0 : i32, i32
  }
  func.func @transform_12(%arg0: i32) -> (i32, i32) {
    %c0_i32 = arith.constant 0 : i32
    %c0_i32_0 = arith.constant 0 : i32
    %c0_i32_1 = arith.constant 0 : i32
    return %c0_i32, %c0_i32_0 : i32, i32
  }
  func.func @transform_13(%arg0: i32) -> (i32, i32) {
    %c0_i32 = arith.constant 0 : i32
    %c0_i32_0 = arith.constant 0 : i32
    %c0_i32_1 = arith.constant 0 : i32
    return %c0_i32, %c0_i32_0 : i32, i32
  }
  func.func @transform_14(%arg0: i32) -> (i32, i32) {
    %c0_i32 = arith.constant 0 : i32
    %c0_i32_0 = arith.constant 0 : i32
    %c0_i32_1 = arith.constant 0 : i32
    return %c0_i32, %c0_i32_0 : i32, i32
  }
  func.func @transform_15(%arg0: i32) -> (i32, i32, i32) {
    %c0_i32 = arith.constant 0 : i32
    %c0_i32_0 = arith.constant 0 : i32
    %c0_i32_1 = arith.constant 0 : i32
    %c0_i32_2 = arith.constant 0 : i32
    return %c0_i32, %c0_i32_0, %c0_i32_1 : i32, i32, i32
  }
  func.func @transform_16(%arg0: i32) -> (i32, i32) {
    %c0_i32 = arith.constant 0 : i32
    %c0_i32_0 = arith.constant 0 : i32
    %c0_i32_1 = arith.constant 0 : i32
    return %c0_i32, %c0_i32_0 : i32, i32
  }
  func.func @transform_17(%arg0: i32) -> (i32, i32, i32) {
    %c0_i32 = arith.constant 0 : i32
    %c0_i32_0 = arith.constant 0 : i32
    %c0_i32_1 = arith.constant 0 : i32
    %c0_i32_2 = arith.constant 0 : i32
    return %c0_i32, %c0_i32_0, %c0_i32_1 : i32, i32, i32
  }
  func.func @transform_18(%arg0: i32) -> (i32, i32) {
    %c0_i32 = arith.constant 0 : i32
    %c0_i32_0 = arith.constant 0 : i32
    %c0_i32_1 = arith.constant 0 : i32
    return %c0_i32, %c0_i32_0 : i32, i32
  }
  func.func @transform_19(%arg0: i32) -> (i32, i32, i32) {
    %c0_i32 = arith.constant 0 : i32
    %c0_i32_0 = arith.constant 0 : i32
    %c0_i32_1 = arith.constant 0 : i32
    return %c0_i32, %arg0, %c0_i32_0 : i32, i32, i32
  }
}

</mosaic_0001>

<bundles_post_ra>
// kernel: cnn_lstm_autoencoder_forward.1
= control target key start
LH: loop header
LB: loop body
LE: loop exit
PB: predicated region body
PF: predicated region fallthrough
CT: control target
= control target key end

     0   :  { %s7692_s0 = inlined_call_operand.vmem [shape: f32[8,8,4], index: 0, kind: input, shape index: {}]   ;;  %s7693_s1 = inlined_call_operand.vmem [shape: f32[3,4,32], index: 1, kind: input, shape index: {}]   ;;  %s7694_s2 = inlined_call_operand.vmem [shape: f32[1,32], index: 2, kind: input, shape index: {}]   ;;  %s7695_s3 = inlined_call_operand.vmem [shape: f32[3,32,32], index: 3, kind: input, shape index: {}]   ;;  %s7696_s4 = inlined_call_operand.vmem [shape: f32[1,32], index: 4, kind: input, shape index: {}]   ;;  %s7697_s5 = inlined_call_operand.vmem [shape: f32[32,128], index: 5, kind: input, shape index: {}]   ;;  %s7698_s6 = inlined_call_operand.vmem [shape: f32[1,128], index: 6, kind: input, shape index: {}]   ;;  %s7699_s7 = inlined_call_operand.vmem [shape: f32[32,256], index: 7, kind: input, shape index: {}]   ;;  %s7700_s8 = inlined_call_operand.vmem [shape: f32[32,128], index: 8, kind: input, shape index: {}]   ;;  %s7701_s9 = inlined_call_operand.vmem [shape: f32[1,128], index: 9, kind: input, shape index: {}]   ;;  %s7702_s10 = inlined_call_operand.vmem [shape: f32[32,128], index: 10, kind: input, shape index: {}]   ;;  %s7703_s11 = inlined_call_operand.vmem [shape: f32[1,128], index: 11, kind: input, shape index: {}]   ;;  %s7704_s12 = inlined_call_operand.vmem [shape: f32[32,256], index: 12, kind: input, shape index: {}]   ;;  %s7705_s13 = inlined_call_operand.vmem [shape: f32[32,128], index: 13, kind: input, shape index: {}]   ;;  %s7706_s14 = inlined_call_operand.vmem [shape: f32[1,128], index: 14, kind: input, shape index: {}]   ;;  %s7707_s15 = inlined_call_operand.vmem [shape: f32[3,32,32], index: 15, kind: input, shape index: {}]   ;;  %s7708_s16 = inlined_call_operand.hbm [shape: f32[1,32], index: 16, kind: input, shape index: {}]   ;;  %s7709_s17 = inlined_call_operand.vmem [shape: f32[3,32,4], index: 17, kind: input, shape index: {}]   ;;  %s7710_s18 = inlined_call_operand.vmem [shape: f32[1,4], index: 18, kind: input, shape index: {}]   ;;  %s7711_s19 = inlined_call_operand.vmem [shape: f32[8,8,4], index: 19, kind: output, shape index: {}]  }
   0x1   :  { %7715 = sst [smem:[#allocation8_spill]] %s7692_s0 }
   0x2   :  { %7716 = sst [smem:[#allocation9_spill]] %s7693_s1 }
   0x3   :  { %7717 = sst [smem:[#allocation10_spill]] %s7694_s2 }
   0x4   :  { %7718 = sst [smem:[#allocation11_spill]] %s7695_s3 }
   0x5   :  { %24 = vsyncpa [#allocation6], 0  ;;  %s6673_s0 = smov [#allocation5]   ;;  %s6649_s1 = scalar_lea.hbm %s7708_s16, 16 }
   0x6   :  { %s63_s30 = sshll.u32 %s6673_s0, 4  ;;  %p6650_p0 = scmp.ne.s32.totalorder %s7708_s16, %s6649_s1  ;;  %s64_s30 = int_to_ptr.vmem [resolvable:$true] %s63_s30 }
   0x7   :  { %p6653_p1 = scmp.lt.u32.totalorder %s6649_s1, %s7708_s16 }
   0x9   :  { %p6655_p2 = pnand %p6653_p1, %p6650_p0 }
   0xb   :  { %6658 = shalt.err (!%p6655_p2)
}
   0xc   :  { %s6659_s25 = scalar_lea.vmem %s64_s30, 16  ;;  %s6663_s3 = scalar_lea.vmem %s64_s30, 32 }
   0xd   :  { %p6660_p3 = scmp.ne.s32.totalorder %s64_s30, %s6659_s25  ;;  %p6664_p4 = scmp.lt.s32.totalorder %s64_s30, %s64_s30 }
   0xe   :  { %p6665_p5 = scmp.lt.s32.totalorder %s6663_s3, %s6659_s25 }
  0x10   :  { %p6666_p6 = por %p6665_p5, %p6664_p4 }
  0x12   :  { %p6667_p7 = pnand %p6666_p6, %p6660_p3 }
  0x14   :  { %6670 = shalt.err (!%p6667_p7)
}
  0x15   :  { %66 = dma.hbm_to_vmem [thread:$0]  %s7708_s16, 16, %s64_s30, [#allocation6]  }
  0x16   :  { %6671 = dma.done.wait [#allocation6], 16  }
  0x17   :  { %6672 = vsyncadd [#allocation6], 4294967280  ;;  %vm74_vm0 = vcmask 31744   ;;  %vm77_vm1 = vcmask 261120   ;;  %v6674_v0 = vmov 0.0   ;;  %vm134_vm2 = vcmask 1043456  }
  0x18   :  { %75 = vst.msk [vmem:[#allocation2] sm:$0xff] %vm74_vm0, %v6674_v0  ;;  %76 = vst.msk [vmem:[#allocation2 + $0x48] sm:$0xff] %vm74_vm0, %v6674_v0  ;;  %s7719_s29 = sld [smem:[#allocation9_spill]]  ;;  %s7720_s20 = sld [smem:[#allocation8_spill]]  ;;  %vm6679_vm3 = vmmov 0  }
  0x19   :  { %78 = vst.msk [vmem:[#allocation3] sm:$0xff] %vm77_vm1, %v6674_v0  ;;  %79 = vst.msk [vmem:[#allocation3 + $0x48] sm:$0xff] %vm77_vm1, %v6674_v0  ;;  %s7721_s23 = sld [smem:[#allocation11_spill]]  ;;  %s7722_s2 = sld [smem:[#allocation10_spill]] }
  0x1a   :  { %80 = vst.msk [vmem:[#allocation4] sm:$0xff] %vm77_vm1, %v6674_v0  ;;  %81 = vst.msk [vmem:[#allocation4 + $0x48] sm:$0xff] %vm77_vm1, %v6674_v0 }
  0x1e   :  { %v5242_v1 = vld [vmem:[%s7719_s29 + $0x4] sm:$0xf]  ;;  %v106_v3 = vld [vmem:[%s7719_s29] sm:$0xf]  ;;  %v83_v4 = vld [vmem:[%s7720_s20 + $0x8] sm:$0xff] }
  0x1f   :  { %v82_v2 = vld [vmem:[%s7720_s20] sm:$0xff]  ;;  %5653 = vmatprep.subr.msk.mxu0 %vm134_vm2, %v5242_v1  ;;  %v84_v5 = vld [vmem:[%s7720_s20 + $0x10] sm:$0xff]  ;;  %v85_v6 = vld [vmem:[%s7720_s20 + $0x18] sm:$0xff]  ;;  %91 = vst.msk [vmem:[#allocation2 + $0x10] sm:$0xff] %vm74_vm0, %v83_v4 }
  0x20   :  { %90 = vst.msk [vmem:[#allocation2 + $0x8] sm:$0xff] %vm74_vm0, %v82_v2  ;;  %5654 = vmatpush3.msk.msra.mxu0 %vm134_vm2, %v5242_v1  ;;  %92 = vst.msk [vmem:[#allocation2 + $0x18] sm:$0xff] %vm74_vm0, %v84_v5  ;;  %v86_v7 = vld [vmem:[%s7720_s20 + $0x20] sm:$0xff]  ;;  %v87_v8 = vld [vmem:[%s7720_s20 + $0x28] sm:$0xff] }
  0x21   :  { %93 = vst.msk [vmem:[#allocation2 + $0x20] sm:$0xff] %vm74_vm0, %v85_v6  ;;  %v88_v9 = vld [vmem:[%s7720_s20 + $0x30] sm:$0xff]  ;;  %5667 = vmatprep.subr.msk.mxu0 %vm134_vm2, %v106_v3  ;;  %94 = vst.msk [vmem:[#allocation2 + $0x28] sm:$0xff] %vm74_vm0, %v86_v7  ;;  %v89_v10 = vld [vmem:[%s7720_s20 + $0x38] sm:$0xff] }
  0x22   :  { %95 = vst.msk [vmem:[#allocation2 + $0x30] sm:$0xff] %vm74_vm0, %v87_v8  ;;  %96 = vst.msk [vmem:[#allocation2 + $0x38] sm:$0xff] %vm74_vm0, %v88_v9  ;;  %v5261_v14 = vld [vmem:[%s7719_s29 + $0x8] sm:$0xf]  ;;  %v98_v20 = vld [vmem:[#allocation2] sm:$0xff] }
  0x23   :  { %97 = vst.msk [vmem:[#allocation2 + $0x40] sm:$0xff] %vm74_vm0, %v89_v10  ;;  %v361_v21 = vld [vmem:[#allocation2 + $0x48] sm:$0xff]  ;;  %v5272_v22 = vld [vmem:[%s7721_s23 + $0x20] sm:$0xff]  ;;  %v5274_v25 = vld [vmem:[%s7721_s23 + $0x30] sm:$0xff] }
  0x24   :  { %v5273_v23 = vld [vmem:[%s7721_s23 + $0x28] sm:$0xff]  ;;  %v5275_v26 = vld [vmem:[%s7721_s23 + $0x38] sm:$0xff]  ;;  %v543_v28 = vld [vmem:[%s7721_s23] sm:$0xff] }
  0x25   :  { %v6082_v24 = vpack.c.bf16 %v5273_v23, %v5272_v22  ;;  %v6086_v27 = vpack.c.bf16 %v5275_v26, %v5274_v25  ;;  %v544_v29 = vld [vmem:[%s7721_s23 + $0x8] sm:$0xff]  ;;  %v5271_v31 = vld [vmem:[%s7722_s2] ss:$0 sm:$0xff]  ;;  %v545_v60 = vld [vmem:[%s7721_s23 + $0x10] sm:$0xff] }
  0x26   :  { %v100_v12 = vld [vmem:[#allocation2 + $0x10] sm:$0xff]  ;;  %v6090_v30 = vpack.c.bf16 %v544_v29, %v543_v28  ;;  %v546_v61 = vld [vmem:[%s7721_s23 + $0x18] sm:$0xff]  ;;  %v5292_v2 = vld [vmem:[%s7721_s23 + $0x40] sm:$0xff] }
  0x27   :  { %v99_v11 = vld [vmem:[#allocation2 + $0x8] sm:$0xff]  ;;  %v101_v13 = vld [vmem:[#allocation2 + $0x18] sm:$0xff]  ;;  %6376 = vmatprep.subr.bf16.mxu1 %v6082_v24  ;;  %v6094_v63 = vpack.c.bf16 %v546_v61, %v545_v60  ;;  %v535_v5 = vld [vmem:[#allocation3] sm:$0xff] }
  0x28   :  { %5655 = vmatprep.mubr.msk.f32.mxu0 %vm74_vm0, %v99_v11  ;;  %v102_v15 = vld [vmem:[#allocation2 + $0x20] sm:$0xff]  ;;  %v103_v16 = vld [vmem:[#allocation2 + $0x28] sm:$0xff]  ;;  %6378 = vmatpush3.bf16.msra.mxu1 %v6082_v24  ;;  %v5294_v8 = vld [vmem:[%s7721_s23 + $0x50] sm:$0xff] }
  0x29   :  { %5656 = vmatmul.mubr.msk.f32.vlgmr.msra.gmra.mrb[0].mxu0 %vm74_vm0, %v100_v12  ;;  %v104_v17 = vld [vmem:[#allocation2 + $0x30] sm:$0xff]  ;;  %v105_v18 = vld [vmem:[#allocation2 + $0x38] sm:$0xff]  ;;  %6377 = vmatprep.subr.bf16.mxu1 %v6086_v27  ;;  %v5304_v23 = vld [vmem:[%s7696_s4] ss:$0 sm:$0xff]  ;;  %s6677_s4 = smov 32  }
  0x2a   :  { %5668 = vmatpush3.msk.msra.mxu0 %vm134_vm2, %v106_v3  ;;  %5658 = vmatprep.mubr.msk.f32.mxu0 %vm74_vm0, %v101_v13  ;;  %v107_v19 = vld [vmem:[#allocation2 + $0x40] sm:$0xff]  ;;  %v5293_v3 = vld [vmem:[%s7721_s23 + $0x48] sm:$0xff]  ;;  %v5295_v9 = vld [vmem:[%s7721_s23 + $0x58] sm:$0xff] }
  0x2b   :  { %5681 = vmatprep.subr.msk.mxu0 %vm134_vm2, %v5261_v14  ;;  %v6098_v6 = vpack.c.bf16 %v5293_v3, %v5292_v2  ;;  %v6102_v10 = vpack.c.bf16 %v5295_v9, %v5294_v8 }
  0x2c   :  { %6379 = vmatpush3.bf16.msra.mxu1 %v6086_v27 }
  0x2d   :  { %5659 = vmatmul.mubr.msk.f32.gmra.mrb[2].mxu0 %vm74_vm0, %v102_v15  ;;  %6091 = vmatprep.subr.bf16.mxu1 %v6090_v30 }
  0x2e   :  { %5661 = vmatprep.mubr.msk.f32.mxu0 %vm74_vm0, %v103_v16 }
  0x31   :  { %5662 = vmatmul.mubr.msk.f32.gmra.mrb[4].mxu0 %vm74_vm0, %v104_v17 }
  0x32   :  { %5664 = vmatprep.mubr.msk.f32.mxu0 %vm74_vm0, %v105_v18 }
  0x35   :  { %5665 = vmatmul.mubr.msk.f32.gmra.mrb[6].mxu0 %vm74_vm0, %v107_v19 }
  0x36   :  { %5669 = vmatprep.mubr.msk.f32.mxu0 %vm74_vm0, %v98_v20 }
  0x39   :  { %5670 = vmatmul.mubr.msk.f32.vlgmr.msra.gmra.mrb[0].mxu0 %vm74_vm0, %v99_v11  ;;  %v797_v11 = vld [vmem:[#allocation3 + $0x48] sm:$0xff] }
  0x3a   :  { %5682 = vmatpush3.msk.msra.mxu0 %vm134_vm2, %v5261_v14  ;;  %5672 = vmatprep.mubr.msk.f32.mxu0 %vm74_vm0, %v100_v12 }
  0x3b   :  { %6083 = vmatprep.subr.bf16.mxu0 %v6082_v24 }
  0x3d   :  { %5673 = vmatmul.mubr.msk.f32.gmra.mrb[2].mxu0 %vm74_vm0, %v101_v13 }
  0x3e   :  { %5675 = vmatprep.mubr.msk.f32.mxu0 %vm74_vm0, %v102_v15 }
  0x41   :  { %5676 = vmatmul.mubr.msk.f32.gmra.mrb[4].mxu0 %vm74_vm0, %v103_v16 }
  0x42   :  { %5678 = vmatprep.mubr.msk.f32.mxu0 %vm74_vm0, %v104_v17 }
  0x45   :  { %5679 = vmatmul.mubr.msk.f32.gmra.mrb[6].mxu0 %vm74_vm0, %v105_v18 }
  0x46   :  { %5683 = vmatprep.mubr.msk.f32.mxu0 %vm74_vm0, %v100_v12  ;;  %v963_v12 = vld [vmem:[%s7697_s5] sm:$0xff] }
  0x49   :  { %5684 = vmatmul.mubr.msk.f32.vlgmr.msra.gmra.mrb[0].mxu0 %vm74_vm0, %v101_v13  ;;  %v964_v13 = vld [vmem:[%s7697_s5 + $0x8] sm:$0xff] }
  0x4a   :  { %5686 = vmatprep.mubr.msk.f32.mxu0 %vm74_vm0, %v102_v15  ;;  %6085 = vmatpush3.bf16.msra.mxu0 %v6082_v24  ;;  %v6106_v14 = vpack.c.bf16 %v964_v13, %v963_v12  ;;  %v965_v15 = vld [vmem:[%s7697_s5 + $0x10] sm:$0xff]  ;;  %v1120_v12 = vld [vmem:[%s7699_s7 + $0x8] sm:$0xff]  ;;  %v1122_v13 = vld [vmem:[%s7699_s7 + $0x18] sm:$0xff] }
  0x4b   :  { %6087 = vmatprep.subr.bf16.mxu0 %v6086_v27 }
  0x4d   :  { %5687 = vmatmul.mubr.msk.f32.gmra.mrb[2].mxu0 %vm74_vm0, %v103_v16  ;;  %v966_v16 = vld [vmem:[%s7697_s5 + $0x18] sm:$0xff] }
  0x4e   :  { %5689 = vmatprep.mubr.msk.f32.mxu0 %vm74_vm0, %v104_v17  ;;  %6089 = vmatpush3.bf16.msra.mxu0 %v6086_v27  ;;  %v6110_v17 = vpack.c.bf16 %v966_v16, %v965_v15  ;;  %v6996_v15 = vpack.c.bf16 %v1122_v13, %v1120_v12  ;;  %v1121_v16 = vld [vmem:[%s7699_s7 + $0x10] sm:$0xff] }
  0x4f   :  { %6107 = vmatprep.subr.bf16.mxu0 %v6106_v14 }
  0x51   :  { %5690 = vmatmul.mubr.msk.f32.gmra.mrb[4].mxu0 %vm74_vm0, %v105_v18 }
  0x52   :  { %5692 = vmatprep.mubr.msk.f32.mxu0 %vm74_vm0, %v107_v19 }
  0x55   :  { %5693 = vmatmul.mubr.msk.f32.gmra.mrb[6].mxu0 %vm74_vm0, %v361_v21 }
 0x11c   :  { %v5685_v32 = vpop.f32.mrb[0].mxu0 }
 0x11d   :  { %v512_v33 = vadd.f32 %v5685_v32, %v5271_v31  ;;  %v457_v34 = vpop.f32.mrb[1].mxu0 }
 0x11e   :  { %v511_v35 = vadd.f32 %v5271_v31, %v457_v34 }
 0x11f   :  { %v520_v36 = vmax.f32 %v512_v33, 0.0 }
 0x120   :  { %v519_v37 = vmax.f32 %v511_v35, 0.0  ;;  %v5688_v38 = vpop.f32.mrb[2].mxu0 }
 0x121   :  { %528 = vst.msk [vmem:[#allocation3 + $0x10] sm:$0xff] %vm77_vm1, %v520_v36  ;;  %v514_v39 = vadd.f32 %v5688_v38, %v5271_v31  ;;  %v467_v40 = vpop.f32.mrb[3].mxu0 }
 0x122   :  { %527 = vst.msk [vmem:[#allocation3 + $0x8] sm:$0xff] %vm77_vm1, %v519_v37  ;;  %v513_v41 = vadd.f32 %v5271_v31, %v467_v40 }
 0x123   :  { %v522_v42 = vmax.f32 %v514_v39, 0.0 }
 0x124   :  { %v521_v43 = vmax.f32 %v513_v41, 0.0  ;;  %v5691_v44 = vpop.f32.mrb[4].mxu0 }
 0x125   :  { %530 = vst.msk [vmem:[#allocation3 + $0x20] sm:$0xff] %vm77_vm1, %v522_v42  ;;  %v516_v45 = vadd.f32 %v5691_v44, %v5271_v31  ;;  %v477_v46 = vpop.f32.mrb[5].mxu0 }
 0x126   :  { %529 = vst.msk [vmem:[#allocation3 + $0x18] sm:$0xff] %vm77_vm1, %v521_v43  ;;  %v515_v47 = vadd.f32 %v5271_v31, %v477_v46 }
 0x127   :  { %v524_v48 = vmax.f32 %v516_v45, 0.0 }
 0x128   :  { %v523_v49 = vmax.f32 %v515_v47, 0.0  ;;  %v5694_v50 = vpop.f32.mrb[6].mxu0  ;;  %v537_v55 = vld [vmem:[#allocation3 + $0x10] sm:$0xff] }
 0x129   :  { %532 = vst.msk [vmem:[#allocation3 + $0x30] sm:$0xff] %vm77_vm1, %v524_v48  ;;  %v518_v51 = vadd.f32 %v5694_v50, %v5271_v31  ;;  %v487_v52 = vpop.f32.mrb[7].mxu0  ;;  %v536_v53 = vld [vmem:[#allocation3 + $0x8] sm:$0xff] }
 0x12a   :  { %531 = vst.msk [vmem:[#allocation3 + $0x28] sm:$0xff] %vm77_vm1, %v523_v49  ;;  %v517_v54 = vadd.f32 %v5271_v31, %v487_v52  ;;  %5703 = vmatprep.mubr.msk.f32.mxu0 %vm77_vm1, %v536_v53 }
 0x12b   :  { %v526_v56 = vmax.f32 %v518_v51, 0.0  ;;  %5704 = vmatmul.mubr.msk.f32.vlgmr.msra.gmra.mrb[8].mxu0 %vm77_vm1, %v537_v55  ;;  %v5305_v51 = vld [vmem:[%s7698_s6] ss:$0 sm:$0xff]  ;;  %s6675_s6 = smov 64  }
 0x12c   :  { %v525_v57 = vmax.f32 %v517_v54, 0.0  ;;  %v539_v59 = vld [vmem:[#allocation3 + $0x20] sm:$0xff]  ;;  %6109 = vmatpush3.bf16.msra.mxu0 %v6106_v14  ;;  %v1119_v14 = vld [vmem:[%s7699_s7] sm:$0xff] }
 0x12d   :  { %534 = vst.msk [vmem:[#allocation3 + $0x40] sm:$0xff] %vm77_vm1, %v526_v56  ;;  %v538_v58 = vld [vmem:[#allocation3 + $0x18] sm:$0xff]  ;;  %6111 = vmatprep.subr.bf16.mxu0 %v6110_v17 }
 0x12e   :  { %533 = vst.msk [vmem:[#allocation3 + $0x38] sm:$0xff] %vm77_vm1, %v525_v57  ;;  %5706 = vmatprep.mubr.msk.f32.mxu0 %vm77_vm1, %v538_v58 }
 0x12f   :  { %5707 = vmatmul.mubr.msk.f32.gmra.mrb[10].mxu0 %vm77_vm1, %v539_v59 }
 0x130   :  { %v541_v1 = vld [vmem:[#allocation3 + $0x30] sm:$0xff]  ;;  %6113 = vmatpush3.bf16.msra.mxu0 %v6110_v17  ;;  %v1124_v17 = vld [vmem:[%s7699_s7 + $0x28] sm:$0xff] }
 0x131   :  { %v540_v62 = vld [vmem:[#allocation3 + $0x28] sm:$0xff]  ;;  %6129 = vmatprep.subr.bf16.mxu0 %v6996_v15 }
 0x132   :  { %5709 = vmatprep.mubr.msk.f32.mxu1 %vm77_vm1, %v540_v62 }
 0x133   :  { %5710 = vmatmul.mubr.msk.f32.vlgmr.msra.gmra.mrb[0].mxu1 %vm77_vm1, %v541_v1 }
 0x134   :  { %6093 = vmatpush3.bf16.msra.mxu1 %v6090_v30  ;;  %v547_v7 = vld [vmem:[#allocation3 + $0x40] sm:$0xff] }
 0x135   :  { %v542_v4 = vld [vmem:[#allocation3 + $0x38] sm:$0xff]  ;;  %6095 = vmatprep.subr.bf16.mxu1 %v6094_v63 }
 0x136   :  { %5712 = vmatprep.mubr.msk.f32.mxu1 %vm77_vm1, %v542_v4 }
 0x137   :  { %5713 = vmatmul.mubr.msk.f32.gmra.mrb[2].mxu1 %vm77_vm1, %v547_v7 }
 0x138   :  { %6097 = vmatpush3.bf16.msra.mxu1 %v6094_v63  ;;  %5723 = vmatprep.mubr.msk.f32.mxu1 %vm77_vm1, %v535_v5 }
 0x139   :  { %6099 = vmatprep.subr.bf16.mxu1 %v6098_v6 }
 0x13b   :  { %5724 = vmatmul.mubr.msk.f32.vlgmr.msra.gmra.mrb[4].mxu1 %vm77_vm1, %v536_v53 }
 0x13c   :  { %6101 = vmatpush3.bf16.msra.mxu1 %v6098_v6  ;;  %5726 = vmatprep.mubr.msk.f32.mxu1 %vm77_vm1, %v537_v55 }
 0x13d   :  { %6103 = vmatprep.subr.bf16.mxu1 %v6102_v10 }
 0x13f   :  { %5727 = vmatmul.mubr.msk.f32.gmra.mrb[6].mxu1 %vm77_vm1, %v538_v58 }
 0x140   :  { %5729 = vmatprep.mubr.msk.f32.mxu1 %vm77_vm1, %v539_v59  ;;  %6105 = vmatpush3.bf16.msra.mxu1 %v6102_v10 }
 0x141   :  { %6115 = vmatprep.subr.bf16.mxu1 %v6996_v15 }
 0x143   :  { %5730 = vmatmul.mubr.msk.f32.gmra.mrb[0].mxu1 %vm77_vm1, %v540_v62 }
 0x144   :  { %5732 = vmatprep.mubr.msk.f32.mxu1 %vm77_vm1, %v541_v1 }
 0x147   :  { %5733 = vmatmul.mubr.msk.f32.gmra.mrb[2].mxu1 %vm77_vm1, %v542_v4 }
 0x148   :  { %5743 = vmatprep.mubr.msk.f32.mxu1 %vm77_vm1, %v537_v55 }
 0x14b   :  { %5744 = vmatmul.mubr.msk.f32.vlgmr.msra.gmra.mrb[4].mxu1 %vm77_vm1, %v538_v58 }
 0x14c   :  { %5746 = vmatprep.mubr.msk.f32.mxu1 %vm77_vm1, %v539_v59 }
 0x14f   :  { %5747 = vmatmul.mubr.msk.f32.gmra.mrb[6].mxu1 %vm77_vm1, %v540_v62 }
 0x150   :  { %5749 = vmatprep.mubr.msk.f32.mxu1 %vm77_vm1, %v541_v1 }
 0x153   :  { %5750 = vmatmul.mubr.msk.f32.gmra.mrb[0].mxu1 %vm77_vm1, %v542_v4 }
 0x154   :  { %5752 = vmatprep.mubr.msk.f32.mxu1 %vm77_vm1, %v547_v7 }
 0x157   :  { %5753 = vmatmul.mubr.msk.f32.gmra.mrb[2].mxu1 %vm77_vm1, %v797_v11 }
 0x158   :  { %1196 = vmatprep.mubr.f32.mxu1 %v6674_v0 }
 0x1fe   :  { %v5705_v18 = vpop.f32.mrb[8].mxu0 }
 0x1ff   :  { %v643_v19 = vpop.f32.mrb[9].mxu0 }
 0x202   :  { %v5708_v20 = vpop.f32.mrb[10].mxu0 }
 0x203   :  { %v653_v21 = vpop.f32.mrb[11].mxu0 }
 0x21e   :  { %v5745_v22 = vpop.f32.mrb[4].mxu1 }
 0x21f   :  { %v6380_v24 = vadd.f32 %v5745_v22, %v5705_v18  ;;  %v893_v25 = vpop.f32.mrb[5].mxu1  ;;  %v1126_v18 = vld [vmem:[%s7699_s7 + $0x38] sm:$0xff]  ;;  %v1125_v22 = vld [vmem:[%s7699_s7 + $0x30] sm:$0xff] }
 0x220   :  { %v6381_v26 = vadd.f32 %v893_v25, %v643_v19  ;;  %v7007_v19 = vpack.c.bf16 %v1121_v16, %v1119_v14 }
 0x221   :  { %v948_v27 = vadd.f32 %v6380_v24, %v5304_v23 }
 0x222   :  { %v947_v28 = vadd.f32 %v6381_v26, %v5304_v23  ;;  %v5748_v29 = vpop.f32.mrb[6].mxu1  ;;  %6117 = vmatpush1.bf16.msra.mxu1 %v7007_v19 }
 0x223   :  { %v6382_v30 = vadd.f32 %v5748_v29, %v5708_v20  ;;  %v903_v31 = vpop.f32.mrb[7].mxu1  ;;  %v956_v34 = vmax.f32 %v948_v27, 0.0  ;;  %v7009_v20 = vpack.c.bf16 %v1126_v18, %v1124_v17 }
 0x224   :  { %v955_v32 = vmax.f32 %v947_v28, 0.0  ;;  %v6383_v33 = vadd.f32 %v903_v31, %v653_v21  ;;  %v1123_v21 = vld [vmem:[%s7699_s7 + $0x20] sm:$0xff]  ;;  %s6676_s7 = smov 96  }
 0x225   :  { %v950_v35 = vadd.f32 %v6382_v30, %v5304_v23  ;;  %6119 = vmatprep.subr.bf16.mxu1 %v7009_v20  ;;  %v7035_v28 = vld [vmem:[%s7701_s9] ss:$0 sm:$0xff] }
 0x226   :  { %v949_v36 = vadd.f32 %v6383_v33, %v5304_v23  ;;  %v5751_v37 = vpop.f32.mrb[0].mxu1  ;;  %5763 = vmatprep.mubr.msk.f32.mxu0 %vm77_vm1, %v955_v32 }
 0x227   :  { %v913_v38 = vpop.f32.mrb[1].mxu1  ;;  %5764 = vmatmul.mubr.msk.f32.vlgmr.msra.gmra.mrb[12].mxu0 %vm77_vm1, %v956_v34  ;;  %v958_v41 = vmax.f32 %v950_v35, 0.0  ;;  %v952_v42 = vadd.f32 %v5751_v37, %v5304_v23 }
 0x228   :  { %v957_v39 = vmax.f32 %v949_v36, 0.0  ;;  %v951_v40 = vadd.f32 %v5304_v23, %v913_v38  ;;  %6131 = vmatpush1.bf16.msra.mxu0 %v7007_v19 }
 0x229   :  { %v960_v47 = vmax.f32 %v952_v42, 0.0  ;;  %6133 = vmatprep.subr.bf16.mxu0 %v7009_v20 }
 0x22a   :  { %v959_v43 = vmax.f32 %v951_v40, 0.0  ;;  %v5754_v44 = vpop.f32.mrb[2].mxu1  ;;  %5766 = vmatprep.mubr.msk.f32.mxu0 %vm77_vm1, %v957_v39 }
 0x22b   :  { %v923_v45 = vpop.f32.mrb[3].mxu1  ;;  %5767 = vmatmul.mubr.msk.f32.gmra.mrb[14].mxu0 %vm77_vm1, %v958_v41  ;;  %v954_v48 = vadd.f32 %v5754_v44, %v5304_v23 }
 0x22c   :  { %v953_v46 = vadd.f32 %v5304_v23, %v923_v45  ;;  %5769 = vmatprep.mubr.msk.f32.mxu0 %vm77_vm1, %v959_v43  ;;  %v7020_v23 = vpack.c.bf16 %v1125_v22, %v1123_v21 }
 0x22d   :  { %v962_v50 = vmax.f32 %v954_v48, 0.0  ;;  %v1227_v48 = vld [vmem:[%s7700_s8] sm:$0xff] }
 0x22e   :  { %v961_v49 = vmax.f32 %v953_v46, 0.0  ;;  %6121 = vmatpush1.bf16.msra.mxu1 %v7020_v23  ;;  %6135 = vmatpush1.bf16.msra.mxu0 %v7020_v23 }
 0x22f   :  { %5770 = vmatmul.mubr.msk.f32.gmra.mrb[16].mxu0 %vm77_vm1, %v960_v47  ;;  %6143 = vmatprep.subr.bf16.mxu0 %v6996_v15 }
 0x230   :  { %5772 = vmatprep.mubr.msk.f32.mxu0 %vm77_vm1, %v961_v49  ;;  %v1228_v49 = vld [vmem:[%s7700_s8 + $0x8] sm:$0xff] }
 0x233   :  { %5773 = vmatmul.mubr.msk.f32.gmra.mrb[18].mxu0 %vm77_vm1, %v962_v50  ;;  %v1229_v50 = vld [vmem:[%s7700_s8 + $0x10] sm:$0xff] }
 0x234   :  { %1402 = vmatprep.mubr.f32.mxu0 %v6674_v0 }
 0x2fa   :  { %v5765_v52 = vpop.f32.mrb[12].mxu0 }
 0x2fb   :  { %v1070_v53 = vadd.f32 %v5765_v52, %v5305_v51  ;;  %v1064_v54 = vpop.f32.mrb[13].mxu0  ;;  %v7051_v52 = vpack.c.bf16 %v1228_v49, %v1227_v48 }
 0x2fc   :  { %v1065_v55 = vadd.f32 %v5305_v51, %v1064_v54 }
 0x2fe   :  { %6457 = vtanh.f32 %v1065_v55  ;;  %v5768_v56 = vpop.f32.mrb[14].mxu0  ;;  %v1103_v6 = vmul.f32 0.5, %v1065_v55 }
 0x2ff   :  { %v6974_v57 = vadd.f32 %v5768_v56, %v5305_v51  ;;  %v1074_v58 = vpop.f32.mrb[15].mxu0 }
 0x300   :  { %v6976_v59 = vadd.f32 %v5305_v51, %v1074_v58  ;;  %6459 = vtanh.f32 %v1103_v6 }
 0x302   :  { %v5771_v60 = vpop.f32.mrb[16].mxu0 }
 0x303   :  { %v6978_v61 = vadd.f32 %v5771_v60, %v5305_v51  ;;  %v1084_v62 = vpop.f32.mrb[17].mxu0 }
 0x304   :  { %v6980_v63 = vadd.f32 %v5305_v51, %v1084_v62 }
 0x306   :  { %v5774_v1 = vpop.f32.mrb[18].mxu0 }
 0x307   :  { %v6982_v2 = vadd.f32 %v5774_v1, %v5305_v51  ;;  %v1094_v3 = vpop.f32.mrb[19].mxu0 }
 0x308   :  { %v6458_v4 = vpop.eup %6457  ;;  %v6984_v5 = vadd.f32 %v5305_v51, %v1094_v3  ;;  %v6678_v51 = vmov 0.0|0.0  }
 0x309   :  { %1109 = vrot.lane.b32.xlu0 %v6458_v4, %s6675_s6  ;;  %6122 = vmatprep.subr.bf16.mxu1 %v6678_v51 }
 0x30a   :  { %v6460_v7 = vpop.eup %6459 }
 0x30b   :  { %v1105_v8 = vadd.f32 1.0, %v6460_v7 }
 0x30d   :  { %v1106_v9 = vmul.f32 0.5, %v1105_v8 }
 0x37b   :  { %v1110_v10 = vpop.permute.xlu0 %1109 }
 0x37c   :  { %v1112_v11 = vmul.f32 %v1110_v10, %v1106_v9 }
 0x37e   :  { %6461 = vtanh.f32 %v1112_v11 }
 0x388   :  { %v6462_v24 = vpop.eup %6461 }
 0x389   :  { %1115 = vrot.lane.b32.xlu0 %v6462_v24, %s6676_s7 }
 0x38d   :  { %1313 = vrot.lane.b32.xlu0 %v1112_v11, %s6677_s4 }
 0x3fb   :  { %v1116_v25 = vpop.permute.xlu0 %1115 }
 0x3fc   :  { %v1118_v26 = vmul.f32 %v1116_v25, %v1106_v9 }
 0x3fe   :  { %1128 = vrot.lane.b32.xlu1 %v1118_v26, %s6677_s4 }
 0x3ff   :  { %v1314_v41 = vpop.permute.xlu0 %1313 }
 0x470   :  { %v1129_v27 = vpop.permute.xlu1 %1128 }
 0x471   :  { %5314 = vmatmul.mubr.msk.f32.vlgmr.msra.gmra.mrb[8].mxu1 %vm77_vm1, %v1129_v27 }
 0x472   :  { %6124 = vmatpush3.bf16.msra.mxu1 %v7051_v52  ;;  %5783 = vmatprep.mubr.msk.f32.mxu1 %vm6679_vm3, %v6674_v0 }
 0x473   :  { %6125 = vmatprep.subr.bf16.mxu1 %v6678_v51 }
 0x544   :  { %v1198_v29 = vpop.f32.mrb[8].mxu1 }
 0x545   :  { %v1306_v30 = vadd.f32 %v1198_v29, %v1070_v53  ;;  %v1200_v31 = vpop.f32.mrb[9].mxu1  ;;  %v1230_v53 = vld [vmem:[%s7700_s8 + $0x18] sm:$0xff] }
 0x546   :  { %v1210_v32 = vadd.f32 %v7035_v28, %v1200_v31  ;;  %v7057_v54 = vpack.c.bf16 %v1230_v53, %v1229_v50 }
 0x547   :  { %6463 = vtanh.f32 %v1306_v30  ;;  %v1307_v35 = vmul.f32 0.5, %v1306_v30 }
 0x548   :  { %6465 = vtanh.f32 %v1210_v32  ;;  %v1211_v36 = vmul.f32 0.5, %v1210_v32  ;;  %6127 = vmatpush3.bf16.msra.mxu1 %v7057_v54 }
 0x549   :  { %6467 = vtanh.f32 %v1307_v35  ;;  %6136 = vmatprep.subr.bf16.mxu1 %v6678_v51 }
 0x54a   :  { %6469 = vtanh.f32 %v1211_v36 }
 0x551   :  { %v6464_v33 = vpop.eup %6463 }
 0x552   :  { %v6466_v34 = vpop.eup %6465  ;;  %1318 = vrot.lane.b32.xlu1 %v6464_v33, %s6675_s6 }
 0x553   :  { %1217 = vrot.lane.b32.xlu0 %v6466_v34, %s6675_s6  ;;  %v6468_v37 = vpop.eup %6467 }
 0x554   :  { %v6470_v38 = vpop.eup %6469  ;;  %v1309_v39 = vadd.f32 1.0, %v6468_v37 }
 0x555   :  { %v1213_v40 = vadd.f32 1.0, %v6470_v38 }
 0x556   :  { %v1310_v42 = vmul.f32 0.5, %v1309_v39 }
 0x557   :  { %v1214_v44 = vmul.f32 0.5, %v1213_v40 }
 0x558   :  { %v1316_v56 = vmul.f32 %v1314_v41, %v1310_v42 }
 0x5c4   :  { %v1319_v43 = vpop.permute.xlu1 %1318 }
 0x5c5   :  { %v1321_v45 = vmul.f32 %v1319_v43, %v1310_v42  ;;  %v1218_v46 = vpop.permute.xlu0 %1217 }
 0x5c6   :  { %v1220_v47 = vmul.f32 %v1218_v46, %v1214_v44 }
 0x5c7   :  { %1323 = vrot.lane.b32.xlu1 %v1321_v45, %s6677_s4 }
 0x5c8   :  { %6471 = vtanh.f32 %v1220_v47 }
 0x5d2   :  { %v6472_v55 = vpop.eup %6471 }
 0x5d3   :  { %1223 = vrot.lane.b32.xlu0 %v6472_v55, %s6676_s7 }
 0x639   :  { %v1324_v58 = vpop.permute.xlu1 %1323 }
 0x63a   :  { %v1326_v60 = vadd.f32 %v1324_v58, %v1316_v56 }
 0x63c   :  { %6473 = vtanh.f32 %v1326_v60 }
 0x645   :  { %v1224_v62 = vpop.permute.xlu0 %1223 }
 0x646   :  { %v6474_v1 = vpop.eup %6473  ;;  %v1226_v3 = vmul.f32 %v1224_v62, %v1214_v44 }
 0x647   :  { %1329 = vrot.lane.b32.xlu1 %v6474_v1, %s6675_s6 }
 0x648   :  { %1232 = vrot.lane.b32.xlu0 %v1226_v3, %s6677_s4 }
 0x6b9   :  { %v1330_v4 = vpop.permute.xlu1 %1329 }
 0x6ba   :  { %v1332_v6 = vmul.f32 %v1330_v4, %v1310_v42  ;;  %v1233_v7 = vpop.permute.xlu0 %1232 }
 0x6bb   :  { %5784 = vmatmul.mubr.msk.f32.vlgmr.msra.gmra.mrb[10].mxu1 %vm77_vm1, %v1233_v7 }
 0x6bc   :  { %1334 = vrot.lane.b32.xlu1 %v1332_v6, %s6677_s4  ;;  %6138 = vmatpush3.bf16.msra.mxu1 %v7051_v52 }
 0x6bd   :  { %6139 = vmatprep.subr.bf16.mxu1 %v6678_v51  ;;  %5794 = vmatprep.mubr.msk.f32.mxu1 %vm6679_vm3, %v6674_v0 }
 0x6c0   :  { %6141 = vmatpush3.bf16.msra.mxu1 %v7057_v54 }
 0x6c1   :  { %6150 = vmatprep.subr.bf16.mxu1 %v6678_v51 }
 0x72e   :  { %v1335_v8 = vpop.permute.xlu1 %1334 }
 0x72f   :  { %5317 = vmatmul.mubr.msk.f32.vlgmr.msra.gmra.mrb[20].mxu0 %vm77_vm1, %v1335_v8 }
 0x730   :  { %6145 = vmatpush1.bf16.msra.mxu0 %v7007_v19  ;;  %1604 = vmatprep.mubr.f32.mxu0 %v6674_v0 }
 0x731   :  { %6147 = vmatprep.subr.bf16.mxu0 %v7009_v20 }
 0x734   :  { %6149 = vmatpush1.bf16.msra.mxu0 %v7020_v23 }
 0x735   :  { %6157 = vmatprep.subr.bf16.mxu0 %v6996_v15 }
 0x78e   :  { %v1302_v9 = vpop.f32.mrb[10].mxu1 }
 0x78f   :  { %v5785_v10 = vpop.f32.mrb[11].mxu1 }
 0x802   :  { %v1404_v11 = vpop.f32.mrb[20].mxu0 }
 0x803   :  { %v1512_v12 = vadd.f32 %v1404_v11, %v6976_v59  ;;  %v1406_v13 = vpop.f32.mrb[21].mxu0 }
 0x804   :  { %v1409_v14 = vadd.f32 %v7035_v28, %v1406_v13 }
 0x805   :  { %6475 = vtanh.f32 %v1512_v12  ;;  %v1513_v21 = vmul.f32 0.5, %v1512_v12 }
 0x806   :  { %v1410_v16 = vadd.f32 %v1409_v14, %v1302_v9 }
 0x808   :  { %6477 = vtanh.f32 %v1410_v16  ;;  %v1411_v22 = vmul.f32 0.5, %v1410_v16 }
 0x809   :  { %6479 = vtanh.f32 %v1513_v21 }
 0x80a   :  { %6481 = vtanh.f32 %v1411_v22 }
 0x80f   :  { %v6476_v17 = vpop.eup %6475 }
 0x810   :  { %1520 = vrot.lane.b32.xlu1 %v6476_v17, %s6675_s6 }
 0x812   :  { %v6478_v18 = vpop.eup %6477 }
 0x813   :  { %1422 = vrot.lane.b32.xlu0 %v6478_v18, %s6675_s6  ;;  %v6480_v24 = vpop.eup %6479 }
 0x814   :  { %v6482_v59 = vpop.eup %6481  ;;  %v1515_v25 = vadd.f32 1.0, %v6480_v24 }
 0x815   :  { %v1413_v26 = vadd.f32 1.0, %v6482_v59 }
 0x816   :  { %v1516_v27 = vmul.f32 0.5, %v1515_v25 }
 0x817   :  { %1417 = vrot.lane.b32.xlu0 %v1220_v47, %s6677_s4  ;;  %v1414_v31 = vmul.f32 0.5, %v1413_v26 }
 0x818   :  { %v1518_v34 = vmul.f32 %v1516_v27, %v1326_v60 }
 0x882   :  { %v1521_v29 = vpop.permute.xlu1 %1520 }
 0x883   :  { %v1523_v30 = vmul.f32 %v1521_v29, %v1516_v27 }
 0x885   :  { %1525 = vrot.lane.b32.xlu1 %v1523_v30, %s6677_s4  ;;  %v1423_v32 = vpop.permute.xlu0 %1422 }
 0x886   :  { %v1425_v33 = vmul.f32 %v1423_v32, %v1414_v31 }
 0x889   :  { %1427 = vrot.lane.b32.xlu1 %v1425_v33, %s6677_s4  ;;  %v1418_v35 = vpop.permute.xlu0 %1417 }
 0x88a   :  { %v1420_v38 = vmul.f32 %v1418_v35, %v1414_v31 }
 0x8f7   :  { %v1526_v36 = vpop.permute.xlu1 %1525 }
 0x8f8   :  { %v1528_v37 = vadd.f32 %v1526_v36, %v1518_v34 }
 0x8fa   :  { %6483 = vtanh.f32 %v1528_v37 }
 0x8fb   :  { %v1428_v39 = vpop.permute.xlu1 %1427 }
 0x8fc   :  { %v1430_v40 = vadd.f32 %v1428_v39, %v1420_v38 }
 0x8fe   :  { %6485 = vtanh.f32 %v1430_v40 }
 0x904   :  { %v6484_v41 = vpop.eup %6483 }
 0x905   :  { %1531 = vrot.lane.b32.xlu0 %v6484_v41, %s6675_s6 }
 0x908   :  { %v6486_v42 = vpop.eup %6485 }
 0x909   :  { %1433 = vrot.lane.b32.xlu1 %v6486_v42, %s6675_s6 }
 0x977   :  { %v1532_v43 = vpop.permute.xlu0 %1531 }
 0x978   :  { %v1534_v44 = vmul.f32 %v1532_v43, %v1516_v27 }
 0x97a   :  { %1536 = vrot.lane.b32.xlu0 %v1534_v44, %s6677_s4 }
 0x97b   :  { %v1434_v45 = vpop.permute.xlu1 %1433 }
 0x97c   :  { %v1436_v46 = vmul.f32 %v1434_v45, %v1414_v31 }
 0x97e   :  { %1438 = vrot.lane.b32.xlu1 %v1436_v46, %s6677_s4 }
 0x9ec   :  { %v1537_v47 = vpop.permute.xlu0 %1536 }
 0x9ed   :  { %5319 = vmatmul.mubr.msk.f32.vlgmr.msra.gmra.mrb[22].mxu0 %vm77_vm1, %v1537_v47 }
 0x9ee   :  { %6159 = vmatpush1.bf16.msra.mxu0 %v7007_v19  ;;  %1802 = vmatprep.mubr.f32.mxu0 %v6674_v0 }
 0x9ef   :  { %6161 = vmatprep.subr.bf16.mxu0 %v7009_v20 }
 0x9f0   :  { %v1439_v48 = vpop.permute.xlu1 %1438 }
 0x9f1   :  { %5795 = vmatmul.mubr.msk.f32.vlgmr.msra.gmra.mrb[12].mxu1 %vm77_vm1, %v1439_v48 }
 0x9f2   :  { %6152 = vmatpush3.bf16.msra.mxu1 %v7051_v52  ;;  %6163 = vmatpush1.bf16.msra.mxu0 %v7020_v23 }
 0x9f3   :  { %6153 = vmatprep.subr.bf16.mxu1 %v6678_v51  ;;  %5805 = vmatprep.mubr.msk.f32.mxu1 %vm6679_vm3, %v6674_v0 }
 0x9f4   :  { %6171 = vmatprep.subr.bf16.mxu0 %v6996_v15 }
 0x9f6   :  { %6155 = vmatpush3.bf16.msra.mxu1 %v7057_v54 }
 0x9f7   :  { %6164 = vmatprep.subr.bf16.mxu1 %v6678_v51 }
 0xac0   :  { %v1606_v49 = vpop.f32.mrb[22].mxu0 }
 0xac1   :  { %v1710_v50 = vadd.f32 %v1606_v49, %v6974_v57  ;;  %v1608_v53 = vpop.f32.mrb[23].mxu0 }
 0xac2   :  { %v1611_v55 = vadd.f32 %v7035_v28, %v1608_v53 }
 0xac3   :  { %6487 = vtanh.f32 %v1710_v50  ;;  %v1711_v3 = vmul.f32 0.5, %v1710_v50 }
 0xac4   :  { %v1508_v56 = vpop.f32.mrb[12].mxu1 }
 0xac5   :  { %v1612_v58 = vadd.f32 %v1611_v55, %v1508_v56  ;;  %v5796_v60 = vpop.f32.mrb[13].mxu1 }
 0xac7   :  { %6489 = vtanh.f32 %v1612_v58  ;;  %v1613_v4 = vmul.f32 0.5, %v1612_v58 }
 0xac8   :  { %6491 = vtanh.f32 %v1711_v3 }
 0xac9   :  { %6493 = vtanh.f32 %v1613_v4 }
 0xacd   :  { %v6488_v62 = vpop.eup %6487 }
 0xace   :  { %1718 = vrot.lane.b32.xlu0 %v6488_v62, %s6675_s6 }
 0xad1   :  { %v6490_v1 = vpop.eup %6489 }
 0xad2   :  { %1620 = vrot.lane.b32.xlu1 %v6490_v1, %s6675_s6  ;;  %v6492_v6 = vpop.eup %6491 }
 0xad3   :  { %v1713_v57 = vadd.f32 1.0, %v6492_v6  ;;  %v6494_v7 = vpop.eup %6493 }
 0xad4   :  { %v1615_v8 = vadd.f32 1.0, %v6494_v7 }
 0xad5   :  { %v1714_v9 = vmul.f32 0.5, %v1713_v57 }
 0xad6   :  { %v1616_v12 = vmul.f32 0.5, %v1615_v8 }
 0xad7   :  { %v1716_v16 = vmul.f32 %v1714_v9, %v1528_v37 }
 0xad8   :  { %v1618_v21 = vmul.f32 %v1616_v12, %v1430_v40 }
 0xb40   :  { %v1719_v10 = vpop.permute.xlu0 %1718 }
 0xb41   :  { %v1721_v11 = vmul.f32 %v1719_v10, %v1714_v9 }
 0xb43   :  { %1723 = vrot.lane.b32.xlu0 %v1721_v11, %s6677_s4 }
 0xb44   :  { %v1621_v13 = vpop.permute.xlu1 %1620 }
 0xb45   :  { %v1623_v14 = vmul.f32 %v1621_v13, %v1616_v12 }
 0xb47   :  { %1625 = vrot.lane.b32.xlu1 %v1623_v14, %s6677_s4 }
 0xbb5   :  { %v1724_v17 = vpop.permute.xlu0 %1723 }
 0xbb6   :  { %v1726_v18 = vadd.f32 %v1724_v17, %v1716_v16 }
 0xbb8   :  { %6495 = vtanh.f32 %v1726_v18 }
 0xbb9   :  { %v1626_v22 = vpop.permute.xlu1 %1625 }
 0xbba   :  { %v1628_v24 = vadd.f32 %v1626_v22, %v1618_v21 }
 0xbbc   :  { %6497 = vtanh.f32 %v1628_v24 }
 0xbc2   :  { %v6496_v59 = vpop.eup %6495 }
 0xbc3   :  { %1729 = vrot.lane.b32.xlu0 %v6496_v59, %s6675_s6 }
 0xbc6   :  { %v6498_v25 = vpop.eup %6497 }
 0xbc7   :  { %1631 = vrot.lane.b32.xlu1 %v6498_v25, %s6675_s6 }
 0xc35   :  { %v1730_v26 = vpop.permute.xlu0 %1729 }
 0xc36   :  { %v1732_v27 = vmul.f32 %v1730_v26, %v1714_v9 }
 0xc38   :  { %1734 = vrot.lane.b32.xlu0 %v1732_v27, %s6677_s4 }
 0xc39   :  { %v1632_v29 = vpop.permute.xlu1 %1631 }
 0xc3a   :  { %v1634_v30 = vmul.f32 %v1632_v29, %v1616_v12 }
 0xc3c   :  { %1636 = vrot.lane.b32.xlu1 %v1634_v30, %s6677_s4 }
 0xcaa   :  { %v1735_v31 = vpop.permute.xlu0 %1734 }
 0xcab   :  { %5321 = vmatmul.mubr.msk.f32.vlgmr.msra.gmra.mrb[24].mxu0 %vm77_vm1, %v1735_v31 }
 0xcac   :  { %6173 = vmatpush1.bf16.msra.mxu0 %v7007_v19  ;;  %2000 = vmatprep.mubr.f32.mxu0 %v6674_v0 }
 0xcad   :  { %6175 = vmatprep.subr.bf16.mxu0 %v7009_v20 }
 0xcae   :  { %v1637_v32 = vpop.permute.xlu1 %1636 }
 0xcaf   :  { %5806 = vmatmul.mubr.msk.f32.vlgmr.msra.gmra.mrb[14].mxu1 %vm77_vm1, %v1637_v32 }
 0xcb0   :  { %6166 = vmatpush3.bf16.msra.mxu1 %v7051_v52  ;;  %6177 = vmatpush1.bf16.msra.mxu0 %v7020_v23 }
 0xcb1   :  { %6167 = vmatprep.subr.bf16.mxu1 %v6678_v51  ;;  %5816 = vmatprep.mubr.msk.f32.mxu1 %vm6679_vm3, %v6674_v0 }
 0xcb2   :  { %6185 = vmatprep.subr.bf16.mxu0 %v6996_v15 }
 0xcb4   :  { %6169 = vmatpush3.bf16.msra.mxu1 %v7057_v54 }
 0xcb5   :  { %6178 = vmatprep.subr.bf16.mxu1 %v6678_v51 }
 0xd7e   :  { %v1804_v33 = vpop.f32.mrb[24].mxu0 }
 0xd7f   :  { %v1908_v34 = vadd.f32 %v1804_v33, %v6980_v63  ;;  %v1806_v35 = vpop.f32.mrb[25].mxu0 }
 0xd80   :  { %v1809_v36 = vadd.f32 %v7035_v28, %v1806_v35 }
 0xd81   :  { %6499 = vtanh.f32 %v1908_v34  ;;  %v1909_v42 = vmul.f32 0.5, %v1908_v34 }
 0xd82   :  { %v1706_v37 = vpop.f32.mrb[14].mxu1 }
 0xd83   :  { %v1810_v38 = vadd.f32 %v1809_v36, %v1706_v37  ;;  %v5807_v39 = vpop.f32.mrb[15].mxu1 }
 0xd85   :  { %6501 = vtanh.f32 %v1810_v38  ;;  %v1811_v43 = vmul.f32 0.5, %v1810_v38 }
 0xd86   :  { %6503 = vtanh.f32 %v1909_v42 }
 0xd87   :  { %6505 = vtanh.f32 %v1811_v43 }
 0xd8b   :  { %v6500_v40 = vpop.eup %6499 }
 0xd8c   :  { %1916 = vrot.lane.b32.xlu0 %v6500_v40, %s6675_s6 }
 0xd8f   :  { %v6502_v41 = vpop.eup %6501 }
 0xd90   :  { %1818 = vrot.lane.b32.xlu1 %v6502_v41, %s6675_s6  ;;  %v6504_v44 = vpop.eup %6503 }
 0xd91   :  { %v1911_v63 = vadd.f32 1.0, %v6504_v44  ;;  %v6506_v45 = vpop.eup %6505 }
 0xd92   :  { %v1813_v46 = vadd.f32 1.0, %v6506_v45 }
 0xd93   :  { %v1912_v47 = vmul.f32 0.5, %v1911_v63 }
 0xd94   :  { %v1814_v50 = vmul.f32 0.5, %v1813_v46 }
 0xd95   :  { %v1914_v56 = vmul.f32 %v1912_v47, %v1726_v18 }
 0xd96   :  { %v1816_v62 = vmul.f32 %v1814_v50, %v1628_v24 }
 0xdfe   :  { %v1917_v48 = vpop.permute.xlu0 %1916 }
 0xdff   :  { %v1919_v49 = vmul.f32 %v1917_v48, %v1912_v47 }
 0xe01   :  { %1921 = vrot.lane.b32.xlu0 %v1919_v49, %s6677_s4 }
 0xe02   :  { %v1819_v53 = vpop.permute.xlu1 %1818 }
 0xe03   :  { %v1821_v55 = vmul.f32 %v1819_v53, %v1814_v50 }
 0xe05   :  { %1823 = vrot.lane.b32.xlu1 %v1821_v55, %s6677_s4 }
 0xe73   :  { %v1922_v58 = vpop.permute.xlu0 %1921 }
 0xe74   :  { %v1924_v60 = vadd.f32 %v1922_v58, %v1914_v56 }
 0xe76   :  { %6507 = vtanh.f32 %v1924_v60 }
 0xe77   :  { %v1824_v1 = vpop.permute.xlu1 %1823 }
 0xe78   :  { %v1826_v3 = vadd.f32 %v1824_v1, %v1816_v62 }
 0xe7a   :  { %6509 = vtanh.f32 %v1826_v3 }
 0xe80   :  { %v6508_v4 = vpop.eup %6507 }
 0xe81   :  { %1927 = vrot.lane.b32.xlu0 %v6508_v4, %s6675_s6 }
 0xe84   :  { %v6510_v6 = vpop.eup %6509 }
 0xe85   :  { %1829 = vrot.lane.b32.xlu1 %v6510_v6, %s6675_s6 }
 0xef3   :  { %v1928_v57 = vpop.permute.xlu0 %1927 }
 0xef4   :  { %v1930_v7 = vmul.f32 %v1928_v57, %v1912_v47 }
 0xef6   :  { %1932 = vrot.lane.b32.xlu0 %v1930_v7, %s6677_s4 }
 0xef7   :  { %v1830_v8 = vpop.permute.xlu1 %1829 }
 0xef8   :  { %v1832_v9 = vmul.f32 %v1830_v8, %v1814_v50 }
 0xefa   :  { %1834 = vrot.lane.b32.xlu1 %v1832_v9, %s6677_s4 }
 0xf68   :  { %v1933_v10 = vpop.permute.xlu0 %1932 }
 0xf69   :  { %5323 = vmatmul.mubr.msk.f32.vlgmr.msra.gmra.mrb[26].mxu0 %vm77_vm1, %v1933_v10 }
 0xf6a   :  { %6187 = vmatpush1.bf16.msra.mxu0 %v7007_v19  ;;  %2198 = vmatprep.mubr.f32.mxu0 %v6674_v0 }
 0xf6b   :  { %6189 = vmatprep.subr.bf16.mxu0 %v7009_v20 }
 0xf6c   :  { %v1835_v11 = vpop.permute.xlu1 %1834 }
 0xf6d   :  { %5817 = vmatmul.mubr.msk.f32.vlgmr.msra.gmra.mrb[16].mxu1 %vm77_vm1, %v1835_v11 }
 0xf6e   :  { %6180 = vmatpush3.bf16.msra.mxu1 %v7051_v52  ;;  %6191 = vmatpush1.bf16.msra.mxu0 %v7020_v23 }
 0xf6f   :  { %6181 = vmatprep.subr.bf16.mxu1 %v6678_v51  ;;  %5827 = vmatprep.mubr.msk.f32.mxu1 %vm6679_vm3, %v6674_v0 }
 0xf70   :  { %6199 = vmatprep.subr.bf16.mxu0 %v6996_v15 }
 0xf72   :  { %6183 = vmatpush3.bf16.msra.mxu1 %v7057_v54 }
 0xf73   :  { %6192 = vmatprep.subr.bf16.mxu1 %v6678_v51 }
0x103c   :  { %v2002_v12 = vpop.f32.mrb[26].mxu0 }
0x103d   :  { %v2106_v13 = vadd.f32 %v2002_v12, %v6978_v61  ;;  %v2004_v14 = vpop.f32.mrb[27].mxu0 }
0x103e   :  { %v2007_v16 = vadd.f32 %v7035_v28, %v2004_v14 }
0x103f   :  { %6511 = vtanh.f32 %v2106_v13  ;;  %v2107_v59 = vmul.f32 0.5, %v2106_v13 }
0x1040   :  { %v1904_v17 = vpop.f32.mrb[16].mxu1 }
0x1041   :  { %v2008_v18 = vadd.f32 %v2007_v16, %v1904_v17  ;;  %v5818_v21 = vpop.f32.mrb[17].mxu1 }
0x1043   :  { %6513 = vtanh.f32 %v2008_v18  ;;  %v2009_v25 = vmul.f32 0.5, %v2008_v18 }
0x1044   :  { %6515 = vtanh.f32 %v2107_v59 }
0x1045   :  { %6517 = vtanh.f32 %v2009_v25 }
0x1049   :  { %v6512_v22 = vpop.eup %6511 }
0x104a   :  { %2114 = vrot.lane.b32.xlu0 %v6512_v22, %s6675_s6 }
0x104d   :  { %v6514_v24 = vpop.eup %6513 }
0x104e   :  { %2016 = vrot.lane.b32.xlu1 %v6514_v24, %s6675_s6  ;;  %v6516_v26 = vpop.eup %6515 }
0x104f   :  { %v2109_v61 = vadd.f32 1.0, %v6516_v26  ;;  %v6518_v27 = vpop.eup %6517 }
0x1050   :  { %v2011_v30 = vadd.f32 1.0, %v6518_v27 }
0x1051   :  { %v2110_v29 = vmul.f32 0.5, %v2109_v61 }
0x1052   :  { %v2012_v33 = vmul.f32 0.5, %v2011_v30 }
0x1053   :  { %v2112_v36 = vmul.f32 %v2110_v29, %v1924_v60 }
0x1054   :  { %v2014_v39 = vmul.f32 %v2012_v33, %v1826_v3 }
0x10bc   :  { %v2115_v31 = vpop.permute.xlu0 %2114 }
0x10bd   :  { %v2117_v32 = vmul.f32 %v2115_v31, %v2110_v29 }
0x10bf   :  { %2119 = vrot.lane.b32.xlu0 %v2117_v32, %s6677_s4 }
0x10c0   :  { %v2017_v34 = vpop.permute.xlu1 %2016 }
0x10c1   :  { %v2019_v35 = vmul.f32 %v2017_v34, %v2012_v33 }
0x10c3   :  { %2021 = vrot.lane.b32.xlu1 %v2019_v35, %s6677_s4 }
0x1131   :  { %v2120_v37 = vpop.permute.xlu0 %2119 }
0x1132   :  { %v2122_v38 = vadd.f32 %v2120_v37, %v2112_v36 }
0x1134   :  { %6519 = vtanh.f32 %v2122_v38 }
0x1135   :  { %v2022_v40 = vpop.permute.xlu1 %2021 }
0x1136   :  { %v2024_v41 = vadd.f32 %v2022_v40, %v2014_v39 }
0x1138   :  { %6521 = vtanh.f32 %v2024_v41 }
0x113e   :  { %v6520_v42 = vpop.eup %6519 }
0x113f   :  { %2125 = vrot.lane.b32.xlu0 %v6520_v42, %s6675_s6 }
0x1142   :  { %v6522_v43 = vpop.eup %6521 }
0x1143   :  { %2027 = vrot.lane.b32.xlu1 %v6522_v43, %s6675_s6 }
0x11b1   :  { %v2126_v44 = vpop.permute.xlu0 %2125 }
0x11b2   :  { %v2128_v63 = vmul.f32 %v2126_v44, %v2110_v29 }
0x11b4   :  { %2130 = vrot.lane.b32.xlu0 %v2128_v63, %s6677_s4 }
0x11b5   :  { %v2028_v45 = vpop.permute.xlu1 %2027 }
0x11b6   :  { %v2030_v46 = vmul.f32 %v2028_v45, %v2012_v33 }
0x11b8   :  { %2032 = vrot.lane.b32.xlu1 %v2030_v46, %s6677_s4 }
0x1226   :  { %v2131_v47 = vpop.permute.xlu0 %2130 }
0x1227   :  { %5325 = vmatmul.mubr.msk.f32.vlgmr.msra.gmra.mrb[28].mxu0 %vm77_vm1, %v2131_v47 }
0x1228   :  { %6201 = vmatpush1.bf16.msra.mxu0 %v7007_v19  ;;  %2396 = vmatprep.mubr.f32.mxu0 %v6674_v0 }
0x1229   :  { %6203 = vmatprep.subr.bf16.mxu0 %v7009_v20 }
0x122a   :  { %v2033_v48 = vpop.permute.xlu1 %2032 }
0x122b   :  { %5828 = vmatmul.mubr.msk.f32.vlgmr.msra.gmra.mrb[18].mxu1 %vm77_vm1, %v2033_v48 }
0x122c   :  { %6194 = vmatpush3.bf16.msra.mxu1 %v7051_v52  ;;  %6205 = vmatpush1.bf16.msra.mxu0 %v7020_v23 }
0x122d   :  { %6195 = vmatprep.subr.bf16.mxu1 %v6678_v51  ;;  %5838 = vmatprep.mubr.msk.f32.mxu1 %vm6679_vm3, %v6674_v0 }
0x122e   :  { %6218 = vmatprep.subr.bf16.mxu0 %v6678_v51 }
0x1230   :  { %6197 = vmatpush3.bf16.msra.mxu1 %v7057_v54 }
0x1231   :  { %6206 = vmatprep.subr.bf16.mxu1 %v6678_v51 }
0x12fa   :  { %v2200_v19 = vpop.f32.mrb[28].mxu0 }
0x12fb   :  { %v2304_v49 = vadd.f32 %v2200_v19, %v6984_v5  ;;  %v2202_v50 = vpop.f32.mrb[29].mxu0 }
0x12fc   :  { %v2205_v53 = vadd.f32 %v7035_v28, %v2202_v50 }
0x12fd   :  { %6523 = vtanh.f32 %v2304_v49  ;;  %v2305_v62 = vmul.f32 0.5, %v2304_v49 }
0x12fe   :  { %v2102_v55 = vpop.f32.mrb[18].mxu1 }
0x12ff   :  { %v2206_v23 = vadd.f32 %v2205_v53, %v2102_v55  ;;  %v5829_v56 = vpop.f32.mrb[19].mxu1 }
0x1301   :  { %6525 = vtanh.f32 %v2206_v23  ;;  %v2207_v1 = vmul.f32 0.5, %v2206_v23 }
0x1302   :  { %6527 = vtanh.f32 %v2305_v62 }
0x1303   :  { %6529 = vtanh.f32 %v2207_v1 }
0x1307   :  { %v6524_v58 = vpop.eup %6523 }
0x1308   :  { %2312 = vrot.lane.b32.xlu0 %v6524_v58, %s6675_s6 }
0x130b   :  { %v6526_v60 = vpop.eup %6525 }
0x130c   :  { %2214 = vrot.lane.b32.xlu1 %v6526_v60, %s6675_s6  ;;  %v6528_v3 = vpop.eup %6527 }
0x130d   :  { %v2307_v5 = vadd.f32 1.0, %v6528_v3  ;;  %v6530_v4 = vpop.eup %6529 }
0x130e   :  { %v2209_v57 = vadd.f32 1.0, %v6530_v4 }
0x130f   :  { %v2308_v6 = vmul.f32 0.5, %v2307_v5 }
0x1310   :  { %v2210_v9 = vmul.f32 0.5, %v2209_v57 }
0x1311   :  { %v2310_v12 = vmul.f32 %v2308_v6, %v2122_v38 }
0x1312   :  { %v2212_v16 = vmul.f32 %v2210_v9, %v2024_v41 }
0x137a   :  { %v2313_v7 = vpop.permute.xlu0 %2312 }
0x137b   :  { %v2315_v8 = vmul.f32 %v2313_v7, %v2308_v6 }
0x137d   :  { %2317 = vrot.lane.b32.xlu0 %v2315_v8, %s6677_s4 }
0x137e   :  { %v2215_v10 = vpop.permute.xlu1 %2214 }
0x137f   :  { %v2217_v11 = vmul.f32 %v2215_v10, %v2210_v9 }
0x1381   :  { %2219 = vrot.lane.b32.xlu1 %v2217_v11, %s6677_s4 }
0x13ef   :  { %v2318_v13 = vpop.permute.xlu0 %2317 }
0x13f0   :  { %v2320_v14 = vadd.f32 %v2318_v13, %v2310_v12  ;;  %v2624_v13 = vld [vmem:[%s7702_s10 + $0x8] sm:$0xff] }
0x13f2   :  { %6531 = vtanh.f32 %v2320_v14 }
0x13f3   :  { %v2220_v17 = vpop.permute.xlu1 %2219 }
0x13f4   :  { %v2222_v18 = vadd.f32 %v2220_v17, %v2212_v16  ;;  %v2626_v17 = vld [vmem:[%s7702_s10 + $0x18] sm:$0xff] }
0x13f6   :  { %6533 = vtanh.f32 %v2222_v18 }
0x13fc   :  { %v6532_v21 = vpop.eup %6531 }
0x13fd   :  { %2323 = vrot.lane.b32.xlu0 %v6532_v21, %s6675_s6 }
0x1400   :  { %v6534_v22 = vpop.eup %6533 }
0x1401   :  { %2225 = vrot.lane.b32.xlu1 %v6534_v22, %s6675_s6 }
0x146f   :  { %v2324_v24 = vpop.permute.xlu0 %2323 }
0x1470   :  { %v2326_v59 = vmul.f32 %v2324_v24, %v2308_v6 }
0x1472   :  { %2328 = vrot.lane.b32.xlu0 %v2326_v59, %s6677_s4 }
0x1473   :  { %v2226_v25 = vpop.permute.xlu1 %2225 }
0x1474   :  { %v2228_v26 = vmul.f32 %v2226_v25, %v2210_v9  ;;  %v5330_v25 = vld [vmem:[%s7703_s11] ss:$0 sm:$0xff] }
0x1476   :  { %2230 = vrot.lane.b32.xlu1 %v2228_v26, %s6677_s4 }
0x14e4   :  { %v2329_v61 = vpop.permute.xlu0 %2328 }
0x14e5   :  { %5327 = vmatmul.mubr.msk.f32.vlgmr.msra.gmra.mrb[30].mxu0 %vm77_vm1, %v2329_v61 }
0x14e6   :  { %5871 = vmatprep.mubr.msk.f32.mxu0 %vm6679_vm3, %v6674_v0 }
0x14e8   :  { %v2231_v27 = vpop.permute.xlu1 %2230 }
0x14e9   :  { %5839 = vmatmul.mubr.msk.f32.vlgmr.msra.gmra.mrb[20].mxu1 %vm77_vm1, %v2231_v27 }
0x14ea   :  { %6208 = vmatpush3.bf16.msra.mxu1 %v7051_v52  ;;  %5849 = vmatprep.mubr.msk.f32.mxu1 %vm6679_vm3, %v6674_v0 }
0x14eb   :  { %6209 = vmatprep.subr.bf16.mxu1 %v6678_v51 }
0x14ee   :  { %6211 = vmatpush3.bf16.msra.mxu1 %v7057_v54 }
0x14ef   :  { %6212 = vmatprep.subr.bf16.mxu1 %v6678_v51 }
0x15b8   :  { %v2398_v29 = vpop.f32.mrb[30].mxu0 }
0x15b9   :  { %v2502_v30 = vadd.f32 %v2398_v29, %v6982_v2  ;;  %v2400_v31 = vpop.f32.mrb[31].mxu0 }
0x15ba   :  { %v2403_v32 = vadd.f32 %v7035_v28, %v2400_v31 }
0x15bb   :  { %6535 = vtanh.f32 %v2502_v30  ;;  %v2503_v54 = vmul.f32 0.5, %v2502_v30 }
0x15bc   :  { %v2300_v33 = vpop.f32.mrb[20].mxu1 }
0x15bd   :  { %v2404_v34 = vadd.f32 %v2403_v32, %v2300_v33  ;;  %v5840_v35 = vpop.f32.mrb[21].mxu1 }
0x15bf   :  { %6537 = vtanh.f32 %v2404_v34  ;;  %v2405_v37 = vmul.f32 0.5, %v2404_v34 }
0x15c0   :  { %6539 = vtanh.f32 %v2503_v54  ;;  %v2725_v54 = vld [vmem:[%s7704_s12] sm:$0xff] }
0x15c1   :  { %6541 = vtanh.f32 %v2405_v37 }
0x15c5   :  { %v6536_v52 = vpop.eup %6535 }
0x15c6   :  { %2510 = vrot.lane.b32.xlu1 %v6536_v52, %s6675_s6  ;;  %v2726_v52 = vld [vmem:[%s7704_s12 + $0x8] sm:$0xff] }
0x15c9   :  { %v6538_v36 = vpop.eup %6537 }
0x15ca   :  { %2412 = vrot.lane.b32.xlu0 %v6538_v36, %s6675_s6  ;;  %v6540_v38 = vpop.eup %6539  ;;  %v2728_v36 = vld [vmem:[%s7704_s12 + $0x18] sm:$0xff] }
0x15cb   :  { %v2505_v2 = vadd.f32 1.0, %v6540_v38  ;;  %v6542_v39 = vpop.eup %6541  ;;  %v7251_v37 = vpack.c.bf16 %v2728_v36, %v2726_v52  ;;  %v2727_v38 = vld [vmem:[%s7704_s12 + $0x10] sm:$0xff] }
0x15cc   :  { %v2407_v41 = vadd.f32 1.0, %v6542_v39  ;;  %v2732_v39 = vld [vmem:[%s7704_s12 + $0x38] sm:$0xff] }
0x15cd   :  { %v2506_v40 = vmul.f32 0.5, %v2505_v2  ;;  %v2730_v2 = vld [vmem:[%s7704_s12 + $0x28] sm:$0xff] }
0x15ce   :  { %v2408_v44 = vmul.f32 0.5, %v2407_v41  ;;  %v7264_v41 = vpack.c.bf16 %v2732_v39, %v2730_v2 }
0x15cf   :  { %v2508_v46 = vmul.f32 %v2506_v40, %v2320_v14  ;;  %v2625_v14 = vld [vmem:[%s7702_s10 + $0x10] sm:$0xff] }
0x15d0   :  { %v2410_v19 = vmul.f32 %v2408_v44, %v2222_v18  ;;  %v6222_v18 = vpack.c.bf16 %v2626_v17, %v2625_v14 }
0x1638   :  { %v2511_v42 = vpop.permute.xlu1 %2510 }
0x1639   :  { %v2513_v43 = vmul.f32 %v2511_v42, %v2506_v40  ;;  %v2729_v42 = vld [vmem:[%s7704_s12 + $0x20] sm:$0xff] }
0x163b   :  { %2515 = vrot.lane.b32.xlu1 %v2513_v43, %s6677_s4  ;;  %v2731_v43 = vld [vmem:[%s7704_s12 + $0x30] sm:$0xff] }
0x163c   :  { %v2413_v63 = vpop.permute.xlu0 %2412 }
0x163d   :  { %v2415_v45 = vmul.f32 %v2413_v63, %v2408_v44 }
0x163f   :  { %2417 = vrot.lane.b32.xlu0 %v2415_v45, %s6677_s4 }
0x16ad   :  { %v2516_v47 = vpop.permute.xlu1 %2515 }
0x16ae   :  { %v2518_v48 = vadd.f32 %v2516_v47, %v2508_v46 }
0x16b0   :  { %6543 = vtanh.f32 %v2518_v48  ;;  %v7291_v48 = vld [vmem:[%s7706_s14] ss:$0 sm:$0xff] }
0x16b1   :  { %v2418_v49 = vpop.permute.xlu0 %2417 }
0x16b2   :  { %v2420_v50 = vadd.f32 %v2418_v49, %v2410_v19 }
0x16b4   :  { %6545 = vtanh.f32 %v2420_v50 }
0x16ba   :  { %v6544_v53 = vpop.eup %6543 }
0x16bb   :  { %2521 = vrot.lane.b32.xlu1 %v6544_v53, %s6675_s6 }
0x16be   :  { %v6546_v55 = vpop.eup %6545 }
0x16bf   :  { %2423 = vrot.lane.b32.xlu0 %v6546_v55, %s6675_s6 }
0x172d   :  { %v2522_v23 = vpop.permute.xlu1 %2521 }
0x172e   :  { %v2524_v56 = vmul.f32 %v2522_v23, %v2506_v40  ;;  %v7262_v40 = vpack.c.bf16 %v2727_v38, %v2725_v54 }
0x1730   :  { %2526 = vrot.lane.b32.xlu1 %v2524_v56, %s6677_s4 }
0x1731   :  { %v2424_v58 = vpop.permute.xlu0 %2423 }
0x1732   :  { %v2426_v60 = vmul.f32 %v2424_v58, %v2408_v44  ;;  %v7274_v44 = vpack.c.bf16 %v2731_v43, %v2729_v42 }
0x1734   :  { %2428 = vrot.lane.b32.xlu0 %v2426_v60, %s6677_s4 }
0x17a2   :  { %v2527_v1 = vpop.permute.xlu1 %2526 }
0x17a6   :  { %v2429_v62 = vpop.permute.xlu0 %2428 }
0x17a7   :  { %5850 = vmatmul.mubr.msk.f32.vlgmr.msra.gmra.mrb[22].mxu1 %vm77_vm1, %v2429_v62 }
0x17a8   :  { %6214 = vmatpush3.bf16.msra.mxu1 %v6996_v15  ;;  %5860 = vmatprep.mubr.msk.f32.mxu1 %vm6679_vm3, %v6674_v0 }
0x17a9   :  { %6215 = vmatprep.subr.bf16.mxu1 %v6678_v51 }
0x17ac   :  { %6217 = vmatpush3.bf16.msra.mxu1 %v7009_v20 }
0x17ad   :  { %6232 = vmatprep.subr.bf16.mxu1 %v6678_v51 }
0x17af   :  { %5861 = vmatmul.mubr.msk.f32.vlgmr.msra.gmra.mrb[22].mxu1 %vm77_vm1, %v2527_v1 }
0x17b0   :  { %5882 = vmatprep.mubr.msk.f32.mxu1 %vm6679_vm3, %v6674_v0 }
0x1882   :  { %v2596_v3 = vpop.f32.mrb[22].mxu1 }
0x1883   :  { %v2597_v5 = vadd.f32 %v7035_v28, %v2596_v3  ;;  %v5862_v4 = vpop.f32.mrb[23].mxu1  ;;  %v2623_v28 = vld [vmem:[%s7702_s10] sm:$0xff] }
0x1884   :  { %v6219_v16 = vpack.c.bf16 %v2624_v13, %v2623_v28 }
0x1885   :  { %6547 = vtanh.f32 %v2597_v5  ;;  %v2601_v6 = vmul.f32 0.5, %v2597_v5 }
0x1886   :  { %6220 = vmatpush3.bf16.msra.mxu0 %v6219_v16 }
0x1887   :  { %6549 = vtanh.f32 %v2601_v6  ;;  %6221 = vmatprep.subr.bf16.mxu0 %v6678_v51 }
0x188a   :  { %6223 = vmatpush3.bf16.msra.mxu0 %v6222_v18 }
0x188b   :  { %6225 = vmatprep.subr.bf16.mxu0 %v7251_v37 }
0x188f   :  { %v6548_v15 = vpop.eup %6547 }
0x1890   :  { %2608 = vrot.lane.b32.xlu0 %v6548_v15, %s6675_s6 }
0x1891   :  { %v6550_v57 = vpop.eup %6549 }
0x1892   :  { %v2603_v20 = vadd.f32 1.0, %v6550_v57 }
0x1894   :  { %v2604_v7 = vmul.f32 0.5, %v2603_v20 }
0x1896   :  { %v2606_v10 = vmul.f32 %v2604_v7, %v2420_v50 }
0x1902   :  { %v2609_v8 = vpop.permute.xlu0 %2608 }
0x1903   :  { %v2611_v9 = vmul.f32 %v2609_v8, %v2604_v7  ;;  %v2833_v8 = vld [vmem:[%s7705_s13] sm:$0xff] }
0x1905   :  { %2613 = vrot.lane.b32.xlu1 %v2611_v9, %s6677_s4  ;;  %v2834_v9 = vld [vmem:[%s7705_s13 + $0x8] sm:$0xff] }
0x1977   :  { %v2614_v11 = vpop.permute.xlu1 %2613 }
0x1978   :  { %v2616_v12 = vadd.f32 %v2614_v11, %v2606_v10  ;;  %v2835_v10 = vld [vmem:[%s7705_s13 + $0x10] sm:$0xff]  ;;  %v7307_v11 = vpack.c.bf16 %v2834_v9, %v2833_v8 }
0x197a   :  { %6551 = vtanh.f32 %v2616_v12  ;;  %v2836_v12 = vld [vmem:[%s7705_s13 + $0x18] sm:$0xff]  ;;  %6234 = vmatpush3.bf16.msra.mxu1 %v7307_v11 }
0x197b   :  { %v7313_v28 = vpack.c.bf16 %v2836_v12, %v2835_v10  ;;  %6235 = vmatprep.subr.bf16.mxu1 %v6678_v51 }
0x197e   :  { %6237 = vmatpush3.bf16.msra.mxu1 %v7313_v28 }
0x197f   :  { %6246 = vmatprep.subr.bf16.mxu1 %v6678_v51 }
0x1984   :  { %v6552_v21 = vpop.eup %6551 }
0x1985   :  { %2619 = vrot.lane.b32.xlu0 %v6552_v21, %s6675_s6 }
0x19f7   :  { %v2620_v22 = vpop.permute.xlu0 %2619 }
0x19f8   :  { %v2622_v24 = vmul.f32 %v2620_v22, %v2604_v7 }
0x19fa   :  { %2635 = vrot.lane.b32.xlu1 %v2622_v24, %s6677_s4 }
0x1a6c   :  { %v2636_v59 = vpop.permute.xlu1 %2635 }
0x1a6d   :  { %5872 = vmatmul.mubr.msk.f32.vlgmr.msra.gmra.mrb[32].mxu0 %vm77_vm1, %v2636_v59 }
0x1a6e   :  { %2802 = vmatprep.mubr.f32.mxu0 %v6674_v0  ;;  %6227 = vmatpush1.bf16.msra.mxu0 %v7262_v40 }
0x1a6f   :  { %6229 = vmatprep.subr.bf16.mxu0 %v7264_v41 }
0x1a72   :  { %6231 = vmatpush1.bf16.msra.mxu0 %v7274_v44 }
0x1a73   :  { %6239 = vmatprep.subr.bf16.mxu0 %v7251_v37 }
0x1b40   :  { %v2705_v26 = vpop.f32.mrb[32].mxu0 }
0x1b41   :  { %v7237_v61 = vadd.f32 %v5330_v25, %v2705_v26  ;;  %v5873_v27 = vpop.f32.mrb[33].mxu0 }
0x1b43   :  { %6553 = vtanh.f32 %v7237_v61  ;;  %v2709_v30 = vmul.f32 0.5, %v7237_v61 }
0x1b45   :  { %6555 = vtanh.f32 %v2709_v30 }
0x1b4d   :  { %v6554_v29 = vpop.eup %6553 }
0x1b4e   :  { %2715 = vrot.lane.b32.xlu0 %v6554_v29, %s6675_s6 }
0x1b4f   :  { %v6556_v31 = vpop.eup %6555 }
0x1b50   :  { %v2711_v32 = vadd.f32 1.0, %v6556_v31 }
0x1b52   :  { %v2712_v33 = vmul.f32 0.5, %v2711_v32 }
0x1bc0   :  { %v2716_v34 = vpop.permute.xlu0 %2715 }
0x1bc1   :  { %v2718_v35 = vmul.f32 %v2716_v34, %v2712_v33 }
0x1bc3   :  { %6557 = vtanh.f32 %v2718_v35 }
0x1bcd   :  { %v6558_v63 = vpop.eup %6557 }
0x1bce   :  { %2721 = vrot.lane.b32.xlu1 %v6558_v63, %s6676_s7 }
0x1c40   :  { %v2722_v45 = vpop.permute.xlu1 %2721 }
0x1c41   :  { %v2724_v46 = vmul.f32 %v2722_v45, %v2712_v33 }
0x1c43   :  { %2734 = vrot.lane.b32.xlu0 %v2724_v46, %s6677_s4 }
0x1c47   :  { %2921 = vrot.lane.b32.xlu0 %v2718_v35, %s6677_s4 }
0x1cb5   :  { %v2735_v47 = vpop.permute.xlu0 %2734 }
0x1cb6   :  { %5332 = vmatmul.mubr.msk.f32.vlgmr.msra.gmra.mrb[34].mxu0 %vm77_vm1, %v2735_v47 }
0x1cb7   :  { %6241 = vmatpush1.bf16.msra.mxu0 %v7262_v40  ;;  %3018 = vmatprep.mubr.f32.mxu0 %v6674_v0 }
0x1cb8   :  { %6243 = vmatprep.subr.bf16.mxu0 %v7264_v41 }
0x1cb9   :  { %v2922_v5 = vpop.permute.xlu0 %2921 }
0x1cbb   :  { %6245 = vmatpush1.bf16.msra.mxu0 %v7274_v44 }
0x1cbc   :  { %6253 = vmatprep.subr.bf16.mxu0 %v7251_v37 }
0x1d89   :  { %v2804_v19 = vpop.f32.mrb[34].mxu0 }
0x1d8a   :  { %v2914_v49 = vadd.f32 %v2804_v19, %v7237_v61  ;;  %v2806_v50 = vpop.f32.mrb[35].mxu0 }
0x1d8b   :  { %v2816_v53 = vadd.f32 %v7291_v48, %v2806_v50 }
0x1d8c   :  { %6559 = vtanh.f32 %v2914_v49  ;;  %v2915_v56 = vmul.f32 0.5, %v2914_v49 }
0x1d8d   :  { %6561 = vtanh.f32 %v2816_v53  ;;  %v2817_v58 = vmul.f32 0.5, %v2816_v53 }
0x1d8e   :  { %6563 = vtanh.f32 %v2915_v56 }
0x1d8f   :  { %6565 = vtanh.f32 %v2817_v58 }
0x1d96   :  { %v6560_v55 = vpop.eup %6559 }
0x1d97   :  { %v6562_v23 = vpop.eup %6561  ;;  %2926 = vrot.lane.b32.xlu1 %v6560_v55, %s6675_s6 }
0x1d98   :  { %2823 = vrot.lane.b32.xlu0 %v6562_v23, %s6675_s6  ;;  %v6564_v60 = vpop.eup %6563 }
0x1d99   :  { %v6566_v62 = vpop.eup %6565  ;;  %v2917_v1 = vadd.f32 1.0, %v6564_v60 }
0x1d9a   :  { %v2819_v3 = vadd.f32 1.0, %v6566_v62 }
0x1d9b   :  { %v2918_v4 = vmul.f32 0.5, %v2917_v1 }
0x1d9c   :  { %v2820_v6 = vmul.f32 0.5, %v2819_v3 }
0x1d9d   :  { %v2924_v14 = vmul.f32 %v2922_v5, %v2918_v4 }
0x1e09   :  { %v2927_v15 = vpop.permute.xlu1 %2926 }
0x1e0a   :  { %v2929_v57 = vmul.f32 %v2927_v15, %v2918_v4  ;;  %v2824_v20 = vpop.permute.xlu0 %2823 }
0x1e0b   :  { %v2826_v7 = vmul.f32 %v2824_v20, %v2820_v6 }
0x1e0c   :  { %2931 = vrot.lane.b32.xlu1 %v2929_v57, %s6677_s4 }
0x1e0d   :  { %6567 = vtanh.f32 %v2826_v7 }
0x1e17   :  { %v6568_v13 = vpop.eup %6567 }
0x1e18   :  { %2829 = vrot.lane.b32.xlu0 %v6568_v13, %s6676_s7 }
0x1e7e   :  { %v2932_v16 = vpop.permute.xlu1 %2931 }
0x1e7f   :  { %v2934_v17 = vadd.f32 %v2932_v16, %v2924_v14 }
0x1e81   :  { %6569 = vtanh.f32 %v2934_v17 }
0x1e8a   :  { %v2830_v18 = vpop.permute.xlu0 %2829 }
0x1e8b   :  { %v6570_v21 = vpop.eup %6569  ;;  %v2832_v22 = vmul.f32 %v2830_v18, %v2820_v6 }
0x1e8c   :  { %2937 = vrot.lane.b32.xlu1 %v6570_v21, %s6675_s6 }
0x1e8d   :  { %2838 = vrot.lane.b32.xlu0 %v2832_v22, %s6677_s4 }
0x1efe   :  { %v2938_v24 = vpop.permute.xlu1 %2937 }
0x1eff   :  { %v2940_v59 = vmul.f32 %v2938_v24, %v2918_v4  ;;  %v2839_v25 = vpop.permute.xlu0 %2838 }
0x1f00   :  { %2913 = vst.msk [vmem:[#allocation4 + $0x8] sm:$0xff] %vm77_vm1, %v2839_v25  ;;  %5883 = vmatmul.mubr.msk.f32.vlgmr.msra.gmra.mrb[24].mxu1 %vm77_vm1, %v2839_v25 }
0x1f01   :  { %2950 = vrot.lane.b32.xlu1 %v2940_v59, %s6677_s4  ;;  %6248 = vmatpush3.bf16.msra.mxu1 %v7307_v11 }
0x1f02   :  { %6249 = vmatprep.subr.bf16.mxu1 %v6678_v51  ;;  %5893 = vmatprep.mubr.msk.f32.mxu1 %vm6679_vm3, %v6674_v0 }
0x1f05   :  { %6251 = vmatpush3.bf16.msra.mxu1 %v7313_v28 }
0x1f06   :  { %6260 = vmatprep.subr.bf16.mxu1 %v6678_v51 }
0x1f73   :  { %v2951_v26 = vpop.permute.xlu1 %2950 }
0x1f74   :  { %5335 = vmatmul.mubr.msk.f32.vlgmr.msra.gmra.mrb[36].mxu0 %vm77_vm1, %v2951_v26 }
0x1f75   :  { %6255 = vmatpush1.bf16.msra.mxu0 %v7262_v40  ;;  %3241 = vmatprep.mubr.f32.mxu0 %v6674_v0 }
0x1f76   :  { %6257 = vmatprep.subr.bf16.mxu0 %v7264_v41 }
0x1f79   :  { %6259 = vmatpush1.bf16.msra.mxu0 %v7274_v44 }
0x1f7a   :  { %6267 = vmatprep.subr.bf16.mxu0 %v7251_v37 }
0x1fd3   :  { %v2908_v27 = vpop.f32.mrb[24].mxu1 }
0x1fd4   :  { %v5884_v29 = vpop.f32.mrb[25].mxu1 }
0x2047   :  { %v3020_v30 = vpop.f32.mrb[36].mxu0 }
0x2048   :  { %v3141_v31 = vadd.f32 %v3020_v30, %v7237_v61  ;;  %v3022_v32 = vpop.f32.mrb[37].mxu0 }
0x2049   :  { %v3032_v33 = vadd.f32 %v7291_v48, %v3022_v32 }
0x204a   :  { %6571 = vtanh.f32 %v3141_v31  ;;  %v3142_v36 = vmul.f32 0.5, %v3141_v31 }
0x204b   :  { %v3033_v34 = vadd.f32 %v3032_v33, %v2908_v27 }
0x204d   :  { %6573 = vtanh.f32 %v3033_v34  ;;  %v3034_v54 = vmul.f32 0.5, %v3033_v34 }
0x204e   :  { %6575 = vtanh.f32 %v3142_v36 }
0x204f   :  { %6577 = vtanh.f32 %v3034_v54 }
0x2054   :  { %v6572_v35 = vpop.eup %6571 }
0x2055   :  { %3149 = vrot.lane.b32.xlu1 %v6572_v35, %s6675_s6 }
0x2057   :  { %v6574_v52 = vpop.eup %6573 }
0x2058   :  { %3045 = vrot.lane.b32.xlu0 %v6574_v52, %s6675_s6  ;;  %v6576_v38 = vpop.eup %6575 }
0x2059   :  { %v6578_v2 = vpop.eup %6577  ;;  %v3144_v39 = vadd.f32 1.0, %v6576_v38 }
0x205a   :  { %v3036_v42 = vadd.f32 1.0, %v6578_v2 }
0x205b   :  { %v3145_v43 = vmul.f32 0.5, %v3144_v39 }
0x205c   :  { %3040 = vrot.lane.b32.xlu0 %v2826_v7, %s6677_s4  ;;  %v3037_v46 = vmul.f32 0.5, %v3036_v42 }
0x205d   :  { %v3147_v49 = vmul.f32 %v3145_v43, %v2934_v17 }
0x20c7   :  { %v3150_v63 = vpop.permute.xlu1 %3149 }
0x20c8   :  { %v3152_v45 = vmul.f32 %v3150_v63, %v3145_v43 }
0x20ca   :  { %3154 = vrot.lane.b32.xlu1 %v3152_v45, %s6677_s4  ;;  %v3046_v47 = vpop.permute.xlu0 %3045 }
0x20cb   :  { %v3048_v19 = vmul.f32 %v3046_v47, %v3037_v46 }
0x20ce   :  { %3050 = vrot.lane.b32.xlu1 %v3048_v19, %s6677_s4  ;;  %v3041_v50 = vpop.permute.xlu0 %3040 }
0x20cf   :  { %v3043_v23 = vmul.f32 %v3041_v50, %v3037_v46 }
0x213c   :  { %v3155_v53 = vpop.permute.xlu1 %3154 }
0x213d   :  { %v3157_v55 = vadd.f32 %v3155_v53, %v3147_v49 }
0x213f   :  { %6579 = vtanh.f32 %v3157_v55 }
0x2140   :  { %v3051_v56 = vpop.permute.xlu1 %3050 }
0x2141   :  { %v3053_v58 = vadd.f32 %v3051_v56, %v3043_v23 }
0x2143   :  { %6581 = vtanh.f32 %v3053_v58 }
0x2149   :  { %v6580_v60 = vpop.eup %6579 }
0x214a   :  { %3160 = vrot.lane.b32.xlu0 %v6580_v60, %s6675_s6 }
0x214d   :  { %v6582_v62 = vpop.eup %6581 }
0x214e   :  { %3056 = vrot.lane.b32.xlu1 %v6582_v62, %s6675_s6 }
0x21bc   :  { %v3161_v1 = vpop.permute.xlu0 %3160 }
0x21bd   :  { %v3163_v3 = vmul.f32 %v3161_v1, %v3145_v43 }
0x21bf   :  { %3173 = vrot.lane.b32.xlu0 %v3163_v3, %s6677_s4 }
0x21c0   :  { %v3057_v5 = vpop.permute.xlu1 %3056 }
0x21c1   :  { %v3059_v4 = vmul.f32 %v3057_v5, %v3037_v46 }
0x21c3   :  { %3065 = vrot.lane.b32.xlu1 %v3059_v4, %s6677_s4 }
0x2231   :  { %v3174_v15 = vpop.permute.xlu0 %3173 }
0x2232   :  { %5338 = vmatmul.mubr.msk.f32.vlgmr.msra.gmra.mrb[38].mxu0 %vm77_vm1, %v3174_v15 }
0x2233   :  { %6269 = vmatpush1.bf16.msra.mxu0 %v7262_v40  ;;  %3460 = vmatprep.mubr.f32.mxu0 %v6674_v0 }
0x2234   :  { %6271 = vmatprep.subr.bf16.mxu0 %v7264_v41 }
0x2235   :  { %v3066_v6 = vpop.permute.xlu1 %3065 }
0x2236   :  { %3140 = vst.msk [vmem:[#allocation4 + $0x10] sm:$0xff] %vm77_vm1, %v3066_v6  ;;  %5894 = vmatmul.mubr.msk.f32.vlgmr.msra.gmra.mrb[26].mxu1 %vm77_vm1, %v3066_v6 }
0x2237   :  { %6262 = vmatpush3.bf16.msra.mxu1 %v7307_v11  ;;  %6273 = vmatpush1.bf16.msra.mxu0 %v7274_v44 }
0x2238   :  { %6263 = vmatprep.subr.bf16.mxu1 %v6678_v51  ;;  %5904 = vmatprep.mubr.msk.f32.mxu1 %vm6679_vm3, %v6674_v0 }
0x2239   :  { %6281 = vmatprep.subr.bf16.mxu0 %v7251_v37 }
0x223b   :  { %6265 = vmatpush3.bf16.msra.mxu1 %v7313_v28 }
0x223c   :  { %6274 = vmatprep.subr.bf16.mxu1 %v6678_v51 }
0x2305   :  { %v3243_v57 = vpop.f32.mrb[38].mxu0 }
0x2306   :  { %v3360_v20 = vadd.f32 %v3243_v57, %v7237_v61  ;;  %v3245_v7 = vpop.f32.mrb[39].mxu0 }
0x2307   :  { %v3255_v8 = vadd.f32 %v7291_v48, %v3245_v7 }
0x2308   :  { %6583 = vtanh.f32 %v3360_v20  ;;  %v3361_v16 = vmul.f32 0.5, %v3360_v20 }
0x2309   :  { %v3135_v9 = vpop.f32.mrb[26].mxu1 }
0x230a   :  { %v3256_v10 = vadd.f32 %v3255_v8, %v3135_v9  ;;  %v5895_v12 = vpop.f32.mrb[27].mxu1 }
0x230c   :  { %6585 = vtanh.f32 %v3256_v10  ;;  %v3257_v17 = vmul.f32 0.5, %v3256_v10 }
0x230d   :  { %6587 = vtanh.f32 %v3361_v16 }
0x230e   :  { %6589 = vtanh.f32 %v3257_v17 }
0x2312   :  { %v6584_v13 = vpop.eup %6583 }
0x2313   :  { %3368 = vrot.lane.b32.xlu0 %v6584_v13, %s6675_s6 }
0x2316   :  { %v6586_v14 = vpop.eup %6585 }
0x2317   :  { %3264 = vrot.lane.b32.xlu1 %v6586_v14, %s6675_s6  ;;  %v6588_v18 = vpop.eup %6587 }
0x2318   :  { %v3363_v21 = vadd.f32 1.0, %v6588_v18  ;;  %v6590_v22 = vpop.eup %6589 }
0x2319   :  { %v3259_v59 = vadd.f32 1.0, %v6590_v22 }
0x231a   :  { %v3364_v24 = vmul.f32 0.5, %v3363_v21 }
0x231b   :  { %v3260_v27 = vmul.f32 0.5, %v3259_v59 }
0x231c   :  { %v3366_v31 = vmul.f32 %v3364_v24, %v3157_v55 }
0x231d   :  { %v3262_v34 = vmul.f32 %v3260_v27, %v3053_v58 }
0x2385   :  { %v3369_v25 = vpop.permute.xlu0 %3368 }
0x2386   :  { %v3371_v26 = vmul.f32 %v3369_v25, %v3364_v24 }
0x2388   :  { %3373 = vrot.lane.b32.xlu0 %v3371_v26, %s6677_s4 }
0x2389   :  { %v3265_v29 = vpop.permute.xlu1 %3264 }
0x238a   :  { %v3267_v30 = vmul.f32 %v3265_v29, %v3260_v27 }
0x238c   :  { %3269 = vrot.lane.b32.xlu1 %v3267_v30, %s6677_s4 }
0x23fa   :  { %v3374_v32 = vpop.permute.xlu0 %3373 }
0x23fb   :  { %v3376_v33 = vadd.f32 %v3374_v32, %v3366_v31 }
0x23fd   :  { %6591 = vtanh.f32 %v3376_v33 }
0x23fe   :  { %v3270_v35 = vpop.permute.xlu1 %3269 }
0x23ff   :  { %v3272_v52 = vadd.f32 %v3270_v35, %v3262_v34 }
0x2401   :  { %6593 = vtanh.f32 %v3272_v52 }
0x2407   :  { %v6592_v36 = vpop.eup %6591 }
0x2408   :  { %3379 = vrot.lane.b32.xlu0 %v6592_v36, %s6675_s6 }
0x240b   :  { %v6594_v54 = vpop.eup %6593 }
0x240c   :  { %3275 = vrot.lane.b32.xlu1 %v6594_v54, %s6675_s6 }
0x247a   :  { %v3380_v38 = vpop.permute.xlu0 %3379 }
0x247b   :  { %v3382_v2 = vmul.f32 %v3380_v38, %v3364_v24 }
0x247d   :  { %3392 = vrot.lane.b32.xlu0 %v3382_v2, %s6677_s4 }
0x247e   :  { %v3276_v39 = vpop.permute.xlu1 %3275 }
0x247f   :  { %v3278_v42 = vmul.f32 %v3276_v39, %v3260_v27 }
0x2481   :  { %3284 = vrot.lane.b32.xlu1 %v3278_v42, %s6677_s4 }
0x24ef   :  { %v3393_v43 = vpop.permute.xlu0 %3392 }
0x24f0   :  { %5341 = vmatmul.mubr.msk.f32.vlgmr.msra.gmra.mrb[40].mxu0 %vm77_vm1, %v3393_v43 }
0x24f1   :  { %6283 = vmatpush1.bf16.msra.mxu0 %v7262_v40  ;;  %3679 = vmatprep.mubr.f32.mxu0 %v6674_v0 }
0x24f2   :  { %6285 = vmatprep.subr.bf16.mxu0 %v7264_v41 }
0x24f3   :  { %v3285_v63 = vpop.permute.xlu1 %3284 }
0x24f4   :  { %3359 = vst.msk [vmem:[#allocation4 + $0x18] sm:$0xff] %vm77_vm1, %v3285_v63  ;;  %5905 = vmatmul.mubr.msk.f32.vlgmr.msra.gmra.mrb[28].mxu1 %vm77_vm1, %v3285_v63 }
0x24f5   :  { %6276 = vmatpush3.bf16.msra.mxu1 %v7307_v11  ;;  %6287 = vmatpush1.bf16.msra.mxu0 %v7274_v44 }
0x24f6   :  { %6277 = vmatprep.subr.bf16.mxu1 %v6678_v51  ;;  %5915 = vmatprep.mubr.msk.f32.mxu1 %vm6679_vm3, %v6674_v0 }
0x24f7   :  { %6295 = vmatprep.subr.bf16.mxu0 %v7251_v37 }
0x24f9   :  { %6279 = vmatpush3.bf16.msra.mxu1 %v7313_v28 }
0x24fa   :  { %6288 = vmatprep.subr.bf16.mxu1 %v6678_v51 }
0x25c3   :  { %v3462_v45 = vpop.f32.mrb[40].mxu0 }
0x25c4   :  { %v3579_v46 = vadd.f32 %v3462_v45, %v7237_v61  ;;  %v3464_v47 = vpop.f32.mrb[41].mxu0 }
0x25c5   :  { %v3474_v19 = vadd.f32 %v7291_v48, %v3464_v47 }
0x25c6   :  { %6595 = vtanh.f32 %v3579_v46  ;;  %v3580_v56 = vmul.f32 0.5, %v3579_v46 }
0x25c7   :  { %v3354_v49 = vpop.f32.mrb[28].mxu1 }
0x25c8   :  { %v3475_v50 = vadd.f32 %v3474_v19, %v3354_v49  ;;  %v5906_v53 = vpop.f32.mrb[29].mxu1 }
0x25ca   :  { %6597 = vtanh.f32 %v3475_v50  ;;  %v3476_v58 = vmul.f32 0.5, %v3475_v50 }
0x25cb   :  { %6599 = vtanh.f32 %v3580_v56 }
0x25cc   :  { %6601 = vtanh.f32 %v3476_v58 }
0x25d0   :  { %v6596_v55 = vpop.eup %6595 }
0x25d1   :  { %3587 = vrot.lane.b32.xlu0 %v6596_v55, %s6675_s6 }
0x25d4   :  { %v6598_v23 = vpop.eup %6597 }
0x25d5   :  { %3483 = vrot.lane.b32.xlu1 %v6598_v23, %s6675_s6  ;;  %v6600_v60 = vpop.eup %6599 }
0x25d6   :  { %v3582_v62 = vadd.f32 1.0, %v6600_v60  ;;  %v6602_v1 = vpop.eup %6601 }
0x25d7   :  { %v3478_v5 = vadd.f32 1.0, %v6602_v1 }
0x25d8   :  { %v3583_v3 = vmul.f32 0.5, %v3582_v62 }
0x25d9   :  { %v3479_v6 = vmul.f32 0.5, %v3478_v5 }
0x25da   :  { %v3585_v7 = vmul.f32 %v3583_v3, %v3376_v33 }
0x25db   :  { %v3481_v10 = vmul.f32 %v3479_v6, %v3272_v52 }
0x2643   :  { %v3588_v4 = vpop.permute.xlu0 %3587 }
0x2644   :  { %v3590_v15 = vmul.f32 %v3588_v4, %v3583_v3 }
0x2646   :  { %3592 = vrot.lane.b32.xlu0 %v3590_v15, %s6677_s4 }
0x2647   :  { %v3484_v57 = vpop.permute.xlu1 %3483 }
0x2648   :  { %v3486_v20 = vmul.f32 %v3484_v57, %v3479_v6 }
0x264a   :  { %3488 = vrot.lane.b32.xlu1 %v3486_v20, %s6677_s4 }
0x26b8   :  { %v3593_v8 = vpop.permute.xlu0 %3592 }
0x26b9   :  { %v3595_v9 = vadd.f32 %v3593_v8, %v3585_v7 }
0x26bb   :  { %6603 = vtanh.f32 %v3595_v9 }
0x26bc   :  { %v3489_v12 = vpop.permute.xlu1 %3488 }
0x26bd   :  { %v3491_v13 = vadd.f32 %v3489_v12, %v3481_v10 }
0x26bf   :  { %6605 = vtanh.f32 %v3491_v13 }
0x26c5   :  { %v6604_v14 = vpop.eup %6603 }
0x26c6   :  { %3598 = vrot.lane.b32.xlu0 %v6604_v14, %s6675_s6 }
0x26c9   :  { %v6606_v16 = vpop.eup %6605 }
0x26ca   :  { %3494 = vrot.lane.b32.xlu1 %v6606_v16, %s6675_s6 }
0x2738   :  { %v3599_v17 = vpop.permute.xlu0 %3598 }
0x2739   :  { %v3601_v18 = vmul.f32 %v3599_v17, %v3583_v3 }
0x273b   :  { %3611 = vrot.lane.b32.xlu0 %v3601_v18, %s6677_s4 }
0x273c   :  { %v3495_v21 = vpop.permute.xlu1 %3494 }
0x273d   :  { %v3497_v22 = vmul.f32 %v3495_v21, %v3479_v6 }
0x273f   :  { %3503 = vrot.lane.b32.xlu1 %v3497_v22, %s6677_s4 }
0x27ad   :  { %v3612_v24 = vpop.permute.xlu0 %3611 }
0x27ae   :  { %5344 = vmatmul.mubr.msk.f32.vlgmr.msra.gmra.mrb[42].mxu0 %vm77_vm1, %v3612_v24 }
0x27af   :  { %6297 = vmatpush1.bf16.msra.mxu0 %v7262_v40  ;;  %3898 = vmatprep.mubr.f32.mxu0 %v6674_v0 }
0x27b0   :  { %6299 = vmatprep.subr.bf16.mxu0 %v7264_v41 }
0x27b1   :  { %v3504_v59 = vpop.permute.xlu1 %3503 }
0x27b2   :  { %3578 = vst.msk [vmem:[#allocation4 + $0x20] sm:$0xff] %vm77_vm1, %v3504_v59  ;;  %5916 = vmatmul.mubr.msk.f32.vlgmr.msra.gmra.mrb[30].mxu1 %vm77_vm1, %v3504_v59 }
0x27b3   :  { %6290 = vmatpush3.bf16.msra.mxu1 %v7307_v11  ;;  %6301 = vmatpush1.bf16.msra.mxu0 %v7274_v44 }
0x27b4   :  { %6291 = vmatprep.subr.bf16.mxu1 %v6678_v51  ;;  %5926 = vmatprep.mubr.msk.f32.mxu1 %vm6679_vm3, %v6674_v0 }
0x27b5   :  { %6309 = vmatprep.subr.bf16.mxu0 %v7251_v37 }
0x27b7   :  { %6293 = vmatpush3.bf16.msra.mxu1 %v7313_v28 }
0x27b8   :  { %6302 = vmatprep.subr.bf16.mxu1 %v6678_v51 }
0x2881   :  { %v3681_v25 = vpop.f32.mrb[42].mxu0 }
0x2882   :  { %v3798_v26 = vadd.f32 %v3681_v25, %v7237_v61  ;;  %v3683_v27 = vpop.f32.mrb[43].mxu0 }
0x2883   :  { %v3693_v29 = vadd.f32 %v7291_v48, %v3683_v27 }
0x2884   :  { %6607 = vtanh.f32 %v3798_v26  ;;  %v3799_v37 = vmul.f32 0.5, %v3798_v26 }
0x2885   :  { %v3573_v30 = vpop.f32.mrb[30].mxu1 }
0x2886   :  { %v3694_v31 = vadd.f32 %v3693_v29, %v3573_v30  ;;  %v5917_v32 = vpop.f32.mrb[31].mxu1  ;;  %v5355_v30 = vld [vmem:[%s7707_s15 + $0x20] sm:$0xff] }
0x2888   :  { %6609 = vtanh.f32 %v3694_v31  ;;  %v3695_v35 = vmul.f32 0.5, %v3694_v31  ;;  %v5356_v31 = vld [vmem:[%s7707_s15 + $0x28] sm:$0xff] }
0x2889   :  { %6611 = vtanh.f32 %v3799_v37  ;;  %v6328_v32 = vpack.c.bf16 %v5356_v31, %v5355_v30  ;;  %v5353_v30 = vld [vmem:[%s7706_s14] ss:$0 sm:$0xff] }
0x288a   :  { %6613 = vtanh.f32 %v3695_v35 }
0x288e   :  { %v6608_v33 = vpop.eup %6607 }
0x288f   :  { %3806 = vrot.lane.b32.xlu0 %v6608_v33, %s6675_s6 }
0x2892   :  { %v6610_v34 = vpop.eup %6609 }
0x2893   :  { %3702 = vrot.lane.b32.xlu1 %v6610_v34, %s6675_s6  ;;  %v6612_v52 = vpop.eup %6611 }
0x2894   :  { %v3801_v36 = vadd.f32 1.0, %v6612_v52  ;;  %v6614_v54 = vpop.eup %6613 }
0x2895   :  { %v3697_v2 = vadd.f32 1.0, %v6614_v54  ;;  %v5357_v54 = vld [vmem:[%s7707_s15 + $0x30] sm:$0xff] }
0x2896   :  { %v3802_v38 = vmul.f32 0.5, %v3801_v36 }
0x2897   :  { %v3698_v43 = vmul.f32 0.5, %v3697_v2 }
0x2898   :  { %v3804_v46 = vmul.f32 %v3802_v38, %v3595_v9 }
0x2899   :  { %v3700_v49 = vmul.f32 %v3698_v43, %v3491_v13 }
0x2901   :  { %v3807_v39 = vpop.permute.xlu0 %3806 }
0x2902   :  { %v3809_v42 = vmul.f32 %v3807_v39, %v3802_v38 }
0x2904   :  { %3811 = vrot.lane.b32.xlu0 %v3809_v42, %s6677_s4  ;;  %v7461_v42 = vld [vmem:[#allocation4 + $0x8] sm:$0xff] }
0x2905   :  { %v3703_v63 = vpop.permute.xlu1 %3702 }
0x2906   :  { %v3705_v45 = vmul.f32 %v3703_v63, %v3698_v43  ;;  %v7471_v63 = vld [vmem:[#allocation4 + $0x10] sm:$0xff] }
0x2908   :  { %3707 = vrot.lane.b32.xlu1 %v3705_v45, %s6677_s4  ;;  %v7475_v45 = vld [vmem:[#allocation4 + $0x18] sm:$0xff] }
0x2976   :  { %v3812_v47 = vpop.permute.xlu0 %3811 }
0x2977   :  { %v3814_v19 = vadd.f32 %v3812_v47, %v3804_v46 }
0x2979   :  { %6615 = vtanh.f32 %v3814_v19 }
0x297a   :  { %v3708_v50 = vpop.permute.xlu1 %3707 }
0x297b   :  { %v3710_v53 = vadd.f32 %v3708_v50, %v3700_v49 }
0x297d   :  { %6617 = vtanh.f32 %v3710_v53 }
0x2983   :  { %v6616_v55 = vpop.eup %6615 }
0x2984   :  { %3817 = vrot.lane.b32.xlu0 %v6616_v55, %s6675_s6 }
0x2987   :  { %v6618_v23 = vpop.eup %6617 }
0x2988   :  { %3713 = vrot.lane.b32.xlu1 %v6618_v23, %s6675_s6 }
0x29f6   :  { %v3818_v56 = vpop.permute.xlu0 %3817 }
0x29f7   :  { %v3820_v58 = vmul.f32 %v3818_v56, %v3802_v38  ;;  %v5358_v38 = vld [vmem:[%s7707_s15 + $0x38] sm:$0xff] }
0x29f8   :  { %v6332_v2 = vpack.c.bf16 %v5358_v38, %v5357_v54 }
0x29f9   :  { %3830 = vrot.lane.b32.xlu0 %v3820_v58, %s6677_s4 }
0x29fa   :  { %v3714_v60 = vpop.permute.xlu1 %3713 }
0x29fb   :  { %v3716_v62 = vmul.f32 %v3714_v60, %v3698_v43 }
0x29fd   :  { %3722 = vrot.lane.b32.xlu1 %v3716_v62, %s6677_s4 }
0x2a6b   :  { %v3831_v1 = vpop.permute.xlu0 %3830 }
0x2a6c   :  { %5347 = vmatmul.mubr.msk.f32.vlgmr.msra.gmra.mrb[44].mxu0 %vm77_vm1, %v3831_v1 }
0x2a6d   :  { %6311 = vmatpush1.bf16.msra.mxu0 %v7262_v40  ;;  %4117 = vmatprep.mubr.f32.mxu0 %v6674_v0 }
0x2a6e   :  { %6313 = vmatprep.subr.bf16.mxu0 %v7264_v41 }
0x2a6f   :  { %v3723_v3 = vpop.permute.xlu1 %3722 }
0x2a70   :  { %3797 = vst.msk [vmem:[#allocation4 + $0x28] sm:$0xff] %vm77_vm1, %v3723_v3  ;;  %5927 = vmatmul.mubr.msk.f32.vlgmr.msra.gmra.mrb[32].mxu1 %vm77_vm1, %v3723_v3 }
0x2a71   :  { %6315 = vmatpush1.bf16.msra.mxu0 %v7274_v44  ;;  %6304 = vmatpush3.bf16.msra.mxu1 %v7307_v11 }
0x2a72   :  { %6305 = vmatprep.subr.bf16.mxu1 %v6678_v51  ;;  %5937 = vmatprep.mubr.msk.f32.mxu1 %vm6679_vm3, %v6674_v0 }
0x2a73   :  { %6329 = vmatprep.subr.bf16.mxu0 %v6328_v32 }
0x2a75   :  { %6307 = vmatpush3.bf16.msra.mxu1 %v7313_v28 }
0x2a76   :  { %6316 = vmatprep.subr.bf16.mxu1 %v6678_v51 }
0x2a77   :  { %v7485_v46 = vld [vmem:[#allocation4 + $0x28] sm:$0xff] }
0x2b3f   :  { %v3900_v40 = vpop.f32.mrb[44].mxu0 }
0x2b40   :  { %v4017_v41 = vadd.f32 %v3900_v40, %v7237_v61  ;;  %v3902_v5 = vpop.f32.mrb[45].mxu0 }
0x2b41   :  { %v3912_v4 = vadd.f32 %v7291_v48, %v3902_v5 }
0x2b42   :  { %6619 = vtanh.f32 %v4017_v41  ;;  %v4018_v7 = vmul.f32 0.5, %v4017_v41 }
0x2b43   :  { %v3792_v15 = vpop.f32.mrb[32].mxu1 }
0x2b44   :  { %v3913_v44 = vadd.f32 %v3912_v4, %v3792_v15  ;;  %v5928_v6 = vpop.f32.mrb[33].mxu1 }
0x2b46   :  { %6621 = vtanh.f32 %v3913_v44  ;;  %v3914_v8 = vmul.f32 0.5, %v3913_v44 }
0x2b47   :  { %6623 = vtanh.f32 %v4018_v7 }
0x2b48   :  { %6625 = vtanh.f32 %v3914_v8 }
0x2b4c   :  { %v6620_v57 = vpop.eup %6619 }
0x2b4d   :  { %4025 = vrot.lane.b32.xlu0 %v6620_v57, %s6675_s6 }
0x2b50   :  { %v6622_v20 = vpop.eup %6621 }
0x2b51   :  { %3921 = vrot.lane.b32.xlu1 %v6622_v20, %s6675_s6  ;;  %v6624_v9 = vpop.eup %6623 }
0x2b52   :  { %v4020_v10 = vadd.f32 1.0, %v6624_v9  ;;  %v6626_v12 = vpop.eup %6625 }
0x2b53   :  { %v3916_v14 = vadd.f32 1.0, %v6626_v12 }
0x2b54   :  { %v4021_v13 = vmul.f32 0.5, %v4020_v10 }
0x2b55   :  { %v3917_v18 = vmul.f32 0.5, %v3916_v14 }
0x2b56   :  { %v4023_v24 = vmul.f32 %v4021_v13, %v3814_v19 }
0x2b57   :  { %v3919_v26 = vmul.f32 %v3917_v18, %v3710_v53 }
0x2bbf   :  { %v4026_v16 = vpop.permute.xlu0 %4025 }
0x2bc0   :  { %v4028_v17 = vmul.f32 %v4026_v16, %v4021_v13 }
0x2bc2   :  { %4030 = vrot.lane.b32.xlu0 %v4028_v17, %s6677_s4 }
0x2bc3   :  { %v3922_v21 = vpop.permute.xlu1 %3921 }
0x2bc4   :  { %v3924_v22 = vmul.f32 %v3922_v21, %v3917_v18  ;;  %v4260_v21 = vld [vmem:[%s7704_s12 + $0x18] sm:$0xff] }
0x2bc6   :  { %3926 = vrot.lane.b32.xlu1 %v3924_v22, %s6677_s4 }
0x2c34   :  { %v4031_v59 = vpop.permute.xlu0 %4030 }
0x2c35   :  { %v7438_v25 = vadd.f32 %v4031_v59, %v4023_v24  ;;  %v4261_v24 = vld [vmem:[%s7704_s12 + $0x28] sm:$0xff]  ;;  %v4262_v59 = vld [vmem:[%s7704_s12 + $0x38] sm:$0xff] }
0x2c37   :  { %6627 = vtanh.f32 %v7438_v25 }
0x2c38   :  { %v3927_v27 = vpop.permute.xlu1 %3926 }
0x2c39   :  { %v7441_v29 = vadd.f32 %v3927_v27, %v3919_v26  ;;  %v6326_v26 = vpack.c.bf16 %v4262_v59, %v4261_v24  ;;  %v4819_v59 = vld [vmem:[%s7709_s17 + $0x10] sm:$0xff] }
0x2c3b   :  { %6629 = vtanh.f32 %v7441_v29 }
0x2c41   :  { %v6628_v33 = vpop.eup %6627 }
0x2c42   :  { %4036 = vrot.lane.b32.xlu0 %v6628_v33, %s6675_s6 }
0x2c45   :  { %v6630_v34 = vpop.eup %6629 }
0x2c46   :  { %3932 = vrot.lane.b32.xlu1 %v6630_v34, %s6675_s6 }
0x2cb4   :  { %v4037_v37 = vpop.permute.xlu0 %4036 }
0x2cb5   :  { %v4039_v35 = vmul.f32 %v4037_v37, %v4021_v13 }
0x2cb7   :  { %4049 = vrot.lane.b32.xlu0 %v4039_v35, %s6677_s4 }
0x2cb8   :  { %v3933_v52 = vpop.permute.xlu1 %3932 }
0x2cb9   :  { %v3935_v36 = vmul.f32 %v3933_v52, %v3917_v18  ;;  %v4259_v18 = vld [vmem:[%s7704_s12 + $0x8] sm:$0xff] }
0x2cba   :  { %v6323_v22 = vpack.c.bf16 %v4260_v21, %v4259_v18 }
0x2cbb   :  { %3941 = vrot.lane.b32.xlu1 %v3935_v36, %s6677_s4 }
0x2d29   :  { %v4050_v39 = vpop.permute.xlu0 %4049 }
0x2d2a   :  { %5350 = vmatmul.mubr.msk.f32.vlgmr.msra.gmra.mrb[46].mxu0 %vm77_vm1, %v4050_v39  ;;  %v4381_v39 = vld [vmem:[%s7707_s15] sm:$0xff] }
0x2d2b   :  { %6331 = vmatpush3.bf16.msra.mxu0 %v6328_v32  ;;  %5970 = vmatprep.mubr.msk.f32.mxu0 %vm77_vm1, %v7461_v42 }
0x2d2c   :  { %6333 = vmatprep.subr.bf16.mxu0 %v6332_v2 }
0x2d2d   :  { %v3942_v43 = vpop.permute.xlu1 %3941 }
0x2d2e   :  { %4016 = vst.msk [vmem:[#allocation4 + $0x30] sm:$0xff] %vm77_vm1, %v3942_v43  ;;  %5938 = vmatmul.mubr.msk.f32.vlgmr.msra.gmra.mrb[34].mxu1 %vm77_vm1, %v3942_v43  ;;  %v4382_v43 = vld [vmem:[%s7707_s15 + $0x8] sm:$0xff] }
0x2d2f   :  { %6335 = vmatpush3.bf16.msra.mxu0 %v6332_v2  ;;  %6318 = vmatpush3.bf16.msra.mxu1 %v7307_v11  ;;  %v7481_v11 = vld [vmem:[#allocation4 + $0x20] sm:$0xff] }
0x2d30   :  { %6319 = vmatprep.subr.bf16.mxu1 %v6678_v51  ;;  %5948 = vmatprep.mubr.msk.f32.mxu1 %vm6679_vm3, %v6674_v0 }
0x2d32   :  { %5971 = vmatmul.mubr.msk.f32.vlgmr.msra.gmra.mrb[48].mxu0 %vm77_vm1, %v7471_v63 }
0x2d33   :  { %5973 = vmatprep.mubr.msk.f32.mxu0 %vm77_vm1, %v7475_v45  ;;  %6321 = vmatpush3.bf16.msra.mxu1 %v7313_v28 }
0x2d34   :  { %6322 = vmatprep.subr.bf16.mxu1 %v6678_v51 }
0x2d35   :  { %v7489_v47 = vld [vmem:[#allocation4 + $0x30] sm:$0xff] }
0x2d36   :  { %5974 = vmatmul.mubr.msk.f32.gmra.mrb[50].mxu0 %vm77_vm1, %v7481_v11 }
0x2d37   :  { %5976 = vmatprep.mubr.msk.f32.mxu0 %vm77_vm1, %v7485_v46 }
0x2d3a   :  { %5977 = vmatmul.mubr.msk.f32.gmra.mrb[52].mxu0 %vm77_vm1, %v7489_v47 }
0x2dfd   :  { %v4119_v19 = vpop.f32.mrb[46].mxu0 }
0x2dfe   :  { %v4236_v28 = vadd.f32 %v4119_v19, %v7237_v61  ;;  %v4121_v49 = vpop.f32.mrb[47].mxu0  ;;  %v6336_v19 = vpack.c.bf16 %v4382_v43, %v4381_v39 }
0x2dff   :  { %v4131_v50 = vadd.f32 %v7291_v48, %v4121_v49  ;;  %v4383_v49 = vld [vmem:[%s7707_s15 + $0x10] sm:$0xff] }
0x2e00   :  { %6631 = vtanh.f32 %v4236_v28  ;;  %v4237_v60 = vmul.f32 0.5, %v4236_v28  ;;  %6337 = vmatprep.subr.bf16.mxu0 %v6336_v19 }
0x2e01   :  { %v4011_v53 = vpop.f32.mrb[34].mxu1  ;;  %6339 = vmatpush3.bf16.msra.mxu0 %v6336_v19  ;;  %v4809_v19 = vld [vmem:[#allocation3] sm:$0xff] }
0x2e02   :  { %v4132_v55 = vadd.f32 %v4131_v50, %v4011_v53  ;;  %v5939_v23 = vpop.f32.mrb[35].mxu1  ;;  %v4384_v50 = vld [vmem:[%s7707_s15 + $0x18] sm:$0xff] }
0x2e03   :  { %v6340_v53 = vpack.c.bf16 %v4384_v50, %v4383_v49  ;;  %v5376_v23 = vld [vmem:[%s7707_s15 + $0x48] sm:$0xff]  ;;  %v5410_v49 = vld [vmem:[%s7709_s17 + $0x50] sm:$0xff]  ;;  %v5411_v50 = vld [vmem:[%s7709_s17 + $0x58] sm:$0xff] }
0x2e04   :  { %6633 = vtanh.f32 %v4132_v55  ;;  %v4133_v62 = vmul.f32 0.5, %v4132_v55  ;;  %v5375_v55 = vld [vmem:[%s7707_s15 + $0x40] sm:$0xff] }
0x2e05   :  { %6635 = vtanh.f32 %v4237_v60  ;;  %6341 = vmatprep.subr.bf16.mxu0 %v6340_v53 }
0x2e06   :  { %6637 = vtanh.f32 %v4133_v62  ;;  %6343 = vmatpush3.bf16.msra.mxu0 %v6340_v53  ;;  %v6372_v53 = vpack.c.bf16 %v5411_v50, %v5410_v49 }
0x2e0a   :  { %v6632_v56 = vpop.eup %6631 }
0x2e0b   :  { %4244 = vrot.lane.b32.xlu1 %v6632_v56, %s6675_s6 }
0x2e0e   :  { %v6634_v58 = vpop.eup %6633 }
0x2e0f   :  { %4140 = vrot.lane.b32.xlu0 %v6634_v58, %s6675_s6  ;;  %v6636_v1 = vpop.eup %6635  ;;  %v6344_v58 = vpack.c.bf16 %v5376_v23, %v5375_v55  ;;  %v5071_v55 = vld [vmem:[#allocation3 + $0x48] sm:$0xff]  ;;  %v5420_v23 = vld [vmem:[%s7710_s18] ss:$0 sm:$0xff] }
0x2e10   :  { %v4239_v61 = vadd.f32 1.0, %v6636_v1  ;;  %v6638_v3 = vpop.eup %6637  ;;  %v4373_v1 = vld [vmem:[#allocation4] sm:$0xff] }
0x2e11   :  { %v4135_v48 = vadd.f32 1.0, %v6638_v3  ;;  %6345 = vmatprep.subr.bf16.mxu0 %v6344_v58  ;;  %v5377_v3 = vld [vmem:[%s7707_s15 + $0x50] sm:$0xff] }
0x2e12   :  { %v4240_v40 = vmul.f32 0.5, %v4239_v61 }
0x2e13   :  { %v4136_v4 = vmul.f32 0.5, %v4135_v48 }
0x2e14   :  { %v4242_v6 = vmul.f32 %v4240_v40, %v7438_v25 }
0x2e15   :  { %v4138_v7 = vmul.f32 %v4136_v4, %v7441_v29 }
0x2e7d   :  { %v4245_v41 = vpop.permute.xlu1 %4244 }
0x2e7e   :  { %v4247_v5 = vmul.f32 %v4245_v41, %v4240_v40 }
0x2e80   :  { %4249 = vrot.lane.b32.xlu1 %v4247_v5, %s6677_s4  ;;  %v4817_v5 = vld [vmem:[%s7709_s17] sm:$0xff] }
0x2e81   :  { %v4141_v15 = vpop.permute.xlu0 %4140 }
0x2e82   :  { %v4143_v44 = vmul.f32 %v4141_v15, %v4136_v4 }
0x2e84   :  { %4145 = vrot.lane.b32.xlu0 %v4143_v44, %s6677_s4  ;;  %v5387_v44 = vld [vmem:[#allocation5] ss:$0 sm:$0xff] }
0x2ef2   :  { %v4250_v57 = vpop.permute.xlu1 %4249 }
0x2ef3   :  { %v4252_v20 = vadd.f32 %v4250_v57, %v4242_v6 }
0x2ef5   :  { %6639 = vtanh.f32 %v4252_v20 }
0x2ef6   :  { %v4146_v8 = vpop.permute.xlu0 %4145 }
0x2ef7   :  { %v4148_v9 = vadd.f32 %v4146_v8, %v4138_v7 }
0x2ef9   :  { %6641 = vtanh.f32 %v4148_v9 }
0x2eff   :  { %v6640_v10 = vpop.eup %6639 }
0x2f00   :  { %4255 = vrot.lane.b32.xlu1 %v6640_v10, %s6675_s6 }
0x2f03   :  { %v6642_v12 = vpop.eup %6641 }
0x2f04   :  { %4151 = vrot.lane.b32.xlu0 %v6642_v12, %s6675_s6 }
0x2f72   :  { %v4256_v13 = vpop.permute.xlu1 %4255 }
0x2f73   :  { %v4258_v14 = vmul.f32 %v4256_v13, %v4240_v40  ;;  %v5378_v40 = vld [vmem:[%s7707_s15 + $0x58] sm:$0xff] }
0x2f74   :  { %v6348_v48 = vpack.c.bf16 %v5378_v40, %v5377_v3 }
0x2f75   :  { %4271 = vrot.lane.b32.xlu1 %v4258_v14, %s6677_s4 }
0x2f76   :  { %v4152_v16 = vpop.permute.xlu0 %4151 }
0x2f77   :  { %v4154_v17 = vmul.f32 %v4152_v16, %v4136_v4  ;;  %v4818_v4 = vld [vmem:[%s7709_s17 + $0x8] sm:$0xff] }
0x2f78   :  { %v6360_v15 = vpack.c.bf16 %v4818_v4, %v4817_v5 }
0x2f79   :  { %4160 = vrot.lane.b32.xlu0 %v4154_v17, %s6677_s4 }
0x2fe7   :  { %v4272_v27 = vpop.permute.xlu1 %4271 }
0x2feb   :  { %v4161_v25 = vpop.permute.xlu0 %4160 }
0x2fec   :  { %4235 = vst.msk [vmem:[#allocation4 + $0x38] sm:$0xff] %vm77_vm1, %v4161_v25  ;;  %5949 = vmatmul.mubr.msk.f32.vlgmr.msra.gmra.mrb[36].mxu1 %vm77_vm1, %v4161_v25  ;;  %v4820_v25 = vld [vmem:[%s7709_s17 + $0x18] sm:$0xff] }
0x2fed   :  { %6324 = vmatpush3.bf16.msra.mxu1 %v6323_v22  ;;  %5959 = vmatprep.mubr.msk.f32.mxu1 %vm6679_vm3, %v6674_v0 }
0x2fee   :  { %6325 = vmatprep.subr.bf16.mxu1 %v6678_v51 }
0x2ff1   :  { %6327 = vmatpush3.bf16.msra.mxu1 %v6326_v26 }
0x2ff3   :  { %v7522_v29 = vld [vmem:[#allocation4 + $0x38] sm:$0xff] }
0x2ff4   :  { %5960 = vmatmul.mubr.msk.f32.vlgmr.msra.gmra.mrb[36].mxu1 %vm77_vm1, %v4272_v27  ;;  %5979 = vmatprep.mubr.msk.f32.mxu0 %vm77_vm1, %v7522_v29 }
0x30c7   :  { %v4341_v31 = vpop.f32.mrb[36].mxu1 }
0x30c8   :  { %v4342_v32 = vadd.f32 %v5353_v30, %v4341_v31  ;;  %v5961_v33 = vpop.f32.mrb[37].mxu1 }
0x30c9   :  { %v6364_v33 = vpack.c.bf16 %v4820_v25, %v4819_v59 }
0x30ca   :  { %6643 = vtanh.f32 %v4342_v32  ;;  %v4346_v51 = vmul.f32 0.5, %v4342_v32 }
0x30cc   :  { %6645 = vtanh.f32 %v4346_v51 }
0x30d4   :  { %v6644_v0 = vpop.eup %6643 }
0x30d5   :  { %4353 = vrot.lane.b32.xlu0 %v6644_v0, %s6675_s6 }
0x30d6   :  { %v6646_v34 = vpop.eup %6645 }
0x30d7   :  { %v4348_v37 = vadd.f32 1.0, %v6646_v34  ;;  %v5408_v34 = vld [vmem:[%s7709_s17 + $0x40] sm:$0xff] }
0x30d9   :  { %v4349_v35 = vmul.f32 0.5, %v4348_v37  ;;  %v5409_v37 = vld [vmem:[%s7709_s17 + $0x48] sm:$0xff] }
0x30db   :  { %v4351_v54 = vmul.f32 %v4349_v35, %v4148_v9 }
0x3147   :  { %v4354_v52 = vpop.permute.xlu0 %4353 }
0x3148   :  { %v4356_v36 = vmul.f32 %v4354_v52, %v4349_v35 }
0x314a   :  { %4358 = vrot.lane.b32.xlu1 %v4356_v36, %s6677_s4 }
0x31bc   :  { %v4359_v38 = vpop.permute.xlu1 %4358 }
0x31bd   :  { %v4361_v2 = vadd.f32 %v4359_v38, %v4351_v54  ;;  %v6368_v54 = vpack.c.bf16 %v5409_v37, %v5408_v34 }
0x31bf   :  { %6647 = vtanh.f32 %v4361_v2 }
0x31c9   :  { %v6648_v28 = vpop.eup %6647 }
0x31ca   :  { %4364 = vrot.lane.b32.xlu0 %v6648_v28, %s6675_s6 }
0x323c   :  { %v4365_v56 = vpop.permute.xlu0 %4364 }
0x323d   :  { %v4367_v60 = vmul.f32 %v4365_v56, %v4349_v35 }
0x323f   :  { %4369 = vrot.lane.b32.xlu1 %v4367_v60, %s6677_s4 }
0x32b1   :  { %v4370_v62 = vpop.permute.xlu1 %4369 }
0x32b2   :  { %4372 = vst.msk [vmem:[#allocation4 + $0x40] sm:$0xff] %vm77_vm1, %v4370_v62 }
0x32b9   :  { %v4385_v61 = vld [vmem:[#allocation4 + $0x40] sm:$0xff] }
0x32ba   :  { %5980 = vmatmul.mubr.msk.f32.gmra.mrb[54].mxu0 %vm77_vm1, %v4385_v61 }
0x32bb   :  { %5990 = vmatprep.mubr.msk.f32.mxu0 %vm77_vm1, %v4373_v1 }
0x32be   :  { %5991 = vmatmul.mubr.msk.f32.vlgmr.msra.gmra.mrb[48].mxu0 %vm77_vm1, %v7461_v42  ;;  %v4635_v42 = vld [vmem:[#allocation4 + $0x48] sm:$0xff] }
0x32bf   :  { %6347 = vmatpush3.bf16.msra.mxu0 %v6344_v58  ;;  %5993 = vmatprep.mubr.msk.f32.mxu0 %vm77_vm1, %v7471_v63 }
0x32c0   :  { %6349 = vmatprep.subr.bf16.mxu0 %v6348_v48 }
0x32c2   :  { %5994 = vmatmul.mubr.msk.f32.gmra.mrb[50].mxu0 %vm77_vm1, %v7475_v45 }
0x32c3   :  { %5996 = vmatprep.mubr.msk.f32.mxu0 %vm77_vm1, %v7481_v11  ;;  %6351 = vmatpush3.bf16.msra.mxu0 %v6348_v48 }
0x32c6   :  { %5997 = vmatmul.mubr.msk.f32.gmra.mrb[52].mxu0 %vm77_vm1, %v7485_v46 }
0x32c7   :  { %5999 = vmatprep.mubr.msk.f32.mxu0 %vm77_vm1, %v7489_v47 }
0x32ca   :  { %6000 = vmatmul.mubr.msk.f32.gmra.mrb[54].mxu0 %vm77_vm1, %v7522_v29 }
0x32cb   :  { %6010 = vmatprep.mubr.msk.f32.mxu0 %vm77_vm1, %v7471_v63  ;;  %v5388_v63 = vld [vmem:[%s7709_s17 + $0x20] sm:$0xff] }
0x32ce   :  { %6011 = vmatmul.mubr.msk.f32.vlgmr.msra.gmra.mrb[48].mxu0 %vm77_vm1, %v7475_v45  ;;  %v5389_v45 = vld [vmem:[%s7709_s17 + $0x28] sm:$0xff] }
0x32cf   :  { %6013 = vmatprep.mubr.msk.f32.mxu0 %vm77_vm1, %v7481_v11  ;;  %v6352_v11 = vpack.c.bf16 %v5389_v45, %v5388_v63 }
0x32d1   :  { %6353 = vmatprep.subr.bf16.mxu1 %v6352_v11 }
0x32d2   :  { %6014 = vmatmul.mubr.msk.f32.gmra.mrb[50].mxu0 %vm77_vm1, %v7485_v46  ;;  %6355 = vmatpush3.bf16.msra.mxu1 %v6352_v11  ;;  %v5390_v46 = vld [vmem:[%s7709_s17 + $0x30] sm:$0xff] }
0x32d3   :  { %6016 = vmatprep.mubr.msk.f32.mxu0 %vm77_vm1, %v7489_v47  ;;  %v5391_v47 = vld [vmem:[%s7709_s17 + $0x38] sm:$0xff] }
0x32d4   :  { %v6356_v41 = vpack.c.bf16 %v5391_v47, %v5390_v46 }
0x32d6   :  { %6017 = vmatmul.mubr.msk.f32.gmra.mrb[52].mxu0 %vm77_vm1, %v7522_v29  ;;  %6357 = vmatprep.subr.bf16.mxu1 %v6356_v41 }
0x32d7   :  { %6019 = vmatprep.mubr.msk.f32.mxu0 %vm77_vm1, %v4385_v61  ;;  %6359 = vmatpush3.bf16.msra.mxu1 %v6356_v41 }
0x32d8   :  { %6361 = vmatprep.subr.bf16.mxu1 %v6360_v15 }
0x32da   :  { %6020 = vmatmul.mubr.msk.f32.gmra.mrb[54].mxu0 %vm77_vm1, %v4635_v42 }
0x33a1   :  { %v6012_v6 = vpop.f32.mrb[48].mxu0 }
0x33a2   :  { %v4786_v57 = vadd.f32 %v6012_v6, %v5387_v44  ;;  %v4731_v20 = vpop.f32.mrb[49].mxu0 }
0x33a3   :  { %v4785_v7 = vadd.f32 %v5387_v44, %v4731_v20 }
0x33a4   :  { %v4794_v8 = vmax.f32 %v4786_v57, 0.0 }
0x33a5   :  { %v4793_v9 = vmax.f32 %v4785_v7, 0.0  ;;  %v6015_v10 = vpop.f32.mrb[50].mxu0 }
0x33a6   :  { %4802 = vst.msk [vmem:[#allocation3 + $0x10] sm:$0xff] %vm77_vm1, %v4794_v8  ;;  %v4788_v12 = vadd.f32 %v6015_v10, %v5387_v44  ;;  %v4741_v13 = vpop.f32.mrb[51].mxu0 }
0x33a7   :  { %4801 = vst.msk [vmem:[#allocation3 + $0x8] sm:$0xff] %vm77_vm1, %v4793_v9  ;;  %v4787_v14 = vadd.f32 %v5387_v44, %v4741_v13 }
0x33a8   :  { %v4796_v16 = vmax.f32 %v4788_v12, 0.0 }
0x33a9   :  { %v4795_v17 = vmax.f32 %v4787_v14, 0.0  ;;  %v6018_v18 = vpop.f32.mrb[52].mxu0 }
0x33aa   :  { %4804 = vst.msk [vmem:[#allocation3 + $0x20] sm:$0xff] %vm77_vm1, %v4796_v16  ;;  %v4790_v21 = vadd.f32 %v6018_v18, %v5387_v44  ;;  %v4751_v22 = vpop.f32.mrb[53].mxu0 }
0x33ab   :  { %4803 = vst.msk [vmem:[#allocation3 + $0x18] sm:$0xff] %vm77_vm1, %v4795_v17  ;;  %v4789_v24 = vadd.f32 %v5387_v44, %v4751_v22 }
0x33ac   :  { %v4798_v26 = vmax.f32 %v4790_v21, 0.0 }
0x33ad   :  { %v4797_v27 = vmax.f32 %v4789_v24, 0.0  ;;  %v6021_v29 = vpop.f32.mrb[54].mxu0  ;;  %v4811_v51 = vld [vmem:[#allocation3 + $0x10] sm:$0xff] }
0x33ae   :  { %4806 = vst.msk [vmem:[#allocation3 + $0x30] sm:$0xff] %vm77_vm1, %v4798_v26  ;;  %v4792_v30 = vadd.f32 %v6021_v29, %v5387_v44  ;;  %v4761_v31 = vpop.f32.mrb[55].mxu0  ;;  %v4810_v32 = vld [vmem:[#allocation3 + $0x8] sm:$0xff] }
0x33af   :  { %4805 = vst.msk [vmem:[#allocation3 + $0x28] sm:$0xff] %vm77_vm1, %v4797_v27  ;;  %v4791_v0 = vadd.f32 %v5387_v44, %v4761_v31  ;;  %6030 = vmatprep.mubr.msk.f32.mxu1 %vm77_vm1, %v4810_v32 }
0x33b0   :  { %v4800_v35 = vmax.f32 %v4792_v30, 0.0  ;;  %6031 = vmatmul.mubr.msk.f32.vlgmr.msra.gmra.mrb[38].mxu1 %vm77_vm1, %v4811_v51 }
0x33b1   :  { %v4799_v52 = vmax.f32 %v4791_v0, 0.0  ;;  %6363 = vmatpush3.bf16.msra.mxu1 %v6360_v15  ;;  %v4813_v38 = vld [vmem:[#allocation3 + $0x20] sm:$0xff] }
0x33b2   :  { %4808 = vst.msk [vmem:[#allocation3 + $0x40] sm:$0xff] %vm77_vm1, %v4800_v35  ;;  %v4812_v36 = vld [vmem:[#allocation3 + $0x18] sm:$0xff]  ;;  %6365 = vmatprep.subr.bf16.mxu1 %v6364_v33 }
0x33b3   :  { %4807 = vst.msk [vmem:[#allocation3 + $0x38] sm:$0xff] %vm77_vm1, %v4799_v52  ;;  %6033 = vmatprep.mubr.msk.f32.mxu1 %vm77_vm1, %v4812_v36 }
0x33b4   :  { %6034 = vmatmul.mubr.msk.f32.gmra.mrb[40].mxu1 %vm77_vm1, %v4813_v38 }
0x33b5   :  { %6367 = vmatpush3.bf16.msra.mxu1 %v6364_v33  ;;  %v4815_v39 = vld [vmem:[#allocation3 + $0x30] sm:$0xff] }
0x33b6   :  { %v4814_v2 = vld [vmem:[#allocation3 + $0x28] sm:$0xff]  ;;  %6369 = vmatprep.subr.bf16.mxu1 %v6368_v54 }
0x33b7   :  { %6036 = vmatprep.mubr.msk.f32.mxu1 %vm77_vm1, %v4814_v2 }
0x33b8   :  { %6037 = vmatmul.mubr.msk.f32.gmra.mrb[42].mxu1 %vm77_vm1, %v4815_v39 }
0x33b9   :  { %v4821_v28 = vld [vmem:[#allocation3 + $0x40] sm:$0xff] }
0x33ba   :  { %v4816_v43 = vld [vmem:[#allocation3 + $0x38] sm:$0xff] }
0x33bb   :  { %6039 = vmatprep.mubr.msk.f32.mxu1 %vm77_vm1, %v4816_v43 }
0x33bc   :  { %6040 = vmatmul.mubr.msk.f32.gmra.mrb[44].mxu1 %vm77_vm1, %v4821_v28 }
0x33bd   :  { %6050 = vmatprep.mubr.msk.f32.mxu1 %vm77_vm1, %v4809_v19 }
0x33c0   :  { %6051 = vmatmul.mubr.msk.f32.vlgmr.msra.gmra.mrb[38].mxu1 %vm77_vm1, %v4810_v32 }
0x33c1   :  { %6371 = vmatpush3.bf16.msra.mxu1 %v6368_v54  ;;  %6053 = vmatprep.mubr.msk.f32.mxu1 %vm77_vm1, %v4811_v51 }
0x33c2   :  { %6373 = vmatprep.subr.bf16.mxu1 %v6372_v53 }
0x33c4   :  { %6054 = vmatmul.mubr.msk.f32.gmra.mrb[40].mxu1 %vm77_vm1, %v4812_v36 }
0x33c5   :  { %6056 = vmatprep.mubr.msk.f32.mxu1 %vm77_vm1, %v4813_v38  ;;  %6375 = vmatpush3.bf16.msra.mxu1 %v6372_v53 }
0x33c8   :  { %6057 = vmatmul.mubr.msk.f32.gmra.mrb[42].mxu1 %vm77_vm1, %v4814_v2 }
0x33c9   :  { %6059 = vmatprep.mubr.msk.f32.mxu1 %vm77_vm1, %v4815_v39 }
0x33cc   :  { %6060 = vmatmul.mubr.msk.f32.gmra.mrb[44].mxu1 %vm77_vm1, %v4816_v43 }
0x33cd   :  { %6070 = vmatprep.mubr.msk.f32.mxu1 %vm77_vm1, %v4811_v51 }
0x33d0   :  { %6071 = vmatmul.mubr.msk.f32.vlgmr.msra.gmra.mrb[38].mxu1 %vm77_vm1, %v4812_v36 }
0x33d1   :  { %6073 = vmatprep.mubr.msk.f32.mxu1 %vm77_vm1, %v4813_v38 }
0x33d4   :  { %6074 = vmatmul.mubr.msk.f32.gmra.mrb[40].mxu1 %vm77_vm1, %v4814_v2 }
0x33d5   :  { %6076 = vmatprep.mubr.msk.f32.mxu1 %vm77_vm1, %v4815_v39 }
0x33d8   :  { %6077 = vmatmul.mubr.msk.f32.gmra.mrb[42].mxu1 %vm77_vm1, %v4816_v43 }
0x33d9   :  { %6079 = vmatprep.mubr.msk.f32.mxu1 %vm77_vm1, %v4821_v28 }
0x33dc   :  { %6080 = vmatmul.mubr.msk.f32.gmra.mrb[44].mxu1 %vm77_vm1, %v5071_v55 }
0x34a3   :  { %v6072_v56 = vpop.f32.mrb[38].mxu1 }
0x34a4   :  { %v5222_v58 = vadd.f32 %v6072_v56, %v5420_v23  ;;  %v5167_v60 = vpop.f32.mrb[39].mxu1 }
0x34a5   :  { %v5221_v62 = vadd.f32 %v5420_v23, %v5167_v60 }
0x34a6   :  { %5230 = vst.msk [vmem:[%s7711_s19 + $0x8] sm:$0xff] %vm74_vm0, %v5222_v58 }
0x34a7   :  { %5229 = vst.msk [vmem:[%s7711_s19] sm:$0xff] %vm74_vm0, %v5221_v62  ;;  %v6075_v1 = vpop.f32.mrb[40].mxu1 }
0x34a8   :  { %v5224_v61 = vadd.f32 %v6075_v1, %v5420_v23  ;;  %v5177_v3 = vpop.f32.mrb[41].mxu1 }
0x34a9   :  { %v5223_v40 = vadd.f32 %v5420_v23, %v5177_v3 }
0x34aa   :  { %5232 = vst.msk [vmem:[%s7711_s19 + $0x18] sm:$0xff] %vm74_vm0, %v5224_v61 }
0x34ab   :  { %5231 = vst.msk [vmem:[%s7711_s19 + $0x10] sm:$0xff] %vm74_vm0, %v5223_v40  ;;  %v6078_v48 = vpop.f32.mrb[42].mxu1 }
0x34ac   :  { %v5226_v42 = vadd.f32 %v6078_v48, %v5420_v23  ;;  %v5187_v63 = vpop.f32.mrb[43].mxu1 }
0x34ad   :  { %v5225_v45 = vadd.f32 %v5420_v23, %v5187_v63 }
0x34ae   :  { %5234 = vst.msk [vmem:[%s7711_s19 + $0x28] sm:$0xff] %vm74_vm0, %v5226_v42 }
0x34af   :  { %5233 = vst.msk [vmem:[%s7711_s19 + $0x20] sm:$0xff] %vm74_vm0, %v5225_v45  ;;  %v6081_v11 = vpop.f32.mrb[44].mxu1 }
0x34b0   :  { %v5228_v46 = vadd.f32 %v6081_v11, %v5420_v23  ;;  %v5197_v47 = vpop.f32.mrb[45].mxu1 }
0x34b1   :  { %v5227_v41 = vadd.f32 %v5420_v23, %v5197_v47 }
0x34b2   :  { %5236 = vst.msk [vmem:[%s7711_s19 + $0x38] sm:$0xff] %vm74_vm0, %v5228_v46 }
0x34b3   :  { %5235 = vst.msk [vmem:[%s7711_s19 + $0x30] sm:$0xff] %vm74_vm0, %v5227_v41 }
0x34b4   :  { %5241 = vsyncpa [#allocation6], 1 }

</bundles_post_ra>
